<compile_context>
chip_gen: v5e
topology: v5e:2x2
jax: 0.10.0
libtpu: 0.0.40
codegen_flags: <defaults>
</compile_context>

<pallas_src>
import functools
import numpy as np

import jax
import jax.numpy as jnp
from jax.experimental import pallas as pl
from jax.experimental.pallas import tpu as pltpu


# ----------------------------------------------------------------------------
# Pallas kernel: one grid step == WB windows.
# qkv projection -> per-head window-batched scaled dot-product attention with
# (relative-position-bias + mask) additive bias -> softmax -> attn @ v ->
# output projection.  Everything stays in VMEM.
# ----------------------------------------------------------------------------
def _win_attn_kernel(x_ref, wqkv_ref, bqkv_ref, bias_ref, wproj_ref, bproj_ref,
                     o_ref, ctx_ref, *, num_heads, approx_recip):
    WB, N, C = x_ref.shape
    hd = C // num_heads
    G = bias_ref.shape[0]          # windows covered by the bias block (mask period or 1)
    assert WB % G == 0

    # Fused QKV projection over the whole window batch; f32 -> bf16 cast happens
    # here (VPU, hidden under the matmul) instead of in the wrapper.
    x2d = x_ref[...].reshape(WB * N, C).astype(jnp.bfloat16)
    qkv = jnp.dot(x2d, wqkv_ref[...], preferred_element_type=jnp.float32)
    qkv = qkv + bqkv_ref[...]                                   # (WB*N, 3C) f32
    # NOTE: scale is already folded into the q-columns of wqkv / bqkv.

    # Static loop over heads; each matmul is batched over the WB windows (single
    # batch dim -> supported batched dot_general on the MXU).
    for h in range(num_heads):
        qh = qkv[:, h * hd:(h + 1) * hd].reshape(WB, N, hd).astype(jnp.bfloat16)
        kh = qkv[:, C + h * hd:C + (h + 1) * hd].reshape(WB, N, hd).astype(jnp.bfloat16)
        vh = qkv[:, 2 * C + h * hd:2 * C + (h + 1) * hd].reshape(WB, N, hd).astype(jnp.bfloat16)

        # scores: contract last dims directly (no k.T materialization).
        s = jnp.einsum("bnd,bmd->bnm", qh, kh,
                       preferred_element_type=jnp.float32)      # (WB, N, N) f32

        # relative-position bias (+mask): bias block is (G, H, N, N), resident;
        # regroup the WB windows by the nW-periodic mask pattern and add.
        s = (s.reshape(WB // G, G, N, N) + bias_ref[:, h][None]).reshape(WB, N, N)

        # numerically-stable softmax in f32; reciprocal runs on the EUP.
        s = s - jnp.max(s, axis=-1, keepdims=True)
        p = jnp.exp(s)
        denom = jnp.sum(p, axis=-1, keepdims=True)
        if approx_recip:
            p = p * pl.reciprocal(denom, approx=True)
        else:
            p = p / denom

        ctx_h = jnp.einsum("bnm,bmd->bnd", p.astype(jnp.bfloat16), vh,
                           preferred_element_type=jnp.float32)  # (WB, N, hd) f32
        # "concat heads" by writing into the scratch column slot -> bounds liveness.
        ctx_ref[:, h * hd:(h + 1) * hd] = ctx_h.reshape(WB * N, hd)

    y = jnp.dot(ctx_ref[...].astype(jnp.bfloat16), wproj_ref[...],
                preferred_element_type=jnp.float32) + bproj_ref[...]
    o_ref[...] = y.reshape(WB, N, C).astype(o_ref.dtype)


# ----------------------------------------------------------------------------
# Generation-aware VMEM capacity / window-batch selection.
# ----------------------------------------------------------------------------
def _tpu_vmem_capacity_bytes(default=64 << 20):
    """Physical VMEM per core (128 MiB on v5e/v6e, 64 MiB on v7x)."""
    try:
        info = pltpu.get_tpu_info()
        cap = int(getattr(info, "vmem_capacity_bytes", 0))
        if cap > 0:
            return cap
    except Exception:
        pass
    return default


def _largest_divisor_leq(n, cap):
    cap = max(1, min(n, cap))
    for d in range(cap, 0, -1):
        if n % d == 0:
            return d
    return 1


def _choose_window_batch(B_, nW, N, C, num_heads, has_mask, budget_bytes):
    hd = C // num_heads
    # Per-window VMEM footprint (double-buffered x/out blocks, fused qkv, ctx
    # scratch + proj temporaries, and ~2 heads' worth of live score/prob temps).
    per_win = (
        2 * N * C * 4                 # x block (f32), double-buffered
        + 2 * N * C * 4               # out block (f32), double-buffered
        + N * 3 * C * 4               # fused qkv activations (f32)
        + N * C * 4                   # ctx scratch (f32)
        + N * C * (2 + 4)             # ctx bf16 + y f32 for the output projection
        + 2 * (3 * N * hd * 2         # ~2 heads live: q/k/v bf16
               + 2 * N * N * 4        #                scores + probs f32
               + N * N * 2            #                probs bf16
               + N * hd * 4)          #                ctx_h f32
    )
    # Grid-invariant residents: weights, biases, bias(+mask) slab (f32).
    fixed = (C * 3 * C * 2 + C * C * 2 + 16 * C
             + (nW if has_mask else 1) * num_heads * N * N * 4)
    cap = max(1, (budget_bytes - fixed) // max(per_win, 1))
    # Keep >= 2 grid steps so a "parallel" grid axis feeds both v7x TensorCores.
    cap = min(cap, max(1, B_ // 2))

    if has_mask:
        assert B_ % nW == 0, "B_ must be a multiple of the number of mask windows"
        batch = B_ // nW
        if cap >= nW:
            # WB = nW * g keeps every block aligned to the nW-periodic mask pattern,
            # so one resident (nW, H, N, N) bias slab serves every grid step.
            g = _largest_divisor_leq(batch, cap // nW)
            return nW * g
        # Huge-window fallback: WB divides nW; bias is streamed in WB-slices.
        return _largest_divisor_leq(nW, cap)
    return _largest_divisor_leq(B_, cap)


# ----------------------------------------------------------------------------
# Wrapper
# ----------------------------------------------------------------------------
def window_attention_pallas(x, params, window_size, num_heads, mask=None,
                            approx_softmax_recip=True):
    """x: (B_, N, C) float32.  mask: (nW, N, N) additive (0 / -inf style) or None."""
    B_, N, C = x.shape
    assert C % num_heads == 0
    hd = C // num_heads
    scale = hd ** (-0.5)

    # --- relative position bias gather (plain JAX glue, outside the kernel) ---
    rel_index = _relative_position_index(window_size)             # (N, N) int
    table = params["rel_pos_table"]                               # (T, H)
    idx = rel_index.reshape(-1)
    # torch-style negative-index wrap (the module's quirky index computation can
    # produce small negative indices; torch tensor indexing wraps them).
    idx = np.where(idx < 0, idx + table.shape[0], idx)
    rel_bias = table[idx].reshape(N, N, num_heads)                # (N, N, H)
    rel_bias = jnp.transpose(rel_bias, (2, 0, 1)).astype(jnp.float32)  # (H, N, N)

    has_mask = mask is not None
    nW = int(mask.shape[0]) if has_mask else 1

    # Generation-aware VMEM budgeting (v5e/v6e: 128 MiB, v7x: 64 MiB physical).
    vmem_cap = _tpu_vmem_capacity_bytes()
    budget_bytes = int(vmem_cap * 0.45)
    vmem_limit = int(vmem_cap * 0.75)

    WB = _choose_window_batch(B_, nW, N, C, num_heads, has_mask, budget_bytes)
    assert B_ % WB == 0
    grid = (B_ // WB,)

    # bias (+ mask) slab, f32 (small, un-tiled, VMEM-resident when constant-indexed).
    if has_mask:
        bias_arr = (rel_bias[None, :, :, :] + mask[:, None, :, :]).astype(jnp.float32)
        bias_resident = (WB % nW == 0)
        if bias_resident:
            bias_block = (nW, num_heads, N, N)
        else:
            nblk = nW // WB
            bias_block = (WB, num_heads, N, N)
            bias_index_map = lambda b: (b % nblk, 0, 0, 0)        # streamed WB-slices
    else:
        bias_arr = rel_bias[None].astype(jnp.float32)             # (1, H, N, N)
        bias_resident = True
        bias_block = (1, num_heads, N, N)

    # Fold the attention scale into the q-columns of the qkv projection (one-time,
    # zero in-kernel cost).  Weights go bf16 for the MXU; biases stay f32.
    q_scale = jnp.concatenate([jnp.full((C,), scale, jnp.float32),
                               jnp.ones((2 * C,), jnp.float32)])
    wqkv = (params["wqkv"].astype(jnp.float32) * q_scale[None, :]).astype(jnp.bfloat16)
    bqkv = (params["bqkv"].astype(jnp.float32) * q_scale)[None]           # (1, 3C) f32
    wproj = params["wproj"].astype(jnp.bfloat16)                          # (C, C)
    bproj = params["bproj"].astype(jnp.float32)[None]                     # (1, C)

    kernel = functools.partial(_win_attn_kernel, num_heads=num_heads,
                               approx_recip=approx_softmax_recip)

    def run(single_buffer):
        def resident(block_shape):
            rank = len(block_shape)
            idx_map = lambda b: (0,) * rank
            if single_buffer:
                # Constant-index operands don't need a second pipeline buffer.
                return pl.BlockSpec(block_shape, idx_map, pipeline_mode=pl.Buffered(1))
            return pl.BlockSpec(block_shape, idx_map)

        if bias_resident:
            bias_spec = resident(bias_block)
        else:
            bias_spec = pl.BlockSpec(bias_block, bias_index_map)

        return pl.pallas_call(
            kernel,
            out_shape=jax.ShapeDtypeStruct((B_, N, C), x.dtype),
            grid=grid,
            in_specs=[
                pl.BlockSpec((WB, N, C), lambda b: (b, 0, 0)),    # x (f32, cast in-kernel)
                resident((C, 3 * C)),                             # qkv weight (bf16, q-scaled)
                resident((1, 3 * C)),                             # qkv bias   (f32, q-scaled)
                bias_spec,                                        # rel-pos bias (+mask), f32
                resident((C, C)),                                 # proj weight (bf16)
                resident((1, C)),                                 # proj bias   (f32)
            ],
            out_specs=pl.BlockSpec((WB, N, C), lambda b: (b, 0, 0)),
            scratch_shapes=[pltpu.VMEM((WB * N, C), jnp.float32)],  # ctx "concat" buffer
            compiler_params=pltpu.CompilerParams(
                dimension_semantics=("parallel",),   # windows are independent
                vmem_limit_bytes=vmem_limit,
            ),
        )(x, wqkv, bqkv, bias_arr, wproj, bproj)

    try:
        return run(single_buffer=True)
    except Exception:
        # pipeline_mode=pl.Buffered(1) unsupported on this jax build -> default
        # double-buffering of the (small) resident operands; kernel is identical.
        return run(single_buffer=False)


def _relative_position_index(window_size):
    """Reproduces the (quirky) PyTorch index computation exactly: axis 2 is left
    unshifted/unscaled and axes 0/1 use only the (Wd-1)/(Wh-1) shift and the
    single *(2*Wh-1) scaling, exactly as written in the original module."""
    Wd, Wh, Ww = window_size
    coords = np.stack(np.meshgrid(np.arange(Wd), np.arange(Wh), np.arange(Ww),
                                  indexing="ij"))                     # (3, Wd, Wh, Ww)
    coords_flatten = coords.reshape(3, -1)                            # (3, N)
    rel = coords_flatten[:, :, None] - coords_flatten[:, None, :]     # (3, N, N)
    rel = np.transpose(rel, (1, 2, 0)).astype(np.int64)               # (N, N, 3)
    rel[:, :, 0] += Wd - 1
    rel[:, :, 1] += Wh - 1
    rel[:, :, 0] *= 2 * Wh - 1
    return rel.sum(-1)                                                # (N, N)


# ----------------------------------------------------------------------------
# Pure-JAX reference (correctness check only; full f32 math)
# ----------------------------------------------------------------------------
def window_attention_ref(x, params, window_size, num_heads, mask=None):
    B_, N, C = x.shape
    hd = C // num_heads
    scale = hd ** (-0.5)
    qkv = x @ params["wqkv"] + params["bqkv"]                  # (B_, N, 3C)
    qkv = qkv.reshape(B_, N, 3, num_heads, hd).transpose(2, 0, 3, 1, 4)
    q, k, v = qkv[0], qkv[1], qkv[2]                           # (B_, H, N, hd)
    q = q * scale
    attn = jnp.einsum("bhnd,bhmd->bhnm", q, k)                 # (B_, H, N, N)

    rel_index = _relative_position_index(window_size)
    table = params["rel_pos_table"]
    idx = rel_index.reshape(-1)
    idx = np.where(idx < 0, idx + table.shape[0], idx)
    rel_bias = table[idx].reshape(N, N, num_heads).transpose(2, 0, 1)
    attn = attn + rel_bias[None]

    if mask is not None:
        nW = mask.shape[0]
        attn = attn.reshape(B_ // nW, nW, num_heads, N, N) + mask[None, :, None]
        attn = attn.reshape(B_, num_heads, N, N)
    attn = jax.nn.softmax(attn, axis=-1)
    out = jnp.einsum("bhnm,bhmd->bhnd", attn, v)               # (B_, H, N, hd)
    out = out.transpose(0, 2, 1, 3).reshape(B_, N, C)
    return out @ params["wproj"] + params["bproj"]


# ----------------------------------------------------------------------------
if __name__ == "__main__":
    # Small, module-consistent shapes.
    dim = 32
    num_heads = 4
    window_size = (2, 2, 2)
    N = window_size[0] * window_size[1] * window_size[2]     # 8
    batch = 2
    nW = 4
    B_ = batch * nW                                          # 8

    key = jax.random.PRNGKey(0)
    kx, kt, k1, k2, k3, k4 = jax.random.split(key, 6)

    x = jax.random.normal(kx, (B_, N, dim), dtype=jnp.float32)

    table_size = (2 * window_size[0] - 1) * (2 * window_size[1] - 1) * (2 * window_size[2] - 1)
    params = {
        # trunc_normal_(std=0.02)
        "rel_pos_table": 0.02 * jax.random.truncated_normal(
            kt, -2.0, 2.0, (table_size, num_heads), dtype=jnp.float32),
        "wqkv": 0.05 * jax.random.normal(k1, (dim, 3 * dim), dtype=jnp.float32),
        "bqkv": 0.01 * jax.random.normal(k2, (3 * dim,), dtype=jnp.float32),
        "wproj": 0.05 * jax.random.normal(k3, (dim, dim), dtype=jnp.float32),
        "bproj": 0.01 * jax.random.normal(k4, (dim,), dtype=jnp.float32),
    }

    # Synthetic shifted-window style (0 / large-negative) additive mask.
    mask_np = np.zeros((nW, N, N), np.float32)
    for w in range(nW):
        g = (np.arange(N) + w) % 2
        mask_np[w] = np.where(g[:, None] == g[None, :], 0.0, -1e9)
    mask = jnp.asarray(mask_np)

    # TODO(synk): attn_drop / proj_drop are identity in eval mode and omitted here.

    # masked (shifted-window) path
    out = jax.block_until_ready(
        window_attention_pallas(x, params, window_size, num_heads, mask=mask))
    ref = window_attention_ref(x, params, window_size, num_heads, mask=mask)
    np.testing.assert_allclose(np.asarray(out), np.asarray(ref), rtol=2e-2, atol=2e-2)

    # unmasked (non-shifted-window) path
    out_nm = jax.block_until_ready(
        window_attention_pallas(x, params, window_size, num_heads, mask=None))
    ref_nm = window_attention_ref(x, params, window_size, num_heads, mask=None)
    np.testing.assert_allclose(np.asarray(out_nm), np.asarray(ref_nm), rtol=2e-2, atol=2e-2)

    print("KERNEL_OK")
</pallas_src>

<mosaic_0001>
module attributes {stable_mosaic.version = 11 : i64} {
  func.func @_win_attn_kernel(%arg0: i32, %arg1: memref<4x8x32xf32, #tpu.memory_space<vmem>>, %arg2: memref<32x96xbf16, #tpu.memory_space<vmem>>, %arg3: memref<1x96xf32, #tpu.memory_space<vmem>>, %arg4: memref<4x4x8x8xf32, #tpu.memory_space<vmem>>, %arg5: memref<32x32xbf16, #tpu.memory_space<vmem>>, %arg6: memref<1x32xf32, #tpu.memory_space<vmem>>, %arg7: memref<4x8x32xf32, #tpu.memory_space<vmem>>, %arg8: memref<32x32xf32, #tpu.memory_space<vmem>>) attributes {dimension_semantics = [#tpu.dimension_semantics<parallel>], iteration_bounds = array<i64: 2>, scalar_prefetch = 0 : i64, scratch_operands = 1 : i64, tpu.core_type = #tpu.core_type<tc>, window_params = [{transform_indices = @transform_0, window_bounds = array<i64: 4, 8, 32>}, {pipeline_mode = #tpu.pipeline_mode<synchronous>, transform_indices = @transform_1, window_bounds = array<i64: 32, 96>}, {pipeline_mode = #tpu.pipeline_mode<synchronous>, transform_indices = @transform_2, window_bounds = array<i64: 1, 96>}, {pipeline_mode = #tpu.pipeline_mode<synchronous>, transform_indices = @transform_3, window_bounds = array<i64: 4, 4, 8, 8>}, {pipeline_mode = #tpu.pipeline_mode<synchronous>, transform_indices = @transform_4, window_bounds = array<i64: 32, 32>}, {pipeline_mode = #tpu.pipeline_mode<synchronous>, transform_indices = @transform_5, window_bounds = array<i64: 1, 32>}, {transform_indices = @transform_6, window_bounds = array<i64: 4, 8, 32>}]} {
    %c0 = arith.constant 0 : index
    %c0_0 = arith.constant 0 : index
    %c0_1 = arith.constant 0 : index
    %0 = vector.load %arg1[%c0, %c0_0, %c0_1] : memref<4x8x32xf32, #tpu.memory_space<vmem>>, vector<4x8x32xf32>
    %1 = vector.shape_cast %0 : vector<4x8x32xf32> to vector<32x32xf32>
    %2 = arith.truncf %1 : vector<32x32xf32> to vector<32x32xbf16>
    %c0_2 = arith.constant 0 : index
    %c0_3 = arith.constant 0 : index
    %3 = vector.load %arg2[%c0_2, %c0_3] : memref<32x96xbf16, #tpu.memory_space<vmem>>, vector<32x96xbf16>
    %cst = arith.constant dense<0.000000e+00> : vector<32x96xf32>
    %4 = tpu.matmul %2, %3, %cst {dimension_numbers = #tpu.dot_dimension_numbers<[1], [0], [0], [1], [0, 0, 1, 1], [], []>} : vector<32x32xbf16>, vector<32x96xbf16>, vector<32x96xf32> -> vector<32x96xf32>
    %c0_4 = arith.constant 0 : index
    %c0_5 = arith.constant 0 : index
    %5 = vector.load %arg3[%c0_4, %c0_5] : memref<1x96xf32, #tpu.memory_space<vmem>>, vector<1x96xf32>
    %6 = vector.broadcast %5 : vector<1x96xf32> to vector<32x96xf32>
    %7 = arith.addf %4, %6 : vector<32x96xf32>
    %8 = vector.extract_strided_slice %7 {offsets = [0, 0], sizes = [32, 8], strides = [1, 1]} : vector<32x96xf32> to vector<32x8xf32>
    %9 = vector.shape_cast %8 : vector<32x8xf32> to vector<4x8x8xf32>
    %10 = arith.truncf %9 : vector<4x8x8xf32> to vector<4x8x8xbf16>
    %11 = vector.extract_strided_slice %7 {offsets = [0, 32], sizes = [32, 8], strides = [1, 1]} : vector<32x96xf32> to vector<32x8xf32>
    %12 = vector.shape_cast %11 : vector<32x8xf32> to vector<4x8x8xf32>
    %13 = arith.truncf %12 : vector<4x8x8xf32> to vector<4x8x8xbf16>
    %14 = vector.extract_strided_slice %7 {offsets = [0, 64], sizes = [32, 8], strides = [1, 1]} : vector<32x96xf32> to vector<32x8xf32>
    %15 = vector.shape_cast %14 : vector<32x8xf32> to vector<4x8x8xf32>
    %16 = arith.truncf %15 : vector<4x8x8xf32> to vector<4x8x8xbf16>
    "tpu.trace_start"() <{level = 10 : i32, message = "bnd,bmd->bnm"}> : () -> ()
    %cst_6 = arith.constant dense<0.000000e+00> : vector<4x8x8xf32>
    %17 = tpu.matmul %10, %13, %cst_6 {dimension_numbers = #tpu.dot_dimension_numbers<[2], [2], [1], [1], [0, 0, 0, 1, 1, 1], [0], [0]>} : vector<4x8x8xbf16>, vector<4x8x8xbf16>, vector<4x8x8xf32> -> vector<4x8x8xf32>
    "tpu.trace_stop"() : () -> ()
    %18 = vector.shape_cast %17 : vector<4x8x8xf32> to vector<1x4x8x8xf32>
    %c0_7 = arith.constant 0 : index
    %c0_8 = arith.constant 0 : index
    %c0_9 = arith.constant 0 : index
    %c0_10 = arith.constant 0 : index
    %19 = vector.load %arg4[%c0_7, %c0_8, %c0_9, %c0_10] : memref<4x4x8x8xf32, #tpu.memory_space<vmem>>, vector<4x1x8x8xf32>
    %20 = vector.shape_cast %19 : vector<4x1x8x8xf32> to vector<4x8x8xf32>
    %21 = vector.shape_cast %20 : vector<4x8x8xf32> to vector<1x4x8x8xf32>
    %22 = arith.addf %18, %21 : vector<1x4x8x8xf32>
    %23 = vector.shape_cast %22 : vector<1x4x8x8xf32> to vector<4x8x8xf32>
    %cst_11 = arith.constant dense<0xFF800000> : vector<4x8xf32>
    %24 = vector.multi_reduction <maximumf>, %23, %cst_11 [2] : vector<4x8x8xf32> to vector<4x8xf32>
    %25 = vector.shape_cast %24 : vector<4x8xf32> to vector<4x8x1xf32>
    %26 = vector.broadcast %25 : vector<4x8x1xf32> to vector<4x8x8xf32>
    %27 = arith.subf %23, %26 : vector<4x8x8xf32>
    %28 = math.exp %27 : vector<4x8x8xf32>
    %cst_12 = arith.constant dense<0.000000e+00> : vector<4x8xf32>
    %29 = vector.multi_reduction <add>, %28, %cst_12 [2] : vector<4x8x8xf32> to vector<4x8xf32>
    %30 = vector.shape_cast %29 : vector<4x8xf32> to vector<4x8x1xf32>
    %31 = tpu.reciprocal %30 {approx = true} : vector<4x8x1xf32> -> vector<4x8x1xf32>
    %32 = vector.broadcast %31 : vector<4x8x1xf32> to vector<4x8x8xf32>
    %33 = arith.mulf %28, %32 : vector<4x8x8xf32>
    %34 = arith.truncf %33 : vector<4x8x8xf32> to vector<4x8x8xbf16>
    "tpu.trace_start"() <{level = 10 : i32, message = "bnm,bmd->bnd"}> : () -> ()
    %cst_13 = arith.constant dense<0.000000e+00> : vector<4x8x8xf32>
    %35 = tpu.matmul %34, %16, %cst_13 {dimension_numbers = #tpu.dot_dimension_numbers<[2], [1], [1], [2], [0, 0, 0, 1, 1, 2], [0], [0]>} : vector<4x8x8xbf16>, vector<4x8x8xbf16>, vector<4x8x8xf32> -> vector<4x8x8xf32>
    "tpu.trace_stop"() : () -> ()
    %36 = vector.shape_cast %35 : vector<4x8x8xf32> to vector<32x8xf32>
    %c0_14 = arith.constant 0 : index
    %c0_15 = arith.constant 0 : index
    %37 = vector.load %arg8[%c0_14, %c0_15] : memref<32x32xf32, #tpu.memory_space<vmem>>, vector<32x8xf32>
    tpu.vector_store %arg8[%c0_14, %c0_15], %36 {strides = array<i32>} : memref<32x32xf32, #tpu.memory_space<vmem>>, vector<32x8xf32>,
    %38 = vector.extract_strided_slice %7 {offsets = [0, 8], sizes = [32, 8], strides = [1, 1]} : vector<32x96xf32> to vector<32x8xf32>
    %39 = vector.shape_cast %38 : vector<32x8xf32> to vector<4x8x8xf32>
    %40 = arith.truncf %39 : vector<4x8x8xf32> to vector<4x8x8xbf16>
    %41 = vector.extract_strided_slice %7 {offsets = [0, 40], sizes = [32, 8], strides = [1, 1]} : vector<32x96xf32> to vector<32x8xf32>
    %42 = vector.shape_cast %41 : vector<32x8xf32> to vector<4x8x8xf32>
    %43 = arith.truncf %42 : vector<4x8x8xf32> to vector<4x8x8xbf16>
    %44 = vector.extract_strided_slice %7 {offsets = [0, 72], sizes = [32, 8], strides = [1, 1]} : vector<32x96xf32> to vector<32x8xf32>
    %45 = vector.shape_cast %44 : vector<32x8xf32> to vector<4x8x8xf32>
    %46 = arith.truncf %45 : vector<4x8x8xf32> to vector<4x8x8xbf16>
    "tpu.trace_start"() <{level = 10 : i32, message = "bnd,bmd->bnm"}> : () -> ()
    %cst_16 = arith.constant dense<0.000000e+00> : vector<4x8x8xf32>
    %47 = tpu.matmul %40, %43, %cst_16 {dimension_numbers = #tpu.dot_dimension_numbers<[2], [2], [1], [1], [0, 0, 0, 1, 1, 1], [0], [0]>} : vector<4x8x8xbf16>, vector<4x8x8xbf16>, vector<4x8x8xf32> -> vector<4x8x8xf32>
    "tpu.trace_stop"() : () -> ()
    %48 = vector.shape_cast %47 : vector<4x8x8xf32> to vector<1x4x8x8xf32>
    %c0_17 = arith.constant 0 : index
    %c1 = arith.constant 1 : index
    %c0_18 = arith.constant 0 : index
    %c0_19 = arith.constant 0 : index
    %49 = vector.load %arg4[%c0_17, %c1, %c0_18, %c0_19] : memref<4x4x8x8xf32, #tpu.memory_space<vmem>>, vector<4x1x8x8xf32>
    %50 = vector.shape_cast %49 : vector<4x1x8x8xf32> to vector<4x8x8xf32>
    %51 = vector.shape_cast %50 : vector<4x8x8xf32> to vector<1x4x8x8xf32>
    %52 = arith.addf %48, %51 : vector<1x4x8x8xf32>
    %53 = vector.shape_cast %52 : vector<1x4x8x8xf32> to vector<4x8x8xf32>
    %cst_20 = arith.constant dense<0xFF800000> : vector<4x8xf32>
    %54 = vector.multi_reduction <maximumf>, %53, %cst_20 [2] : vector<4x8x8xf32> to vector<4x8xf32>
    %55 = vector.shape_cast %54 : vector<4x8xf32> to vector<4x8x1xf32>
    %56 = vector.broadcast %55 : vector<4x8x1xf32> to vector<4x8x8xf32>
    %57 = arith.subf %53, %56 : vector<4x8x8xf32>
    %58 = math.exp %57 : vector<4x8x8xf32>
    %cst_21 = arith.constant dense<0.000000e+00> : vector<4x8xf32>
    %59 = vector.multi_reduction <add>, %58, %cst_21 [2] : vector<4x8x8xf32> to vector<4x8xf32>
    %60 = vector.shape_cast %59 : vector<4x8xf32> to vector<4x8x1xf32>
    %61 = tpu.reciprocal %60 {approx = true} : vector<4x8x1xf32> -> vector<4x8x1xf32>
    %62 = vector.broadcast %61 : vector<4x8x1xf32> to vector<4x8x8xf32>
    %63 = arith.mulf %58, %62 : vector<4x8x8xf32>
    %64 = arith.truncf %63 : vector<4x8x8xf32> to vector<4x8x8xbf16>
    "tpu.trace_start"() <{level = 10 : i32, message = "bnm,bmd->bnd"}> : () -> ()
    %cst_22 = arith.constant dense<0.000000e+00> : vector<4x8x8xf32>
    %65 = tpu.matmul %64, %46, %cst_22 {dimension_numbers = #tpu.dot_dimension_numbers<[2], [1], [1], [2], [0, 0, 0, 1, 1, 2], [0], [0]>} : vector<4x8x8xbf16>, vector<4x8x8xbf16>, vector<4x8x8xf32> -> vector<4x8x8xf32>
    "tpu.trace_stop"() : () -> ()
    %66 = vector.shape_cast %65 : vector<4x8x8xf32> to vector<32x8xf32>
    %c0_23 = arith.constant 0 : index
    %c8 = arith.constant 8 : index
    %67 = vector.load %arg8[%c0_23, %c8] : memref<32x32xf32, #tpu.memory_space<vmem>>, vector<32x8xf32>
    tpu.vector_store %arg8[%c0_23, %c8], %66 {strides = array<i32>} : memref<32x32xf32, #tpu.memory_space<vmem>>, vector<32x8xf32>,
    %68 = vector.extract_strided_slice %7 {offsets = [0, 16], sizes = [32, 8], strides = [1, 1]} : vector<32x96xf32> to vector<32x8xf32>
    %69 = vector.shape_cast %68 : vector<32x8xf32> to vector<4x8x8xf32>
    %70 = arith.truncf %69 : vector<4x8x8xf32> to vector<4x8x8xbf16>
    %71 = vector.extract_strided_slice %7 {offsets = [0, 48], sizes = [32, 8], strides = [1, 1]} : vector<32x96xf32> to vector<32x8xf32>
    %72 = vector.shape_cast %71 : vector<32x8xf32> to vector<4x8x8xf32>
    %73 = arith.truncf %72 : vector<4x8x8xf32> to vector<4x8x8xbf16>
    %74 = vector.extract_strided_slice %7 {offsets = [0, 80], sizes = [32, 8], strides = [1, 1]} : vector<32x96xf32> to vector<32x8xf32>
    %75 = vector.shape_cast %74 : vector<32x8xf32> to vector<4x8x8xf32>
    %76 = arith.truncf %75 : vector<4x8x8xf32> to vector<4x8x8xbf16>
    "tpu.trace_start"() <{level = 10 : i32, message = "bnd,bmd->bnm"}> : () -> ()
    %cst_24 = arith.constant dense<0.000000e+00> : vector<4x8x8xf32>
    %77 = tpu.matmul %70, %73, %cst_24 {dimension_numbers = #tpu.dot_dimension_numbers<[2], [2], [1], [1], [0, 0, 0, 1, 1, 1], [0], [0]>} : vector<4x8x8xbf16>, vector<4x8x8xbf16>, vector<4x8x8xf32> -> vector<4x8x8xf32>
    "tpu.trace_stop"() : () -> ()
    %78 = vector.shape_cast %77 : vector<4x8x8xf32> to vector<1x4x8x8xf32>
    %c0_25 = arith.constant 0 : index
    %c2 = arith.constant 2 : index
    %c0_26 = arith.constant 0 : index
    %c0_27 = arith.constant 0 : index
    %79 = vector.load %arg4[%c0_25, %c2, %c0_26, %c0_27] : memref<4x4x8x8xf32, #tpu.memory_space<vmem>>, vector<4x1x8x8xf32>
    %80 = vector.shape_cast %79 : vector<4x1x8x8xf32> to vector<4x8x8xf32>
    %81 = vector.shape_cast %80 : vector<4x8x8xf32> to vector<1x4x8x8xf32>
    %82 = arith.addf %78, %81 : vector<1x4x8x8xf32>
    %83 = vector.shape_cast %82 : vector<1x4x8x8xf32> to vector<4x8x8xf32>
    %cst_28 = arith.constant dense<0xFF800000> : vector<4x8xf32>
    %84 = vector.multi_reduction <maximumf>, %83, %cst_28 [2] : vector<4x8x8xf32> to vector<4x8xf32>
    %85 = vector.shape_cast %84 : vector<4x8xf32> to vector<4x8x1xf32>
    %86 = vector.broadcast %85 : vector<4x8x1xf32> to vector<4x8x8xf32>
    %87 = arith.subf %83, %86 : vector<4x8x8xf32>
    %88 = math.exp %87 : vector<4x8x8xf32>
    %cst_29 = arith.constant dense<0.000000e+00> : vector<4x8xf32>
    %89 = vector.multi_reduction <add>, %88, %cst_29 [2] : vector<4x8x8xf32> to vector<4x8xf32>
    %90 = vector.shape_cast %89 : vector<4x8xf32> to vector<4x8x1xf32>
    %91 = tpu.reciprocal %90 {approx = true} : vector<4x8x1xf32> -> vector<4x8x1xf32>
    %92 = vector.broadcast %91 : vector<4x8x1xf32> to vector<4x8x8xf32>
    %93 = arith.mulf %88, %92 : vector<4x8x8xf32>
    %94 = arith.truncf %93 : vector<4x8x8xf32> to vector<4x8x8xbf16>
    "tpu.trace_start"() <{level = 10 : i32, message = "bnm,bmd->bnd"}> : () -> ()
    %cst_30 = arith.constant dense<0.000000e+00> : vector<4x8x8xf32>
    %95 = tpu.matmul %94, %76, %cst_30 {dimension_numbers = #tpu.dot_dimension_numbers<[2], [1], [1], [2], [0, 0, 0, 1, 1, 2], [0], [0]>} : vector<4x8x8xbf16>, vector<4x8x8xbf16>, vector<4x8x8xf32> -> vector<4x8x8xf32>
    "tpu.trace_stop"() : () -> ()
    %96 = vector.shape_cast %95 : vector<4x8x8xf32> to vector<32x8xf32>
    %c0_31 = arith.constant 0 : index
    %c16 = arith.constant 16 : index
    %97 = vector.load %arg8[%c0_31, %c16] : memref<32x32xf32, #tpu.memory_space<vmem>>, vector<32x8xf32>
    tpu.vector_store %arg8[%c0_31, %c16], %96 {strides = array<i32>} : memref<32x32xf32, #tpu.memory_space<vmem>>, vector<32x8xf32>,
    %98 = vector.extract_strided_slice %7 {offsets = [0, 24], sizes = [32, 8], strides = [1, 1]} : vector<32x96xf32> to vector<32x8xf32>
    %99 = vector.shape_cast %98 : vector<32x8xf32> to vector<4x8x8xf32>
    %100 = arith.truncf %99 : vector<4x8x8xf32> to vector<4x8x8xbf16>
    %101 = vector.extract_strided_slice %7 {offsets = [0, 56], sizes = [32, 8], strides = [1, 1]} : vector<32x96xf32> to vector<32x8xf32>
    %102 = vector.shape_cast %101 : vector<32x8xf32> to vector<4x8x8xf32>
    %103 = arith.truncf %102 : vector<4x8x8xf32> to vector<4x8x8xbf16>
    %104 = vector.extract_strided_slice %7 {offsets = [0, 88], sizes = [32, 8], strides = [1, 1]} : vector<32x96xf32> to vector<32x8xf32>
    %105 = vector.shape_cast %104 : vector<32x8xf32> to vector<4x8x8xf32>
    %106 = arith.truncf %105 : vector<4x8x8xf32> to vector<4x8x8xbf16>
    "tpu.trace_start"() <{level = 10 : i32, message = "bnd,bmd->bnm"}> : () -> ()
    %cst_32 = arith.constant dense<0.000000e+00> : vector<4x8x8xf32>
    %107 = tpu.matmul %100, %103, %cst_32 {dimension_numbers = #tpu.dot_dimension_numbers<[2], [2], [1], [1], [0, 0, 0, 1, 1, 1], [0], [0]>} : vector<4x8x8xbf16>, vector<4x8x8xbf16>, vector<4x8x8xf32> -> vector<4x8x8xf32>
    "tpu.trace_stop"() : () -> ()
    %108 = vector.shape_cast %107 : vector<4x8x8xf32> to vector<1x4x8x8xf32>
    %c0_33 = arith.constant 0 : index
    %c3 = arith.constant 3 : index
    %c0_34 = arith.constant 0 : index
    %c0_35 = arith.constant 0 : index
    %109 = vector.load %arg4[%c0_33, %c3, %c0_34, %c0_35] : memref<4x4x8x8xf32, #tpu.memory_space<vmem>>, vector<4x1x8x8xf32>
    %110 = vector.shape_cast %109 : vector<4x1x8x8xf32> to vector<4x8x8xf32>
    %111 = vector.shape_cast %110 : vector<4x8x8xf32> to vector<1x4x8x8xf32>
    %112 = arith.addf %108, %111 : vector<1x4x8x8xf32>
    %113 = vector.shape_cast %112 : vector<1x4x8x8xf32> to vector<4x8x8xf32>
    %cst_36 = arith.constant dense<0xFF800000> : vector<4x8xf32>
    %114 = vector.multi_reduction <maximumf>, %113, %cst_36 [2] : vector<4x8x8xf32> to vector<4x8xf32>
    %115 = vector.shape_cast %114 : vector<4x8xf32> to vector<4x8x1xf32>
    %116 = vector.broadcast %115 : vector<4x8x1xf32> to vector<4x8x8xf32>
    %117 = arith.subf %113, %116 : vector<4x8x8xf32>
    %118 = math.exp %117 : vector<4x8x8xf32>
    %cst_37 = arith.constant dense<0.000000e+00> : vector<4x8xf32>
    %119 = vector.multi_reduction <add>, %118, %cst_37 [2] : vector<4x8x8xf32> to vector<4x8xf32>
    %120 = vector.shape_cast %119 : vector<4x8xf32> to vector<4x8x1xf32>
    %121 = tpu.reciprocal %120 {approx = true} : vector<4x8x1xf32> -> vector<4x8x1xf32>
    %122 = vector.broadcast %121 : vector<4x8x1xf32> to vector<4x8x8xf32>
    %123 = arith.mulf %118, %122 : vector<4x8x8xf32>
    %124 = arith.truncf %123 : vector<4x8x8xf32> to vector<4x8x8xbf16>
    "tpu.trace_start"() <{level = 10 : i32, message = "bnm,bmd->bnd"}> : () -> ()
    %cst_38 = arith.constant dense<0.000000e+00> : vector<4x8x8xf32>
    %125 = tpu.matmul %124, %106, %cst_38 {dimension_numbers = #tpu.dot_dimension_numbers<[2], [1], [1], [2], [0, 0, 0, 1, 1, 2], [0], [0]>} : vector<4x8x8xbf16>, vector<4x8x8xbf16>, vector<4x8x8xf32> -> vector<4x8x8xf32>
    "tpu.trace_stop"() : () -> ()
    %126 = vector.shape_cast %125 : vector<4x8x8xf32> to vector<32x8xf32>
    %c0_39 = arith.constant 0 : index
    %c24 = arith.constant 24 : index
    %127 = vector.load %arg8[%c0_39, %c24] : memref<32x32xf32, #tpu.memory_space<vmem>>, vector<32x8xf32>
    tpu.vector_store %arg8[%c0_39, %c24], %126 {strides = array<i32>} : memref<32x32xf32, #tpu.memory_space<vmem>>, vector<32x8xf32>,
    %c0_40 = arith.constant 0 : index
    %c0_41 = arith.constant 0 : index
    %128 = vector.load %arg8[%c0_40, %c0_41] : memref<32x32xf32, #tpu.memory_space<vmem>>, vector<32x32xf32>
    %129 = arith.truncf %128 : vector<32x32xf32> to vector<32x32xbf16>
    %c0_42 = arith.constant 0 : index
    %c0_43 = arith.constant 0 : index
    %130 = vector.load %arg5[%c0_42, %c0_43] : memref<32x32xbf16, #tpu.memory_space<vmem>>, vector<32x32xbf16>
    %cst_44 = arith.constant dense<0.000000e+00> : vector<32x32xf32>
    %131 = tpu.matmul %129, %130, %cst_44 {dimension_numbers = #tpu.dot_dimension_numbers<[1], [0], [0], [1], [0, 0, 1, 1], [], []>} : vector<32x32xbf16>, vector<32x32xbf16>, vector<32x32xf32> -> vector<32x32xf32>
    %c0_45 = arith.constant 0 : index
    %c0_46 = arith.constant 0 : index
    %132 = vector.load %arg6[%c0_45, %c0_46] : memref<1x32xf32, #tpu.memory_space<vmem>>, vector<1x32xf32>
    %133 = vector.broadcast %132 : vector<1x32xf32> to vector<32x32xf32>
    %134 = arith.addf %131, %133 : vector<32x32xf32>
    %135 = vector.shape_cast %134 : vector<32x32xf32> to vector<4x8x32xf32>
    %c0_47 = arith.constant 0 : index
    %c0_48 = arith.constant 0 : index
    %c0_49 = arith.constant 0 : index
    %136 = vector.load %arg7[%c0_47, %c0_48, %c0_49] : memref<4x8x32xf32, #tpu.memory_space<vmem>>, vector<4x8x32xf32>
    tpu.vector_store %arg7[%c0_47, %c0_48, %c0_49], %135 {strides = array<i32>} : memref<4x8x32xf32, #tpu.memory_space<vmem>>, vector<4x8x32xf32>,
    return
  }
  func.func @transform_0(%arg0: i32) -> (i32, i32, i32) {
    %c0_i32 = arith.constant 0 : i32
    %c0_i32_0 = arith.constant 0 : i32
    %c0_i32_1 = arith.constant 0 : i32
    return %arg0, %c0_i32, %c0_i32_0 : i32, i32, i32
  }
  func.func @transform_1(%arg0: i32) -> (i32, i32) {
    %c0_i32 = arith.constant 0 : i32
    %c0_i32_0 = arith.constant 0 : i32
    %c0_i32_1 = arith.constant 0 : i32
    return %c0_i32, %c0_i32_0 : i32, i32
  }
  func.func @transform_2(%arg0: i32) -> (i32, i32) {
    %c0_i32 = arith.constant 0 : i32
    %c0_i32_0 = arith.constant 0 : i32
    %c0_i32_1 = arith.constant 0 : i32
    return %c0_i32, %c0_i32_0 : i32, i32
  }
  func.func @transform_3(%arg0: i32) -> (i32, i32, i32, i32) {
    %c0_i32 = arith.constant 0 : i32
    %c0_i32_0 = arith.constant 0 : i32
    %c0_i32_1 = arith.constant 0 : i32
    %c0_i32_2 = arith.constant 0 : i32
    %c0_i32_3 = arith.constant 0 : i32
    return %c0_i32, %c0_i32_0, %c0_i32_1, %c0_i32_2 : i32, i32, i32, i32
  }
  func.func @transform_4(%arg0: i32) -> (i32, i32) {
    %c0_i32 = arith.constant 0 : i32
    %c0_i32_0 = arith.constant 0 : i32
    %c0_i32_1 = arith.constant 0 : i32
    return %c0_i32, %c0_i32_0 : i32, i32
  }
  func.func @transform_5(%arg0: i32) -> (i32, i32) {
    %c0_i32 = arith.constant 0 : i32
    %c0_i32_0 = arith.constant 0 : i32
    %c0_i32_1 = arith.constant 0 : i32
    return %c0_i32, %c0_i32_0 : i32, i32
  }
  func.func @transform_6(%arg0: i32) -> (i32, i32, i32) {
    %c0_i32 = arith.constant 0 : i32
    %c0_i32_0 = arith.constant 0 : i32
    %c0_i32_1 = arith.constant 0 : i32
    return %arg0, %c0_i32, %c0_i32_0 : i32, i32, i32
  }
}

module attributes {stable_mosaic.version = 11 : i64} {
  func.func @_win_attn_kernel(%arg0: i32, %arg1: memref<4x8x32xf32, #tpu.memory_space<vmem>>, %arg2: memref<32x96xbf16, #tpu.memory_space<vmem>>, %arg3: memref<1x96xf32, #tpu.memory_space<vmem>>, %arg4: memref<4x4x8x8xf32, #tpu.memory_space<vmem>>, %arg5: memref<32x32xbf16, #tpu.memory_space<vmem>>, %arg6: memref<1x32xf32, #tpu.memory_space<vmem>>, %arg7: memref<4x8x32xf32, #tpu.memory_space<vmem>>, %arg8: memref<32x32xf32, #tpu.memory_space<vmem>>) attributes {dimension_semantics = [#tpu.dimension_semantics<parallel>], iteration_bounds = array<i64: 2>, scalar_prefetch = 0 : i64, scratch_operands = 1 : i64, tpu.core_type = #tpu.core_type<tc>, window_params = [{transform_indices = @transform_0, window_bounds = array<i64: 4, 8, 32>}, {pipeline_mode = #tpu.pipeline_mode<synchronous>, transform_indices = @transform_1, window_bounds = array<i64: 32, 96>}, {pipeline_mode = #tpu.pipeline_mode<synchronous>, transform_indices = @transform_2, window_bounds = array<i64: 1, 96>}, {pipeline_mode = #tpu.pipeline_mode<synchronous>, transform_indices = @transform_3, window_bounds = array<i64: 4, 4, 8, 8>}, {pipeline_mode = #tpu.pipeline_mode<synchronous>, transform_indices = @transform_4, window_bounds = array<i64: 32, 32>}, {pipeline_mode = #tpu.pipeline_mode<synchronous>, transform_indices = @transform_5, window_bounds = array<i64: 1, 32>}, {transform_indices = @transform_6, window_bounds = array<i64: 4, 8, 32>}]} {
    %c0 = arith.constant 0 : index
    %c0_0 = arith.constant 0 : index
    %c0_1 = arith.constant 0 : index
    %0 = vector.load %arg1[%c0, %c0_0, %c0_1] : memref<4x8x32xf32, #tpu.memory_space<vmem>>, vector<4x8x32xf32>
    %1 = vector.shape_cast %0 : vector<4x8x32xf32> to vector<32x32xf32>
    %2 = arith.truncf %1 : vector<32x32xf32> to vector<32x32xbf16>
    %c0_2 = arith.constant 0 : index
    %c0_3 = arith.constant 0 : index
    %3 = vector.load %arg2[%c0_2, %c0_3] : memref<32x96xbf16, #tpu.memory_space<vmem>>, vector<32x96xbf16>
    %cst = arith.constant dense<0.000000e+00> : vector<32x96xf32>
    %4 = tpu.matmul %2, %3, %cst {dimension_numbers = #tpu.dot_dimension_numbers<[1], [0], [0], [1], [0, 0, 1, 1], [], []>} : vector<32x32xbf16>, vector<32x96xbf16>, vector<32x96xf32> -> vector<32x96xf32>
    %c0_4 = arith.constant 0 : index
    %c0_5 = arith.constant 0 : index
    %5 = vector.load %arg3[%c0_4, %c0_5] : memref<1x96xf32, #tpu.memory_space<vmem>>, vector<1x96xf32>
    %6 = vector.broadcast %5 : vector<1x96xf32> to vector<32x96xf32>
    %7 = arith.addf %4, %6 : vector<32x96xf32>
    %8 = vector.extract_strided_slice %7 {offsets = [0, 0], sizes = [32, 8], strides = [1, 1]} : vector<32x96xf32> to vector<32x8xf32>
    %9 = vector.shape_cast %8 : vector<32x8xf32> to vector<4x8x8xf32>
    %10 = arith.truncf %9 : vector<4x8x8xf32> to vector<4x8x8xbf16>
    %11 = vector.extract_strided_slice %7 {offsets = [0, 32], sizes = [32, 8], strides = [1, 1]} : vector<32x96xf32> to vector<32x8xf32>
    %12 = vector.shape_cast %11 : vector<32x8xf32> to vector<4x8x8xf32>
    %13 = arith.truncf %12 : vector<4x8x8xf32> to vector<4x8x8xbf16>
    %14 = vector.extract_strided_slice %7 {offsets = [0, 64], sizes = [32, 8], strides = [1, 1]} : vector<32x96xf32> to vector<32x8xf32>
    %15 = vector.shape_cast %14 : vector<32x8xf32> to vector<4x8x8xf32>
    %16 = arith.truncf %15 : vector<4x8x8xf32> to vector<4x8x8xbf16>
    "tpu.trace_start"() <{level = 10 : i32, message = "bnd,bmd->bnm"}> : () -> ()
    %cst_6 = arith.constant dense<0.000000e+00> : vector<4x8x8xf32>
    %17 = tpu.matmul %10, %13, %cst_6 {dimension_numbers = #tpu.dot_dimension_numbers<[2], [2], [1], [1], [0, 0, 0, 1, 1, 1], [0], [0]>} : vector<4x8x8xbf16>, vector<4x8x8xbf16>, vector<4x8x8xf32> -> vector<4x8x8xf32>
    "tpu.trace_stop"() : () -> ()
    %18 = vector.shape_cast %17 : vector<4x8x8xf32> to vector<1x4x8x8xf32>
    %c0_7 = arith.constant 0 : index
    %c0_8 = arith.constant 0 : index
    %c0_9 = arith.constant 0 : index
    %c0_10 = arith.constant 0 : index
    %19 = vector.load %arg4[%c0_7, %c0_8, %c0_9, %c0_10] : memref<4x4x8x8xf32, #tpu.memory_space<vmem>>, vector<4x1x8x8xf32>
    %20 = vector.shape_cast %19 : vector<4x1x8x8xf32> to vector<4x8x8xf32>
    %21 = vector.shape_cast %20 : vector<4x8x8xf32> to vector<1x4x8x8xf32>
    %22 = arith.addf %18, %21 : vector<1x4x8x8xf32>
    %23 = vector.shape_cast %22 : vector<1x4x8x8xf32> to vector<4x8x8xf32>
    %cst_11 = arith.constant dense<0xFF800000> : vector<4x8xf32>
    %24 = vector.multi_reduction <maximumf>, %23, %cst_11 [2] : vector<4x8x8xf32> to vector<4x8xf32>
    %25 = vector.shape_cast %24 : vector<4x8xf32> to vector<4x8x1xf32>
    %26 = vector.broadcast %25 : vector<4x8x1xf32> to vector<4x8x8xf32>
    %27 = arith.subf %23, %26 : vector<4x8x8xf32>
    %28 = math.exp %27 : vector<4x8x8xf32>
    %cst_12 = arith.constant dense<0.000000e+00> : vector<4x8xf32>
    %29 = vector.multi_reduction <add>, %28, %cst_12 [2] : vector<4x8x8xf32> to vector<4x8xf32>
    %30 = vector.shape_cast %29 : vector<4x8xf32> to vector<4x8x1xf32>
    %31 = tpu.reciprocal %30 {approx = true} : vector<4x8x1xf32> -> vector<4x8x1xf32>
    %32 = vector.broadcast %31 : vector<4x8x1xf32> to vector<4x8x8xf32>
    %33 = arith.mulf %28, %32 : vector<4x8x8xf32>
    %34 = arith.truncf %33 : vector<4x8x8xf32> to vector<4x8x8xbf16>
    "tpu.trace_start"() <{level = 10 : i32, message = "bnm,bmd->bnd"}> : () -> ()
    %cst_13 = arith.constant dense<0.000000e+00> : vector<4x8x8xf32>
    %35 = tpu.matmul %34, %16, %cst_13 {dimension_numbers = #tpu.dot_dimension_numbers<[2], [1], [1], [2], [0, 0, 0, 1, 1, 2], [0], [0]>} : vector<4x8x8xbf16>, vector<4x8x8xbf16>, vector<4x8x8xf32> -> vector<4x8x8xf32>
    "tpu.trace_stop"() : () -> ()
    %36 = vector.shape_cast %35 : vector<4x8x8xf32> to vector<32x8xf32>
    %c0_14 = arith.constant 0 : index
    %c0_15 = arith.constant 0 : index
    %37 = vector.load %arg8[%c0_14, %c0_15] : memref<32x32xf32, #tpu.memory_space<vmem>>, vector<32x8xf32>
    tpu.vector_store %arg8[%c0_14, %c0_15], %36 {strides = array<i32>} : memref<32x32xf32, #tpu.memory_space<vmem>>, vector<32x8xf32>,
    %38 = vector.extract_strided_slice %7 {offsets = [0, 8], sizes = [32, 8], strides = [1, 1]} : vector<32x96xf32> to vector<32x8xf32>
    %39 = vector.shape_cast %38 : vector<32x8xf32> to vector<4x8x8xf32>
    %40 = arith.truncf %39 : vector<4x8x8xf32> to vector<4x8x8xbf16>
    %41 = vector.extract_strided_slice %7 {offsets = [0, 40], sizes = [32, 8], strides = [1, 1]} : vector<32x96xf32> to vector<32x8xf32>
    %42 = vector.shape_cast %41 : vector<32x8xf32> to vector<4x8x8xf32>
    %43 = arith.truncf %42 : vector<4x8x8xf32> to vector<4x8x8xbf16>
    %44 = vector.extract_strided_slice %7 {offsets = [0, 72], sizes = [32, 8], strides = [1, 1]} : vector<32x96xf32> to vector<32x8xf32>
    %45 = vector.shape_cast %44 : vector<32x8xf32> to vector<4x8x8xf32>
    %46 = arith.truncf %45 : vector<4x8x8xf32> to vector<4x8x8xbf16>
    "tpu.trace_start"() <{level = 10 : i32, message = "bnd,bmd->bnm"}> : () -> ()
    %cst_16 = arith.constant dense<0.000000e+00> : vector<4x8x8xf32>
    %47 = tpu.matmul %40, %43, %cst_16 {dimension_numbers = #tpu.dot_dimension_numbers<[2], [2], [1], [1], [0, 0, 0, 1, 1, 1], [0], [0]>} : vector<4x8x8xbf16>, vector<4x8x8xbf16>, vector<4x8x8xf32> -> vector<4x8x8xf32>
    "tpu.trace_stop"() : () -> ()
    %48 = vector.shape_cast %47 : vector<4x8x8xf32> to vector<1x4x8x8xf32>
    %c0_17 = arith.constant 0 : index
    %c1 = arith.constant 1 : index
    %c0_18 = arith.constant 0 : index
    %c0_19 = arith.constant 0 : index
    %49 = vector.load %arg4[%c0_17, %c1, %c0_18, %c0_19] : memref<4x4x8x8xf32, #tpu.memory_space<vmem>>, vector<4x1x8x8xf32>
    %50 = vector.shape_cast %49 : vector<4x1x8x8xf32> to vector<4x8x8xf32>
    %51 = vector.shape_cast %50 : vector<4x8x8xf32> to vector<1x4x8x8xf32>
    %52 = arith.addf %48, %51 : vector<1x4x8x8xf32>
    %53 = vector.shape_cast %52 : vector<1x4x8x8xf32> to vector<4x8x8xf32>
    %cst_20 = arith.constant dense<0xFF800000> : vector<4x8xf32>
    %54 = vector.multi_reduction <maximumf>, %53, %cst_20 [2] : vector<4x8x8xf32> to vector<4x8xf32>
    %55 = vector.shape_cast %54 : vector<4x8xf32> to vector<4x8x1xf32>
    %56 = vector.broadcast %55 : vector<4x8x1xf32> to vector<4x8x8xf32>
    %57 = arith.subf %53, %56 : vector<4x8x8xf32>
    %58 = math.exp %57 : vector<4x8x8xf32>
    %cst_21 = arith.constant dense<0.000000e+00> : vector<4x8xf32>
    %59 = vector.multi_reduction <add>, %58, %cst_21 [2] : vector<4x8x8xf32> to vector<4x8xf32>
    %60 = vector.shape_cast %59 : vector<4x8xf32> to vector<4x8x1xf32>
    %61 = tpu.reciprocal %60 {approx = true} : vector<4x8x1xf32> -> vector<4x8x1xf32>
    %62 = vector.broadcast %61 : vector<4x8x1xf32> to vector<4x8x8xf32>
    %63 = arith.mulf %58, %62 : vector<4x8x8xf32>
    %64 = arith.truncf %63 : vector<4x8x8xf32> to vector<4x8x8xbf16>
    "tpu.trace_start"() <{level = 10 : i32, message = "bnm,bmd->bnd"}> : () -> ()
    %cst_22 = arith.constant dense<0.000000e+00> : vector<4x8x8xf32>
    %65 = tpu.matmul %64, %46, %cst_22 {dimension_numbers = #tpu.dot_dimension_numbers<[2], [1], [1], [2], [0, 0, 0, 1, 1, 2], [0], [0]>} : vector<4x8x8xbf16>, vector<4x8x8xbf16>, vector<4x8x8xf32> -> vector<4x8x8xf32>
    "tpu.trace_stop"() : () -> ()
    %66 = vector.shape_cast %65 : vector<4x8x8xf32> to vector<32x8xf32>
    %c0_23 = arith.constant 0 : index
    %c8 = arith.constant 8 : index
    %67 = vector.load %arg8[%c0_23, %c8] : memref<32x32xf32, #tpu.memory_space<vmem>>, vector<32x8xf32>
    tpu.vector_store %arg8[%c0_23, %c8], %66 {strides = array<i32>} : memref<32x32xf32, #tpu.memory_space<vmem>>, vector<32x8xf32>,
    %68 = vector.extract_strided_slice %7 {offsets = [0, 16], sizes = [32, 8], strides = [1, 1]} : vector<32x96xf32> to vector<32x8xf32>
    %69 = vector.shape_cast %68 : vector<32x8xf32> to vector<4x8x8xf32>
    %70 = arith.truncf %69 : vector<4x8x8xf32> to vector<4x8x8xbf16>
    %71 = vector.extract_strided_slice %7 {offsets = [0, 48], sizes = [32, 8], strides = [1, 1]} : vector<32x96xf32> to vector<32x8xf32>
    %72 = vector.shape_cast %71 : vector<32x8xf32> to vector<4x8x8xf32>
    %73 = arith.truncf %72 : vector<4x8x8xf32> to vector<4x8x8xbf16>
    %74 = vector.extract_strided_slice %7 {offsets = [0, 80], sizes = [32, 8], strides = [1, 1]} : vector<32x96xf32> to vector<32x8xf32>
    %75 = vector.shape_cast %74 : vector<32x8xf32> to vector<4x8x8xf32>
    %76 = arith.truncf %75 : vector<4x8x8xf32> to vector<4x8x8xbf16>
    "tpu.trace_start"() <{level = 10 : i32, message = "bnd,bmd->bnm"}> : () -> ()
    %cst_24 = arith.constant dense<0.000000e+00> : vector<4x8x8xf32>
    %77 = tpu.matmul %70, %73, %cst_24 {dimension_numbers = #tpu.dot_dimension_numbers<[2], [2], [1], [1], [0, 0, 0, 1, 1, 1], [0], [0]>} : vector<4x8x8xbf16>, vector<4x8x8xbf16>, vector<4x8x8xf32> -> vector<4x8x8xf32>
    "tpu.trace_stop"() : () -> ()
    %78 = vector.shape_cast %77 : vector<4x8x8xf32> to vector<1x4x8x8xf32>
    %c0_25 = arith.constant 0 : index
    %c2 = arith.constant 2 : index
    %c0_26 = arith.constant 0 : index
    %c0_27 = arith.constant 0 : index
    %79 = vector.load %arg4[%c0_25, %c2, %c0_26, %c0_27] : memref<4x4x8x8xf32, #tpu.memory_space<vmem>>, vector<4x1x8x8xf32>
    %80 = vector.shape_cast %79 : vector<4x1x8x8xf32> to vector<4x8x8xf32>
    %81 = vector.shape_cast %80 : vector<4x8x8xf32> to vector<1x4x8x8xf32>
    %82 = arith.addf %78, %81 : vector<1x4x8x8xf32>
    %83 = vector.shape_cast %82 : vector<1x4x8x8xf32> to vector<4x8x8xf32>
    %cst_28 = arith.constant dense<0xFF800000> : vector<4x8xf32>
    %84 = vector.multi_reduction <maximumf>, %83, %cst_28 [2] : vector<4x8x8xf32> to vector<4x8xf32>
    %85 = vector.shape_cast %84 : vector<4x8xf32> to vector<4x8x1xf32>
    %86 = vector.broadcast %85 : vector<4x8x1xf32> to vector<4x8x8xf32>
    %87 = arith.subf %83, %86 : vector<4x8x8xf32>
    %88 = math.exp %87 : vector<4x8x8xf32>
    %cst_29 = arith.constant dense<0.000000e+00> : vector<4x8xf32>
    %89 = vector.multi_reduction <add>, %88, %cst_29 [2] : vector<4x8x8xf32> to vector<4x8xf32>
    %90 = vector.shape_cast %89 : vector<4x8xf32> to vector<4x8x1xf32>
    %91 = tpu.reciprocal %90 {approx = true} : vector<4x8x1xf32> -> vector<4x8x1xf32>
    %92 = vector.broadcast %91 : vector<4x8x1xf32> to vector<4x8x8xf32>
    %93 = arith.mulf %88, %92 : vector<4x8x8xf32>
    %94 = arith.truncf %93 : vector<4x8x8xf32> to vector<4x8x8xbf16>
    "tpu.trace_start"() <{level = 10 : i32, message = "bnm,bmd->bnd"}> : () -> ()
    %cst_30 = arith.constant dense<0.000000e+00> : vector<4x8x8xf32>
    %95 = tpu.matmul %94, %76, %cst_30 {dimension_numbers = #tpu.dot_dimension_numbers<[2], [1], [1], [2], [0, 0, 0, 1, 1, 2], [0], [0]>} : vector<4x8x8xbf16>, vector<4x8x8xbf16>, vector<4x8x8xf32> -> vector<4x8x8xf32>
    "tpu.trace_stop"() : () -> ()
    %96 = vector.shape_cast %95 : vector<4x8x8xf32> to vector<32x8xf32>
    %c0_31 = arith.constant 0 : index
    %c16 = arith.constant 16 : index
    %97 = vector.load %arg8[%c0_31, %c16] : memref<32x32xf32, #tpu.memory_space<vmem>>, vector<32x8xf32>
    tpu.vector_store %arg8[%c0_31, %c16], %96 {strides = array<i32>} : memref<32x32xf32, #tpu.memory_space<vmem>>, vector<32x8xf32>,
    %98 = vector.extract_strided_slice %7 {offsets = [0, 24], sizes = [32, 8], strides = [1, 1]} : vector<32x96xf32> to vector<32x8xf32>
    %99 = vector.shape_cast %98 : vector<32x8xf32> to vector<4x8x8xf32>
    %100 = arith.truncf %99 : vector<4x8x8xf32> to vector<4x8x8xbf16>
    %101 = vector.extract_strided_slice %7 {offsets = [0, 56], sizes = [32, 8], strides = [1, 1]} : vector<32x96xf32> to vector<32x8xf32>
    %102 = vector.shape_cast %101 : vector<32x8xf32> to vector<4x8x8xf32>
    %103 = arith.truncf %102 : vector<4x8x8xf32> to vector<4x8x8xbf16>
    %104 = vector.extract_strided_slice %7 {offsets = [0, 88], sizes = [32, 8], strides = [1, 1]} : vector<32x96xf32> to vector<32x8xf32>
    %105 = vector.shape_cast %104 : vector<32x8xf32> to vector<4x8x8xf32>
    %106 = arith.truncf %105 : vector<4x8x8xf32> to vector<4x8x8xbf16>
    "tpu.trace_start"() <{level = 10 : i32, message = "bnd,bmd->bnm"}> : () -> ()
    %cst_32 = arith.constant dense<0.000000e+00> : vector<4x8x8xf32>
    %107 = tpu.matmul %100, %103, %cst_32 {dimension_numbers = #tpu.dot_dimension_numbers<[2], [2], [1], [1], [0, 0, 0, 1, 1, 1], [0], [0]>} : vector<4x8x8xbf16>, vector<4x8x8xbf16>, vector<4x8x8xf32> -> vector<4x8x8xf32>
    "tpu.trace_stop"() : () -> ()
    %108 = vector.shape_cast %107 : vector<4x8x8xf32> to vector<1x4x8x8xf32>
    %c0_33 = arith.constant 0 : index
    %c3 = arith.constant 3 : index
    %c0_34 = arith.constant 0 : index
    %c0_35 = arith.constant 0 : index
    %109 = vector.load %arg4[%c0_33, %c3, %c0_34, %c0_35] : memref<4x4x8x8xf32, #tpu.memory_space<vmem>>, vector<4x1x8x8xf32>
    %110 = vector.shape_cast %109 : vector<4x1x8x8xf32> to vector<4x8x8xf32>
    %111 = vector.shape_cast %110 : vector<4x8x8xf32> to vector<1x4x8x8xf32>
    %112 = arith.addf %108, %111 : vector<1x4x8x8xf32>
    %113 = vector.shape_cast %112 : vector<1x4x8x8xf32> to vector<4x8x8xf32>
    %cst_36 = arith.constant dense<0xFF800000> : vector<4x8xf32>
    %114 = vector.multi_reduction <maximumf>, %113, %cst_36 [2] : vector<4x8x8xf32> to vector<4x8xf32>
    %115 = vector.shape_cast %114 : vector<4x8xf32> to vector<4x8x1xf32>
    %116 = vector.broadcast %115 : vector<4x8x1xf32> to vector<4x8x8xf32>
    %117 = arith.subf %113, %116 : vector<4x8x8xf32>
    %118 = math.exp %117 : vector<4x8x8xf32>
    %cst_37 = arith.constant dense<0.000000e+00> : vector<4x8xf32>
    %119 = vector.multi_reduction <add>, %118, %cst_37 [2] : vector<4x8x8xf32> to vector<4x8xf32>
    %120 = vector.shape_cast %119 : vector<4x8xf32> to vector<4x8x1xf32>
    %121 = tpu.reciprocal %120 {approx = true} : vector<4x8x1xf32> -> vector<4x8x1xf32>
    %122 = vector.broadcast %121 : vector<4x8x1xf32> to vector<4x8x8xf32>
    %123 = arith.mulf %118, %122 : vector<4x8x8xf32>
    %124 = arith.truncf %123 : vector<4x8x8xf32> to vector<4x8x8xbf16>
    "tpu.trace_start"() <{level = 10 : i32, message = "bnm,bmd->bnd"}> : () -> ()
    %cst_38 = arith.constant dense<0.000000e+00> : vector<4x8x8xf32>
    %125 = tpu.matmul %124, %106, %cst_38 {dimension_numbers = #tpu.dot_dimension_numbers<[2], [1], [1], [2], [0, 0, 0, 1, 1, 2], [0], [0]>} : vector<4x8x8xbf16>, vector<4x8x8xbf16>, vector<4x8x8xf32> -> vector<4x8x8xf32>
    "tpu.trace_stop"() : () -> ()
    %126 = vector.shape_cast %125 : vector<4x8x8xf32> to vector<32x8xf32>
    %c0_39 = arith.constant 0 : index
    %c24 = arith.constant 24 : index
    %127 = vector.load %arg8[%c0_39, %c24] : memref<32x32xf32, #tpu.memory_space<vmem>>, vector<32x8xf32>
    tpu.vector_store %arg8[%c0_39, %c24], %126 {strides = array<i32>} : memref<32x32xf32, #tpu.memory_space<vmem>>, vector<32x8xf32>,
    %c0_40 = arith.constant 0 : index
    %c0_41 = arith.constant 0 : index
    %128 = vector.load %arg8[%c0_40, %c0_41] : memref<32x32xf32, #tpu.memory_space<vmem>>, vector<32x32xf32>
    %129 = arith.truncf %128 : vector<32x32xf32> to vector<32x32xbf16>
    %c0_42 = arith.constant 0 : index
    %c0_43 = arith.constant 0 : index
    %130 = vector.load %arg5[%c0_42, %c0_43] : memref<32x32xbf16, #tpu.memory_space<vmem>>, vector<32x32xbf16>
    %cst_44 = arith.constant dense<0.000000e+00> : vector<32x32xf32>
    %131 = tpu.matmul %129, %130, %cst_44 {dimension_numbers = #tpu.dot_dimension_numbers<[1], [0], [0], [1], [0, 0, 1, 1], [], []>} : vector<32x32xbf16>, vector<32x32xbf16>, vector<32x32xf32> -> vector<32x32xf32>
    %c0_45 = arith.constant 0 : index
    %c0_46 = arith.constant 0 : index
    %132 = vector.load %arg6[%c0_45, %c0_46] : memref<1x32xf32, #tpu.memory_space<vmem>>, vector<1x32xf32>
    %133 = vector.broadcast %132 : vector<1x32xf32> to vector<32x32xf32>
    %134 = arith.addf %131, %133 : vector<32x32xf32>
    %135 = vector.shape_cast %134 : vector<32x32xf32> to vector<4x8x32xf32>
    %c0_47 = arith.constant 0 : index
    %c0_48 = arith.constant 0 : index
    %c0_49 = arith.constant 0 : index
    %136 = vector.load %arg7[%c0_47, %c0_48, %c0_49] : memref<4x8x32xf32, #tpu.memory_space<vmem>>, vector<4x8x32xf32>
    tpu.vector_store %arg7[%c0_47, %c0_48, %c0_49], %135 {strides = array<i32>} : memref<4x8x32xf32, #tpu.memory_space<vmem>>, vector<4x8x32xf32>,
    return
  }
  func.func @transform_0(%arg0: i32) -> (i32, i32, i32) {
    %c0_i32 = arith.constant 0 : i32
    %c0_i32_0 = arith.constant 0 : i32
    %c0_i32_1 = arith.constant 0 : i32
    return %arg0, %c0_i32, %c0_i32_0 : i32, i32, i32
  }
  func.func @transform_1(%arg0: i32) -> (i32, i32) {
    %c0_i32 = arith.constant 0 : i32
    %c0_i32_0 = arith.constant 0 : i32
    %c0_i32_1 = arith.constant 0 : i32
    return %c0_i32, %c0_i32_0 : i32, i32
  }
  func.func @transform_2(%arg0: i32) -> (i32, i32) {
    %c0_i32 = arith.constant 0 : i32
    %c0_i32_0 = arith.constant 0 : i32
    %c0_i32_1 = arith.constant 0 : i32
    return %c0_i32, %c0_i32_0 : i32, i32
  }
  func.func @transform_3(%arg0: i32) -> (i32, i32, i32, i32) {
    %c0_i32 = arith.constant 0 : i32
    %c0_i32_0 = arith.constant 0 : i32
    %c0_i32_1 = arith.constant 0 : i32
    %c0_i32_2 = arith.constant 0 : i32
    %c0_i32_3 = arith.constant 0 : i32
    return %c0_i32, %c0_i32_0, %c0_i32_1, %c0_i32_2 : i32, i32, i32, i32
  }
  func.func @transform_4(%arg0: i32) -> (i32, i32) {
    %c0_i32 = arith.constant 0 : i32
    %c0_i32_0 = arith.constant 0 : i32
    %c0_i32_1 = arith.constant 0 : i32
    return %c0_i32, %c0_i32_0 : i32, i32
  }
  func.func @transform_5(%arg0: i32) -> (i32, i32) {
    %c0_i32 = arith.constant 0 : i32
    %c0_i32_0 = arith.constant 0 : i32
    %c0_i32_1 = arith.constant 0 : i32
    return %c0_i32, %c0_i32_0 : i32, i32
  }
  func.func @transform_6(%arg0: i32) -> (i32, i32, i32) {
    %c0_i32 = arith.constant 0 : i32
    %c0_i32_0 = arith.constant 0 : i32
    %c0_i32_1 = arith.constant 0 : i32
    return %arg0, %c0_i32, %c0_i32_0 : i32, i32, i32
  }
}

</mosaic_0001>

<bundles_post_ra>
// kernel: tpu_custom_call.1
= control target key start
LH: loop header
LB: loop body
LE: loop exit
PB: predicated region body
PF: predicated region fallthrough
CT: control target
= control target key end

     0   :  { %11 = vsyncpa [#allocation4], 0  ;;  %s2456_s0 = inlined_call_operand.hbm [shape: f32[8,8,32], index: 0, kind: input, shape index: {}]   ;;  %s2457_s1 = inlined_call_operand.hbm [shape: bf16[32,96], index: 1, kind: input, shape index: {}]   ;;  %s2458_s2 = inlined_call_operand.vmem [shape: f32[1,96], index: 2, kind: input, shape index: {}]   ;;  %s2459_s3 = inlined_call_operand.hbm [shape: f32[4,4,8,8], index: 3, kind: input, shape index: {}]   ;;  %s2460_s4 = inlined_call_operand.hbm [shape: bf16[32,32], index: 4, kind: input, shape index: {}]   ;;  %s2461_s5 = inlined_call_operand.vmem [shape: f32[1,32], index: 5, kind: input, shape index: {}]   ;;  %s2462_s6 = inlined_call_operand.hbm [shape: f32[8,8,32], index: 6, kind: output, shape index: {}]  }
   0x1   :  { %13 = vsyncpa [#allocation4 + $0x1], 0 }
   0x2   :  { %14 = vsyncpa [#allocation7], 0 }
   0x3   :  { %15 = vsyncpa [#allocation10], 0 }
   0x4   :  { %16 = vsyncpa [#allocation5], 0 }
   0x5   :  { %18 = vsyncpa [#allocation5 + $0x1], 0  ;;  %s2051_s21 = smov 0   ;;  %s2053_s22 = smov 0  }
   0x6   :  { %s2055_s23 = smov 0   ;;  %s2057_s24 = smov 0  }
   0x7 LB: > { %s2072_s25 = sadd.s32 4294967295, %s1992_s24   ;;  %s1558_s26 = sadd.s32 4294967294, %s1992_s24   ;;  %s1992_s24 = sphi %s2057_s24, %s2477_s24   ;;  %s1988_s23 = sphi %s2055_s23, %s2476_s23   ;;  %s1984_s22 = sphi %s2053_s22, %s2475_s22   ;;  %s1980_s21 = sphi %s2051_s21, %s2474_s21  }
   0x8   : > { %p44_p0 = scmp.ne.s32.totalorder %s1984_s22, %s1980_s21  ;;  %p45_p1 = scmp.eq.s32.totalorder %s2072_s25, 0 }
   0x9   : > { %p173_p2 = scmp.eq.s32.totalorder %s2072_s25, 1  ;;  %p179_p3 = scmp.eq.s32.totalorder %s1558_s26, 1 }
   0xa   : > { %p2081_p4 = por %p45_p1, %p44_p0  ;;  %p1559_p5 = scmp.ge.s32.totalorder %s1992_s24, 1 }
   0xb   : > { %p2086_p6 = por %p179_p3, %p44_p0  ;;  %p186_p7 = scmp.lt.s32.totalorder %s1992_s24, 3 }
   0xc   : > { %s197_s7 = sshll.u32 %s2457_s1, 4  ;;  %s1994_s9 = smov [#allocation6]   ;;  %s198_s7 = int_to_ptr.hbm [resolvable:$true] %s197_s7 }
   0xd   : > { %p2094_p8 = pnand %p1559_p5, %p186_p7  ;;  %s199_s10 = sshll.u32 %s1994_s9, 4  ;;  %s200_s10 = int_to_ptr.vmem [resolvable:$true] %s199_s10 }
   0xe   : > { %s214_s14 = sshll.u32 %s2459_s3, 4  ;;  %s1995_s15 = smov 64   ;;  %s215_s14 = int_to_ptr.hbm [resolvable:$true] %s214_s14 }
   0xf   : > { %p1652_p9 = pneg %p2094_p8  ;;  %s1996_s16 = smov 4  }
  0x10   : > { %s1997_s17 = smov [#allocation8]   ;;  %s2463_s19 = smov 128  }
  0x11   : > { %p2102_p10 = pnand %p1652_p9, %p45_p1  ;;  %s216_s18 = sshll.u32 %s1997_s17, 4  ;;  %s217_s18 = int_to_ptr.vmem [resolvable:$true] %s216_s18 }
  0x12   : > { %s2464_s20 = smov 8   ;;  %s228_s30 = sshll.u32 %s2460_s4, 4  ;;  %s229_s30 = int_to_ptr.hbm [resolvable:$true] %s228_s30 }
  0x13   : > { %1655 = dma.hbm_to_vmem [thread:$0]  (!%p2102_p10), %s198_s7, 256, %s200_s10, [#allocation7], %s1995_s15, %s1995_s15, %s1996_s16  }
  0x14   : > { %1658 = dma.hbm_to_vmem [thread:$0]  (!%p2102_p10), %s215_s14, 2048, %s217_s18, [#allocation7], %s2463_s19, %s2463_s19, %s2464_s20  }
  0x15   : > { %s2000_s7 = smov [#allocation9]   ;;  %s2123_s10 = sadd.s32 1, %s1992_s24  }
  0x16   : > { %s230_s9 = sshll.u32 %s2000_s7, 4  ;;  %s28_s12 = ssub.s32 %s1992_s24, %s2123_s10  ;;  %s231_s9 = int_to_ptr.vmem [resolvable:$true] %s230_s9 }
  0x17   : > { %1661 = dma.hbm_to_vmem [thread:$0]  (!%p2102_p10), %s229_s30, 256, %s231_s9, [#allocation10], %s1995_s15, %s1995_s15, %s1996_s16  }
  0x18   : > { %s31_s13 = sadd.s32 1, %s1988_s23  ;;  %p29_p12 = scmp.eq.s32.totalorder %s28_s12, 0 }
  0x19   : > { %p38_p13 = scmp.ne.s32.totalorder %s1988_s23, %s1984_s22  ;;  %p39_p0 = scmp.eq.s32.totalorder %s1992_s24, 0 }
  0x1a   : > { %s2132_s14 = scalar_select %p29_p12, %s1988_s23, %s31_s13  }
  0x1b   : > { %p2136_p3 = por %p173_p2, %p38_p13  ;;  %p1673_p5 = scmp.lt.s32.totalorder %s1992_s24, 2 }
  0x1c   : > { %s247_s18 = sand.u32 1, %s1988_s23   ;;  %s1630_s26 = sshll.u32 %s1992_s24, 5 }
  0x1d   : > { %p40_p7 = por %p39_p0, %p38_p13  ;;  %s1564_s11 = sshll.u32 %s247_s18, 5 }
  0x1e   : > { %s256_s29 = scalar_lea.hbm %s2456_s0, %s1630_s26  ;;  %s251_s7 = scalar_lea.vmem [#allocation3], %s1564_s11 }
  0x1f   : > { %s257_s30 = sshll.u32 %s256_s29, 4  ;;  %s259_s9 = sshll.u32 %s251_s7, 4  ;;  %s258_s30 = int_to_ptr.hbm [resolvable:$true] %s257_s30  ;;  %s260_s9 = int_to_ptr.vmem [resolvable:$true] %s259_s9 }
  0x20   : > { %p2146_p9 = pnand %p1673_p5, %p40_p7  ;;  %s248_s13 = scalar_lea.sflag [#allocation4], %s247_s18 }
  0x21   : > { %s1888_s19 = sshra.s32 %s258_s30, 4  ;;  %s1895_s11 = scalar_lea.hbm %s2456_s0, 64  ;;  %s1889_s19 = int_to_ptr.hbm [resolvable:$true] %s1888_s19 }
  0x22   : > { %s1890_s20 = scalar_lea.hbm %s1889_s19, 32  ;;  %p1892_p10 = pneg %p2146_p9 }
  0x23   : > { %p1891_p2 = scmp.ne.s32.totalorder %s1889_s19, %s1890_s20  ;;  %p1896_p0 = scmp.lt.s32.totalorder %s1889_s19, %s2456_s0 }
  0x24   : > { %p1897_p5 = scmp.lt.s32.totalorder %s1895_s11, %s1890_s20 }
  0x25   : > { %p1893_p12 = pnand %p1892_p10, %p1891_p2 }
  0x26   : > { %p1898_p7 = por %p1897_p5, %p1896_p0 }
  0x27   : > { %p1894_p13 = pneg %p1893_p12 }
  0x29   : > { %p1899_p11 = pnand %p1898_p7, %p1894_p13 }
  0x2b   : > { %1902 = shalt.err (!%p1899_p11)
}
  0x2c   : > { %s2471_s18 = smov 8   ;;  %s2472_s7 = smov 128  }
  0x2d   : > { %1665 = dma.hbm_to_vmem [thread:$0]  (!%p2146_p9), %s258_s30, 512, %s260_s9, %s248_s13, %s2472_s7, %s2472_s7, %s2471_s18  }
  0x2e   : > { %271 = sbr.rel (%p2094_p8) target bundleno = 2431 (0x97f), region = 44  ;;  %s2166_s26 = sand.u32 (!%p2094_p8), 1, %s1984_s22  }
  0x2f   : > { %s1568_s19 = sshll.u32 (!%p2094_p8), %s2166_s26, 5  ;;  %s274_s20 = scalar_lea.sflag (!%p2094_p8), [#allocation4], %s2166_s26 }
  0x30   : > { %s277_s15 = scalar_lea.vmem (!%p2094_p8), [#allocation3], %s1568_s19 }
  0x33   : > { %1963 = dma.done.wait (%p2081_p4), %s274_s20, 512  }
  0x34   : > { %1965 = vsyncadd (%p2081_p4), %s274_s20, 4294966784 }
  0x35   : > { %1967 = dma.done.wait (%p45_p1), [#allocation7], 2304  }
  0x36   : > { %1969 = vsyncadd (%p45_p1), [#allocation7], 4294964992 }
  0x37   : > { %1971 = dma.done.wait (%p45_p1), [#allocation10], 256  }
  0x38   : > { %1973 = vsyncadd (%p45_p1), [#allocation10], 4294967040  ;;  %v1632_v0 = vld [vmem:[#allocation6 + $0x8] sm:$0xff]  ;;  %v1631_v1 = vld [vmem:[#allocation6] sm:$0xff]  ;;  %vm351_vm0 = vcmask 261120   ;;  %s2001_s30 = smov 64  }
  0x39   : > { %v325_v2 = vld [vmem:[%s277_s15] sm:$0xff]  ;;  %364 = vmatpush.bf16.msra.mxu0 %v1632_v0  ;;  %v326_v3 = vld [vmem:[%s277_s15 + $0x8] sm:$0xff]  ;;  %v327_v5 = vld [vmem:[%s277_s15 + $0x10] sm:$0xff]  ;;  %s2002_s9 = smov 96   ;;  %vm539_vm1 = vcmask 1043456   ;;  %vm386_vm2 = vcmask 64512  }
  0x3a   : > { %v329_v4 = vpack.c.bf16 %v326_v3, %v325_v2  ;;  %v328_v6 = vld [vmem:[%s277_s15 + $0x18] sm:$0xff]  ;;  %v1732_v8 = vld [vmem:[%s2458_s2] ss:$0 sm:$0xff]  ;;  %v478_v42 = vld [vmem:[#allocation8] sm:$0xff]  ;;  %s2003_s12 = smov 120   ;;  %s2004_s13 = smov 88  }
  0x3b   : > { %v330_v7 = vpack.c.bf16 %v328_v6, %v327_v5  ;;  %v479_v46 = vld [vmem:[#allocation8 + $0x20] sm:$0xff]  ;;  %s2005_s11 = smov 80   ;;  %s2006_s16 = smov 56   ;;  %vm872_vm3 = vcmask 130112   ;;  %vm1126_vm4 = vcmask 195712   ;;  %vm1380_vm5 = vcmask 261312  }
  0x3c   : > { %v480_v51 = vld [vmem:[#allocation8 + $0x40] sm:$0xff]  ;;  %s2007_s29 = smov 112   ;;  %s2008_s18 = smov 48  }
  0x3d   : > { %365 = vmatpush.bf16.msra.mxu0 %v1631_v1  ;;  %v481_v53 = vld [vmem:[#allocation8 + $0x60] sm:$0xff]  ;;  %s2009_s7 = smov 72   ;;  %s2010_s20 = smov 104  }
  0x3e   : > { %s2011_s15 = smov 40   ;;  %s2012_s27 = smov 8  }
  0x3f   : > { %s2013_s8 = smov 16  }
  0x40   : > { %1581 = vmatmul.msk.bf16.vlgmr.msra.gmra.mxu0 %vm351_vm0, %v329_v4 }
  0x50   : > { %1582 = vmatmul.msk.bf16.gmra.mxu0 %vm351_vm0, %v330_v7 }
  0xbd   : > { %v367_v9 = vpop.f32.mrf.mxu0 }
  0xbe   : > { %v368_v10 = vadd.f32 %v1732_v8, %v367_v9 }
  0xc0   : > { %v377_v11 = vpack.c.bf16 %v368_v10, %v368_v10 }
  0xc2   : > { %v382_v12 = vunpack.c.l.b16 %v377_v11 }
  0xc4   : > { %v2189_v13 = vpack.c.b16 %v382_v12, %v382_v12 }
  0xc5   : > { %v369_v14 = vpop.f32.mrf.mxu0 }
  0xc6   : > { %v370_v15 = vadd.f32 %v1732_v8, %v369_v14  ;;  %534 = vrot.lane.b32.xlu2 %v2189_v13, %s2001_s30 }
  0xc8   : > { %v378_v16 = vpack.c.bf16 %v370_v15, %v370_v15 }
  0xca   : > { %v407_v17 = vunpack.c.l.b16 %v378_v16 }
  0xcc   : > { %v2193_v18 = vpack.c.b16 %v407_v17, %v407_v17 }
  0xcd   : > { %v372_v19 = vpop.f32.mrf.mxu0 }
  0xce   : > { %v373_v20 = vadd.f32 %v1732_v8, %v372_v19  ;;  %409 = vrot.lane.b32.xlu0 %v2193_v18, %s2002_s9  ;;  %556 = vrot.lane.b32.xlu2 %v2193_v18, %s2001_s30 }
  0xd0   : > { %v379_v21 = vpack.c.bf16 %v373_v20, %v373_v20 }
  0xd2   : > { %v431_v22 = vunpack.c.l.b16 %v379_v21 }
  0xd4   : > { %v2198_v23 = vpack.c.b16 %v431_v22, %v431_v22 }
  0xd5   : > { %v374_v24 = vpop.f32.mrf.mxu0 }
  0xd6   : > { %433 = vrot.lane.b32.xlu1 %v2198_v23, %s2002_s9  ;;  %384 = vrot.lane.b32.xlu0 %v2189_v13, %s2002_s9  ;;  %v375_v25 = vadd.f32 %v1732_v8, %v374_v24 }
  0xd8   : > { %v380_v26 = vpack.c.bf16 %v375_v25, %v375_v25 }
  0xda   : > { %v455_v27 = vunpack.c.l.b16 %v380_v26 }
  0xdc   : > { %v2202_v28 = vpack.c.b16 %v455_v27, %v455_v27 }
  0xde   : > { %457 = vrot.lane.b32.xlu1 %v2202_v28, %s2002_s9  ;;  %s1938_s9 = scalar_lea.hbm %s2462_s6, 64 }
 0x120   : > { %v535_v29 = vpop.permute.xlu2 %534 }
 0x121   : > { %v541_v30 = vsel %vm539_vm1, %v535_v29, 0 }
 0x122   : > { %550 = vmatpush.bf16.msra.mxu2 %v541_v30 }
 0x128   : > { %v557_v33 = vpop.permute.xlu2 %556 }
 0x129   : > { %v562_v38 = vsel %vm539_vm1, %v557_v33, 0 }
 0x140   : > { %v410_v31 = vpop.permute.xlu0 %409 }
 0x141   : > { %v415_v32 = vsel %vm386_vm2, %v410_v31, 0 }
 0x142   : > { %424 = vmatpush.bf16.xpose.msra.mxu3 %v415_v32 }
 0x148   : > { %v434_v34 = vpop.permute.xlu1 %433  ;;  %v385_v35 = vpop.permute.xlu0 %384 }
 0x149   : > { %1584 = vmatmul.msk.bf16.vlgmr.msra.gmra.mxu3 %vm386_vm2, %v378_v16  ;;  %v391_v36 = vsel %vm386_vm2, %v385_v35, 0  ;;  %v439_v37 = vsel %vm386_vm2, %v434_v34, 0 }
 0x14a   : > { %400 = vmatpush.bf16.xpose.msra.mxu1 %v391_v36  ;;  %448 = vmatpush.bf16.xpose.msrb.mxu3 %v439_v37 }
 0x150   : > { %v458_v39 = vpop.permute.xlu1 %457 }
 0x151   : > { %1583 = vmatmul.msk.bf16.vlgmr.msra.gmra.mxu1 %vm386_vm2, %v377_v11  ;;  %v463_v40 = vsel %vm386_vm2, %v458_v39, 0 }
 0x152   : > { %571 = vmatpush.bf16.msra.mxu3 %v562_v38  ;;  %472 = vmatpush.bf16.xpose.msrb.mxu1 %v463_v40 }
 0x159   : > { %1585 = vmatmul.msk.bf16.vlgmr.msrb.gmra.mxu3 %vm386_vm2, %v379_v21 }
 0x161   : > { %1586 = vmatmul.msk.bf16.vlgmr.msrb.gmra.mxu1 %vm386_vm2, %v380_v26 }
 0x1cc   : > { %v426_v41 = vpop.f32.mrf.mxu3 }
 0x1cd   : > { %v483_v48 = vadd.f32 %v479_v46, %v426_v41 }
 0x1ce   : > { %v402_v43 = vpop.f32.mrf.mxu1 }
 0x1cf   : > { %v482_v44 = vadd.f32 %v478_v42, %v402_v43  ;;  %v489_v50 = vsel %vm386_vm2, %v483_v48, -inf }
 0x1d1   : > { %v486_v45 = vsel %vm386_vm2, %v482_v44, -inf }
 0x1d2   : > { %487 = vmax.xlane.f32.xlu2 %v486_v45 }
 0x1d4   : > { %v428_v47 = vpop.f32.mrf.mxu3 }
 0x1d6   : > { %v404_v49 = vpop.f32.mrf.mxu1 }
 0x1da   : > { %490 = vmax.xlane.f32.xlu2 %v489_v50 }
 0x1dc   : > { %v450_v52 = vpop.f32.mrf.mxu3 }
 0x1dd   : > { %v484_v54 = vadd.f32 %v480_v51, %v450_v52 }
 0x1de   : > { %v474_v55 = vpop.f32.mrf.mxu1 }
 0x1df   : > { %v485_v56 = vadd.f32 %v481_v53, %v474_v55  ;;  %v492_v57 = vsel %vm386_vm2, %v484_v54, -inf }
 0x1e0   : > { %493 = vmax.xlane.f32.xlu0 %v492_v57  ;;  %v716_v57 = vld [vmem:[#allocation8 + $0x8] sm:$0xff] }
 0x1e1   : > { %v495_v58 = vsel %vm386_vm2, %v485_v56, -inf }
 0x1e2   : > { %496 = vmax.xlane.f32.xlu1 %v495_v58 }
 0x1e4   : > { %v452_v59 = vpop.f32.mrf.mxu3 }
 0x1e6   : > { %v476_v60 = vpop.f32.mrf.mxu1 }
 0x1f2   : > { %623 = vrot.lane.b32.xlu2 %v2189_v13, %s2003_s12 }
 0x1f4   : > { %625 = vrot.lane.b32.xlu0 %v2189_v13, %s2004_s13 }
 0x1fb   : > { %648 = vrot.lane.b32.xlu1 %v2193_v18, %s2004_s13 }
 0x203   : > { %577 = vrot.lane.b32.xlu1 %v2198_v23, %s2001_s30 }
 0x20b   : > { %598 = vrot.lane.b32.xlu1 %v2202_v28, %s2001_s30  ;;  %s2014_s30 = smov 24  }
 0x213   : > { %671 = vrot.lane.b32.xlu1 %v2198_v23, %s2004_s13 }
 0x21b   : > { %694 = vrot.lane.b32.xlu1 %v2202_v28, %s2004_s13  ;;  %s321_s13 = scalar_lea.vmem [#allocation11], %s1568_s19  ;;  %s1441_s19 = scalar_lea.sflag [#allocation5], %s2166_s26 }
 0x223   : > { %669 = vrot.lane.b32.xlu1 %v2198_v23, %s2003_s12 }
 0x245   : > { %v488_v61 = vpop.xlane.xlu2 %487 }
 0x246   : > { %v498_v62 = vsub.f32 %v482_v44, %v488_v61 }
 0x248   : > { %v502_v63 = vmul.f32 1.442695, %v498_v62 }
 0x24a   : > { %1734 = vpow2.f32 %v502_v63  ;;  %v717_v63 = vld [vmem:[#allocation8 + $0x28] sm:$0xff] }
 0x24d   : > { %v491_v0 = vpop.xlane.xlu2 %490 }
 0x24e   : > { %v499_v1 = vsub.f32 %v483_v48, %v491_v0 }
 0x250   : > { %v1735_v2 = vpop.eup %1734  ;;  %v504_v3 = vmul.f32 1.442695, %v499_v1 }
 0x251   : > { %v510_v4 = vsel %vm386_vm2, %v1735_v2, 0.0 }
 0x252   : > { %1736 = vpow2.f32 %v504_v3  ;;  %511 = vadd.xlane.f32.xlu2 %v510_v4 }
 0x253   : > { %v494_v5 = vpop.xlane.xlu0 %493 }
 0x254   : > { %v500_v6 = vsub.f32 %v484_v54, %v494_v5 }
 0x255   : > { %v497_v12 = vpop.xlane.xlu1 %496  ;;  %v624_v33 = vpop.permute.xlu2 %623 }
 0x256   : > { %v506_v7 = vmul.f32 1.442695, %v500_v6  ;;  %v501_v26 = vsub.f32 %v485_v56, %v497_v12 }
 0x258   : > { %v1737_v8 = vpop.eup %1736  ;;  %1738 = vpow2.f32 %v506_v7  ;;  %v508_v27 = vmul.f32 1.442695, %v501_v26 }
 0x259   : > { %v513_v9 = vsel %vm386_vm2, %v1737_v8, 0.0 }
 0x25a   : > { %514 = vadd.xlane.f32.xlu2 %v513_v9  ;;  %1740 = vpow2.f32 %v508_v27 }
 0x25e   : > { %v1739_v10 = vpop.eup %1738 }
 0x25f   : > { %v516_v11 = vsel %vm386_vm2, %v1739_v10, 0.0 }
 0x260   : > { %517 = vadd.xlane.f32.xlu0 %v516_v11  ;;  %v1741_v31 = vpop.eup %1740 }
 0x261   : > { %v519_v32 = vsel %vm386_vm2, %v1741_v31, 0.0 }
 0x266   : > { %v626_v14 = vpop.permute.xlu0 %625 }
 0x267   : > { %v631_v15 = vsel %vm386_vm2, %v626_v14, 0 }
 0x268   : > { %640 = vmatpush.bf16.xpose.msrb.mxu2 %v631_v15  ;;  %v718_v15 = vld [vmem:[#allocation8 + $0x48] sm:$0xff] }
 0x26d   : > { %v649_v16 = vpop.permute.xlu1 %648 }
 0x26e   : > { %v654_v17 = vsel %vm386_vm2, %v649_v16, 0 }
 0x26f   : > { %663 = vmatpush.bf16.xpose.msrb.mxu3 %v654_v17 }
 0x272   : > { %646 = vrot.lane.b32.xlu2 %v2193_v18, %s2003_s12 }
 0x274   : > { %692 = vrot.lane.b32.xlu0 %v2202_v28, %s2003_s12 }
 0x275   : > { %v578_v19 = vpop.permute.xlu1 %577 }
 0x276   : > { %v583_v20 = vsel %vm539_vm1, %v578_v19, 0 }
 0x277   : > { %592 = vmatpush.bf16.msrb.mxu0 %v583_v20 }
 0x27c   : > { %902 = vrot.lane.b32.xlu0 %v2193_v18, %s2005_s11 }
 0x27d   : > { %v599_v21 = vpop.permute.xlu1 %598 }
 0x27e   : > { %v604_v22 = vsel %vm539_vm1, %v599_v21, 0 }
 0x27f   : > { %613 = vmatpush.bf16.msra.mxu1 %v604_v22 }
 0x285   : > { %v672_v24 = vpop.permute.xlu1 %671 }
 0x286   : > { %v677_v25 = vsel %vm386_vm2, %v672_v24, 0 }
 0x287   : > { %686 = vmatpush.bf16.xpose.msra.mxu0 %v677_v25 }
 0x28d   : > { %v695_v29 = vpop.permute.xlu1 %694 }
 0x28e   : > { %v700_v30 = vsel %vm386_vm2, %v695_v29, 0 }
 0x28f   : > { %709 = vmatpush.bf16.xpose.msrb.mxu1 %v700_v30 }
 0x295   : > { %v670_v47 = vpop.permute.xlu1 %669 }
 0x29b   : > { %520 = vadd.xlane.f32.xlu2 %v519_v32 }
 0x2c5   : > { %v512_v34 = vpop.xlane.xlu2 %511 }
 0x2c6   : > { %1742 = vrcp.f32 %v512_v34 }
 0x2cc   : > { %v1743_v35 = vpop.eup %1742 }
 0x2cd   : > { %v515_v36 = vpop.xlane.xlu2 %514  ;;  %v526_v37 = vmul.f32 %v1743_v35, %v1735_v2 }
 0x2ce   : > { %1744 = vrcp.f32 %v515_v36 }
 0x2cf   : > { %v530_v38 = vpack.c.bf16 %v526_v37, %v526_v37 }
 0x2d1   : > { %1587 = vmatmul.msk.bf16.vlgmr.msra.gmra.mxu2 %vm386_vm2, %v530_v38 }
 0x2d3   : > { %v518_v39 = vpop.xlane.xlu0 %517 }
 0x2d4   : > { %v1745_v40 = vpop.eup %1744  ;;  %1746 = vrcp.f32 %v518_v39 }
 0x2d5   : > { %v527_v41 = vmul.f32 %v1745_v40, %v1737_v8  ;;  %v647_v46 = vpop.permute.xlu2 %646 }
 0x2d7   : > { %v531_v42 = vpack.c.bf16 %v527_v41, %v527_v41 }
 0x2d9   : > { %1588 = vmatmul.msk.bf16.vlgmr.msra.gmra.mxu3 %vm386_vm2, %v531_v42 }
 0x2da   : > { %v1747_v43 = vpop.eup %1746 }
 0x2db   : > { %v528_v44 = vmul.f32 %v1747_v43, %v1739_v10  ;;  %v719_v10 = vld [vmem:[#allocation8 + $0x68] sm:$0xff] }
 0x2dd   : > { %v532_v45 = vpack.c.bf16 %v528_v44, %v528_v44 }
 0x2df   : > { %1589 = vmatmul.msk.bf16.vlgmr.msrb.gmra.mxu0 %vm386_vm2, %v532_v45 }
 0x2e1   : > { %1591 = vmatmul.msk.bf16.vlgmr.msrb.gmra.mxu2 %vm386_vm2, %v624_v33 }
 0x2e6   : > { %v693_v52 = vpop.permute.xlu0 %692 }
 0x2e9   : > { %1592 = vmatmul.msk.bf16.vlgmr.msrb.gmra.mxu3 %vm386_vm2, %v647_v46 }
 0x2ee   : > { %v903_v35 = vpop.permute.xlu0 %902 }
 0x2ef   : > { %1593 = vmatmul.msk.bf16.vlgmr.msra.gmra.mxu0 %vm386_vm2, %v670_v47  ;;  %v908_v38 = vsel %vm386_vm2, %v903_v35, 0 }
 0x30e   : > { %v521_v48 = vpop.xlane.xlu2 %520 }
 0x30f   : > { %1748 = vrcp.f32 %v521_v48 }
 0x315   : > { %v1749_v49 = vpop.eup %1748 }
 0x316   : > { %v529_v50 = vmul.f32 %v1749_v49, %v1741_v31 }
 0x318   : > { %v533_v51 = vpack.c.bf16 %v529_v50, %v529_v50 }
 0x31a   : > { %1590 = vmatmul.msk.bf16.vlgmr.msra.gmra.mxu1 %vm386_vm2, %v533_v51 }
 0x32a   : > { %1594 = vmatmul.msk.bf16.vlgmr.msrb.gmra.mxu1 %vm386_vm2, %v693_v52 }
 0x354   : > { %v552_v53 = vpop.f32.mrf.mxu2 }
 0x355   : > { %619 = vst.msk [vmem:[#allocation2] sm:$0xff] %vm386_vm2, %v552_v53 }
 0x35c   : > { %v554_v54 = vpop.f32.mrf.mxu2  ;;  %v573_v55 = vpop.f32.mrf.mxu3 }
 0x35d   : > { %620 = vst.msk [vmem:[#allocation2 + $0x8] sm:$0xff] %vm386_vm2, %v573_v55  ;;  %v594_v56 = vpop.f32.mrf.mxu0 }
 0x35e   : > { %621 = vst.msk [vmem:[#allocation2 + $0x10] sm:$0xff] %vm386_vm2, %v594_v56 }
 0x364   : > { %v575_v58 = vpop.f32.mrf.mxu3  ;;  %v642_v59 = vpop.f32.mrf.mxu2 }
 0x365   : > { %v596_v60 = vpop.f32.mrf.mxu0  ;;  %v720_v61 = vadd.f32 %v716_v57, %v642_v59 }
 0x367   : > { %v724_v62 = vsel %vm386_vm2, %v720_v61, -inf }
 0x368   : > { %725 = vmax.xlane.f32.xlu2 %v724_v62 }
 0x36c   : > { %v644_v0 = vpop.f32.mrf.mxu2  ;;  %v665_v1 = vpop.f32.mrf.mxu3 }
 0x36d   : > { %v721_v2 = vadd.f32 %v717_v63, %v665_v1  ;;  %v688_v3 = vpop.f32.mrf.mxu0 }
 0x36e   : > { %v722_v16 = vadd.f32 %v718_v15, %v688_v3 }
 0x36f   : > { %v727_v4 = vsel %vm386_vm2, %v721_v2, -inf }
 0x370   : > { %728 = vmax.xlane.f32.xlu1 %v727_v4  ;;  %v730_v17 = vsel %vm386_vm2, %v722_v16, -inf }
 0x374   : > { %v667_v5 = vpop.f32.mrf.mxu3 }
 0x375   : > { %v690_v6 = vpop.f32.mrf.mxu0 }
 0x380   : > { %772 = vrot.lane.b32.xlu2 %v2189_v13, %s2006_s16 }
 0x388   : > { %879 = vrot.lane.b32.xlu2 %v2189_v13, %s2005_s11 }
 0x389   : > { %793 = vrot.lane.b32.xlu1 %v2193_v18, %s2006_s16 }
 0x391   : > { %900 = vrot.lane.b32.xlu1 %v2193_v18, %s2007_s29 }
 0x397   : > { %v615_v7 = vpop.f32.mrf.mxu1 }
 0x398   : > { %622 = vst.msk [vmem:[#allocation2 + $0x18] sm:$0xff] %vm386_vm2, %v615_v7 }
 0x39f   : > { %v617_v8 = vpop.f32.mrf.mxu1 }
 0x3a7   : > { %v711_v9 = vpop.f32.mrf.mxu1 }
 0x3a8   : > { %v723_v11 = vadd.f32 %v719_v10, %v711_v9 }
 0x3aa   : > { %v733_v14 = vsel %vm386_vm2, %v723_v11, -inf }
 0x3af   : > { %v713_v12 = vpop.f32.mrf.mxu1 }
 0x3b1   : > { %734 = vmax.xlane.f32.xlu2 %v733_v14 }
 0x3b9   : > { %731 = vmax.xlane.f32.xlu2 %v730_v17 }
 0x3db   : > { %v726_v19 = vpop.xlane.xlu2 %725 }
 0x3dc   : > { %v736_v20 = vsub.f32 %v720_v61, %v726_v19 }
 0x3de   : > { %v740_v21 = vmul.f32 1.442695, %v736_v20  ;;  %v970_v20 = vld [vmem:[#allocation8 + $0x10] sm:$0xff] }
 0x3e0   : > { %1750 = vpow2.f32 %v740_v21 }
 0x3e3   : > { %v729_v22 = vpop.xlane.xlu1 %728  ;;  %v773_v24 = vpop.permute.xlu2 %772 }
 0x3e4   : > { %v737_v25 = vsub.f32 %v721_v2, %v729_v22  ;;  %v778_v26 = vsel %vm539_vm1, %v773_v24, 0 }
 0x3e5   : > { %787 = vmatpush.bf16.msra.mxu2 %v778_v26  ;;  %v971_v26 = vld [vmem:[#allocation8 + $0x30] sm:$0xff] }
 0x3e6   : > { %v1751_v27 = vpop.eup %1750  ;;  %v742_v29 = vmul.f32 1.442695, %v737_v25 }
 0x3e7   : > { %v748_v30 = vsel %vm386_vm2, %v1751_v27, 0.0 }
 0x3e8   : > { %1752 = vpow2.f32 %v742_v29  ;;  %749 = vadd.xlane.f32.xlu0 %v748_v30 }
 0x3eb   : > { %v880_v31 = vpop.permute.xlu2 %879 }
 0x3ec   : > { %v885_v32 = vsel %vm386_vm2, %v880_v31, 0 }
 0x3ed   : > { %894 = vmatpush.bf16.xpose.msrb.mxu2 %v885_v32 }
 0x3ee   : > { %v1753_v33 = vpop.eup %1752 }
 0x3ef   : > { %v751_v34 = vsel %vm386_vm2, %v1753_v33, 0.0 }
 0x3f0   : > { %752 = vadd.xlane.f32.xlu2 %v751_v34 }
 0x3fb   : > { %v794_v36 = vpop.permute.xlu1 %793 }
 0x3fc   : > { %v799_v37 = vsel %vm539_vm1, %v794_v36, 0  ;;  %814 = vrot.lane.b32.xlu0 %v2198_v23, %s2006_s16  ;;  %v973_v36 = vld [vmem:[#allocation8 + $0x70] sm:$0xff] }
 0x3fd   : > { %808 = vmatpush.bf16.msra.mxu3 %v799_v37 }
 0x401   : > { %917 = vmatpush.bf16.xpose.msrb.mxu3 %v908_v38 }
 0x403   : > { %v901_v62 = vpop.permute.xlu1 %900 }
 0x404   : > { %835 = vrot.lane.b32.xlu0 %v2202_v28, %s2006_s16 }
 0x408   : > { %877 = vrot.lane.b32.xlu2 %v2189_v13, %s2007_s29 }
 0x40c   : > { %925 = vrot.lane.b32.xlu0 %v2198_v23, %s2005_s11 }
 0x414   : > { %948 = vrot.lane.b32.xlu0 %v2202_v28, %s2005_s11  ;;  %s1635_s11 = sshll.u32 %s2072_s25, 5 }
 0x41c   : > { %923 = vrot.lane.b32.xlu0 %v2198_v23, %s2007_s29 }
 0x424   : > { %v735_v39 = vpop.xlane.xlu2 %734 }
 0x425   : > { %v739_v40 = vsub.f32 %v723_v11, %v735_v39 }
 0x427   : > { %v746_v41 = vmul.f32 1.442695, %v739_v40 }
 0x429   : > { %1754 = vpow2.f32 %v746_v41  ;;  %v972_v41 = vld [vmem:[#allocation8 + $0x50] sm:$0xff] }
 0x42c   : > { %v732_v42 = vpop.xlane.xlu2 %731 }
 0x42d   : > { %v738_v43 = vsub.f32 %v722_v16, %v732_v42 }
 0x42f   : > { %v1755_v44 = vpop.eup %1754  ;;  %v744_v45 = vmul.f32 1.442695, %v738_v43 }
 0x430   : > { %v757_v46 = vsel %vm386_vm2, %v1755_v44, 0.0 }
 0x431   : > { %1756 = vpow2.f32 %v744_v45  ;;  %758 = vadd.xlane.f32.xlu1 %v757_v46 }
 0x437   : > { %v1757_v47 = vpop.eup %1756 }
 0x438   : > { %v754_v48 = vsel %vm386_vm2, %v1757_v47, 0.0 }
 0x439   : > { %755 = vadd.xlane.f32.xlu2 %v754_v48 }
 0x44a   : > { %1026 = vrot.lane.b32.xlu1 %v2189_v13, %s2008_s18 }
 0x451   : > { %946 = vrot.lane.b32.xlu2 %v2202_v28, %s2007_s29 }
 0x459   : > { %1156 = vrot.lane.b32.xlu2 %v2193_v18, %s2009_s7 }
 0x45b   : > { %v750_v49 = vpop.xlane.xlu0 %749 }
 0x45c   : > { %1758 = vrcp.f32 %v750_v49 }
 0x462   : > { %v1759_v50 = vpop.eup %1758 }
 0x463   : > { %v764_v51 = vmul.f32 %v1759_v50, %v1751_v27  ;;  %v753_v52 = vpop.xlane.xlu2 %752 }
 0x464   : > { %1760 = vrcp.f32 %v753_v52 }
 0x465   : > { %v768_v53 = vpack.c.bf16 %v764_v51, %v764_v51 }
 0x467   : > { %1595 = vmatmul.msk.bf16.vlgmr.msra.gmra.mxu2 %vm386_vm2, %v768_v53 }
 0x46a   : > { %v1761_v54 = vpop.eup %1760 }
 0x46b   : > { %v765_v55 = vmul.f32 %v1761_v54, %v1753_v33  ;;  %v878_v59 = vpop.permute.xlu2 %877 }
 0x46d   : > { %v769_v56 = vpack.c.bf16 %v765_v55, %v765_v55 }
 0x46e   : > { %v815_v57 = vpop.permute.xlu0 %814 }
 0x46f   : > { %v820_v58 = vsel %vm539_vm1, %v815_v57, 0  ;;  %1596 = vmatmul.msk.bf16.vlgmr.msra.gmra.mxu3 %vm386_vm2, %v769_v56 }
 0x470   : > { %829 = vmatpush.bf16.msrb.mxu0 %v820_v58 }
 0x476   : > { %v836_v60 = vpop.permute.xlu0 %835 }
 0x477   : > { %v841_v61 = vsel %vm539_vm1, %v836_v60, 0  ;;  %1599 = vmatmul.msk.bf16.vlgmr.msrb.gmra.mxu2 %vm386_vm2, %v878_v59 }
 0x478   : > { %850 = vmatpush.bf16.msra.mxu1 %v841_v61 }
 0x47e   : > { %v926_v63 = vpop.permute.xlu0 %925 }
 0x47f   : > { %v931_v0 = vsel %vm386_vm2, %v926_v63, 0  ;;  %1600 = vmatmul.msk.bf16.vlgmr.msrb.gmra.mxu3 %vm386_vm2, %v901_v62 }
 0x480   : > { %940 = vmatpush.bf16.xpose.msra.mxu0 %v931_v0 }
 0x486   : > { %v949_v1 = vpop.permute.xlu0 %948 }
 0x487   : > { %v954_v2 = vsel %vm386_vm2, %v949_v1, 0 }
 0x488   : > { %963 = vmatpush.bf16.xpose.msrb.mxu1 %v954_v2 }
 0x48e   : > { %v924_v15 = vpop.permute.xlu0 %923 }
 0x4a4   : > { %v759_v3 = vpop.xlane.xlu1 %758 }
 0x4a5   : > { %1762 = vrcp.f32 %v759_v3 }
 0x4ab   : > { %v1763_v4 = vpop.eup %1762 }
 0x4ac   : > { %v767_v5 = vmul.f32 %v1763_v4, %v1755_v44  ;;  %v756_v6 = vpop.xlane.xlu2 %755 }
 0x4ad   : > { %1764 = vrcp.f32 %v756_v6 }
 0x4ae   : > { %v771_v7 = vpack.c.bf16 %v767_v5, %v767_v5 }
 0x4b0   : > { %1598 = vmatmul.msk.bf16.vlgmr.msra.gmra.mxu1 %vm386_vm2, %v771_v7 }
 0x4b3   : > { %v1765_v8 = vpop.eup %1764 }
 0x4b4   : > { %v766_v9 = vmul.f32 %v1765_v8, %v1757_v47  ;;  %v947_v14 = vpop.permute.xlu2 %946 }
 0x4b6   : > { %v770_v10 = vpack.c.bf16 %v766_v9, %v766_v9 }
 0x4b8   : > { %1597 = vmatmul.msk.bf16.vlgmr.msrb.gmra.mxu0 %vm386_vm2, %v770_v10 }
 0x4bc   : > { %v1027_v11 = vpop.permute.xlu1 %1026  ;;  %v1157_v56 = vpop.permute.xlu2 %1156 }
 0x4bd   : > { %v1032_v12 = vsel %vm539_vm1, %v1027_v11, 0  ;;  %v1162_v60 = vsel %vm386_vm2, %v1157_v56, 0 }
 0x4be   : > { %1041 = vmatpush.bf16.msra.mxu2 %v1032_v12 }
 0x4c0   : > { %1602 = vmatmul.msk.bf16.vlgmr.msrb.gmra.mxu1 %vm386_vm2, %v947_v14 }
 0x4c8   : > { %1601 = vmatmul.msk.bf16.vlgmr.msra.gmra.mxu0 %vm386_vm2, %v924_v15 }
 0x4ea   : > { %v2310_v16 = vpop.f32.mrf.mxu2 }
 0x4f2   : > { %v791_v17 = vpop.f32.mrf.mxu2  ;;  %v2312_v19 = vpop.f32.mrf.mxu3 }
 0x4fa   : > { %v812_v21 = vpop.f32.mrf.mxu3  ;;  %v896_v22 = vpop.f32.mrf.mxu2 }
 0x4fb   : > { %v974_v24 = vadd.f32 %v970_v20, %v896_v22 }
 0x4fd   : > { %v978_v25 = vsel %vm386_vm2, %v974_v24, -inf }
 0x4fe   : > { %979 = vmax.xlane.f32.xlu1 %v978_v25 }
 0x502   : > { %v898_v27 = vpop.f32.mrf.mxu2  ;;  %v919_v29 = vpop.f32.mrf.mxu3 }
 0x503   : > { %v975_v30 = vadd.f32 %v971_v26, %v919_v29 }
 0x505   : > { %v981_v31 = vsel %vm386_vm2, %v975_v30, -inf }
 0x506   : > { %982 = vmax.xlane.f32.xlu0 %v981_v31 }
 0x50a   : > { %v921_v32 = vpop.f32.mrf.mxu3 }
 0x51a   : > { %1047 = vrot.lane.b32.xlu0 %v2193_v18, %s2008_s18 }
 0x52d   : > { %v2318_v33 = vpop.f32.mrf.mxu1 }
 0x535   : > { %v2320_v34 = vpop.f32.mrf.mxu0  ;;  %v854_v35 = vpop.f32.mrf.mxu1 }
 0x53d   : > { %v833_v37 = vpop.f32.mrf.mxu0  ;;  %v965_v38 = vpop.f32.mrf.mxu1 }
 0x53e   : > { %v977_v39 = vadd.f32 %v973_v36, %v965_v38 }
 0x540   : > { %v987_v40 = vsel %vm386_vm2, %v977_v39, -inf }
 0x541   : > { %988 = vmax.xlane.f32.xlu1 %v987_v40 }
 0x545   : > { %v942_v42 = vpop.f32.mrf.mxu0  ;;  %v967_v43 = vpop.f32.mrf.mxu1 }
 0x546   : > { %v976_v44 = vadd.f32 %v972_v41, %v942_v42 }
 0x548   : > { %v984_v45 = vsel %vm386_vm2, %v976_v44, -inf }
 0x549   : > { %985 = vmax.xlane.f32.xlu1 %v984_v45 }
 0x54d   : > { %v944_v46 = vpop.f32.mrf.mxu0 }
 0x562   : > { %1133 = vrot.lane.b32.xlu1 %v2189_v13, %s2009_s7 }
 0x571   : > { %v980_v47 = vpop.xlane.xlu1 %979 }
 0x572   : > { %v990_v48 = vsub.f32 %v974_v24, %v980_v47 }
 0x574   : > { %v994_v49 = vmul.f32 1.442695, %v990_v48  ;;  %v1224_v48 = vld [vmem:[#allocation8 + $0x18] sm:$0xff] }
 0x576   : > { %1766 = vpow2.f32 %v994_v49 }
 0x579   : > { %v983_v50 = vpop.xlane.xlu0 %982 }
 0x57a   : > { %v991_v51 = vsub.f32 %v975_v30, %v983_v50 }
 0x57c   : > { %v1767_v52 = vpop.eup %1766  ;;  %v996_v54 = vmul.f32 1.442695, %v991_v51 }
 0x57d   : > { %v1002_v53 = vsel %vm386_vm2, %v1767_v52, 0.0 }
 0x57e   : > { %1003 = vadd.xlane.f32.xlu2 %v1002_v53  ;;  %1768 = vpow2.f32 %v996_v54  ;;  %v1225_v54 = vld [vmem:[#allocation8 + $0x38] sm:$0xff] }
 0x584   : > { %v1769_v55 = vpop.eup %1768 }
 0x585   : > { %v1005_v57 = vsel %vm386_vm2, %v1769_v55, 0.0 }
 0x58c   : > { %1006 = vadd.xlane.f32.xlu1 %v1005_v57  ;;  %v1048_v58 = vpop.permute.xlu0 %1047 }
 0x58d   : > { %v1053_v59 = vsel %vm539_vm1, %v1048_v58, 0 }
 0x58e   : > { %1062 = vmatpush.bf16.msra.mxu3 %v1053_v59 }
 0x592   : > { %1171 = vmatpush.bf16.xpose.msrb.mxu3 %v1162_v60 }
 0x596   : > { %1131 = vrot.lane.b32.xlu2 %v2189_v13, %s2010_s20 }
 0x59e   : > { %1154 = vrot.lane.b32.xlu2 %v2193_v18, %s2010_s20 }
 0x5a6   : > { %1068 = vrot.lane.b32.xlu2 %v2198_v23, %s2008_s18 }
 0x5ae   : > { %1202 = vrot.lane.b32.xlu2 %v2202_v28, %s2009_s7 }
 0x5b4   : > { %v989_v61 = vpop.xlane.xlu1 %988 }
 0x5b5   : > { %v993_v62 = vsub.f32 %v977_v39, %v989_v61 }
 0x5b6   : > { %1177 = vrot.lane.b32.xlu2 %v2198_v23, %s2010_s20 }
 0x5b7   : > { %v1000_v63 = vmul.f32 1.442695, %v993_v62  ;;  %v1226_v62 = vld [vmem:[#allocation8 + $0x58] sm:$0xff] }
 0x5b9   : > { %1770 = vpow2.f32 %v1000_v63 }
 0x5bc   : > { %v986_v0 = vpop.xlane.xlu1 %985 }
 0x5bd   : > { %v992_v1 = vsub.f32 %v976_v44, %v986_v0 }
 0x5be   : > { %1200 = vrot.lane.b32.xlu2 %v2202_v28, %s2010_s20 }
 0x5bf   : > { %v1771_v2 = vpop.eup %1770  ;;  %v998_v3 = vmul.f32 1.442695, %v992_v1 }
 0x5c0   : > { %v1011_v4 = vsel %vm386_vm2, %v1771_v2, 0.0 }
 0x5c1   : > { %1772 = vpow2.f32 %v998_v3  ;;  %1012 = vadd.xlane.f32.xlu1 %v1011_v4  ;;  %v1227_v4 = vld [vmem:[#allocation8 + $0x78] sm:$0xff] }
 0x5c7   : > { %v1773_v5 = vpop.eup %1772 }
 0x5c8   : > { %v1008_v6 = vsel %vm386_vm2, %v1773_v5, 0.0 }
 0x5c9   : > { %1009 = vadd.xlane.f32.xlu0 %v1008_v6 }
 0x5d4   : > { %v1134_v7 = vpop.permute.xlu1 %1133 }
 0x5d5   : > { %v1139_v8 = vsel %vm386_vm2, %v1134_v7, 0 }
 0x5d6   : > { %1148 = vmatpush.bf16.xpose.msrb.mxu2 %v1139_v8 }
 0x5da   : > { %1179 = vrot.lane.b32.xlu1 %v2198_v23, %s2009_s7  ;;  %s1453_s7 = sshll.u32 %s321_s13, 4  ;;  %s1454_s7 = int_to_ptr.vmem [resolvable:$true] %s1453_s7 }
 0x5dd   : > { %1089 = vrot.lane.b32.xlu0 %v2202_v28, %s2008_s18  ;;  %s1452_s18 = scalar_lea.hbm %s2462_s6, %s1635_s11 }
 0x5de   : > { %s1455_s20 = sshll.u32 %s1452_s18, 4  ;;  %s1456_s20 = int_to_ptr.hbm [resolvable:$true] %s1455_s20 }
 0x5f1   : > { %v1004_v9 = vpop.xlane.xlu2 %1003 }
 0x5f2   : > { %1774 = vrcp.f32 %v1004_v9 }
 0x5f8   : > { %v1775_v10 = vpop.eup %1774 }
 0x5f9   : > { %v1018_v11 = vmul.f32 %v1775_v10, %v1767_v52  ;;  %v1132_v12 = vpop.permute.xlu2 %1131 }
 0x5fb   : > { %v1022_v14 = vpack.c.bf16 %v1018_v11, %v1018_v11 }
 0x5fd   : > { %1603 = vmatmul.msk.bf16.vlgmr.msra.gmra.mxu2 %vm386_vm2, %v1022_v14 }
 0x5ff   : > { %v1007_v15 = vpop.xlane.xlu1 %1006 }
 0x600   : > { %1776 = vrcp.f32 %v1007_v15 }
 0x601   : > { %v1155_v17 = vpop.permute.xlu2 %1154 }
 0x606   : > { %v1777_v20 = vpop.eup %1776 }
 0x607   : > { %v1019_v21 = vmul.f32 %v1777_v20, %v1769_v55 }
 0x609   : > { %v1023_v22 = vpack.c.bf16 %v1019_v21, %v1019_v21  ;;  %v1069_v24 = vpop.permute.xlu2 %1068 }
 0x60a   : > { %v1074_v25 = vsel %vm539_vm1, %v1069_v24, 0 }
 0x60b   : > { %1604 = vmatmul.msk.bf16.vlgmr.msra.gmra.mxu3 %vm386_vm2, %v1023_v22  ;;  %1083 = vmatpush.bf16.msrb.mxu0 %v1074_v25 }
 0x60d   : > { %1607 = vmatmul.msk.bf16.vlgmr.msrb.gmra.mxu2 %vm386_vm2, %v1132_v12 }
 0x611   : > { %v1203_v36 = vpop.permute.xlu2 %1202 }
 0x612   : > { %v1208_v41 = vsel %vm386_vm2, %v1203_v36, 0 }
 0x619   : > { %v1178_v43 = vpop.permute.xlu2 %1177 }
 0x61b   : > { %1608 = vmatmul.msk.bf16.vlgmr.msrb.gmra.mxu3 %vm386_vm2, %v1155_v17 }
 0x621   : > { %v1201_v44 = vpop.permute.xlu2 %1200 }
 0x634   : > { %v1013_v27 = vpop.xlane.xlu1 %1012 }
 0x63c   : > { %v1010_v26 = vpop.xlane.xlu0 %1009 }
 0x63d   : > { %1778 = vrcp.f32 %v1010_v26 }
 0x63e   : > { %1780 = vrcp.f32 %v1013_v27 }
 0x643   : > { %v1779_v29 = vpop.eup %1778 }
 0x644   : > { %v1020_v30 = vmul.f32 %v1779_v29, %v1773_v5  ;;  %v1781_v32 = vpop.eup %1780 }
 0x645   : > { %v1021_v38 = vmul.f32 %v1781_v32, %v1771_v2 }
 0x646   : > { %v1024_v31 = vpack.c.bf16 %v1020_v30, %v1020_v30 }
 0x647   : > { %v1025_v42 = vpack.c.bf16 %v1021_v38, %v1021_v38 }
 0x648   : > { %1605 = vmatmul.msk.bf16.vlgmr.msrb.gmra.mxu0 %vm386_vm2, %v1024_v31 }
 0x64c   : > { %v1180_v35 = vpop.permute.xlu1 %1179 }
 0x64d   : > { %v1185_v37 = vsel %vm386_vm2, %v1180_v35, 0 }
 0x64e   : > { %1194 = vmatpush.bf16.xpose.msra.mxu0 %v1185_v37 }
 0x64f   : > { %v1090_v39 = vpop.permute.xlu0 %1089 }
 0x650   : > { %v1095_v40 = vsel %vm539_vm1, %v1090_v39, 0 }
 0x651   : > { %1104 = vmatpush.bf16.msra.mxu1 %v1095_v40 }
 0x654   : > { %1606 = vmatmul.msk.bf16.vlgmr.msra.gmra.mxu1 %vm386_vm2, %v1025_v42 }
 0x655   : > { %1217 = vmatpush.bf16.xpose.msrb.mxu1 %v1208_v41 }
 0x658   : > { %1609 = vmatmul.msk.bf16.vlgmr.msra.gmra.mxu0 %vm386_vm2, %v1178_v43 }
 0x664   : > { %1610 = vmatmul.msk.bf16.vlgmr.msrb.gmra.mxu1 %vm386_vm2, %v1201_v44 }
 0x680   : > { %v1043_v45 = vpop.f32.mrf.mxu2 }
 0x688   : > { %v1045_v46 = vpop.f32.mrf.mxu2 }
 0x68e   : > { %v1064_v47 = vpop.f32.mrf.mxu3 }
 0x690   : > { %v1150_v49 = vpop.f32.mrf.mxu2 }
 0x691   : > { %v1228_v50 = vadd.f32 %v1224_v48, %v1150_v49 }
 0x693   : > { %v1232_v51 = vsel %vm386_vm2, %v1228_v50, -inf }
 0x694   : > { %1233 = vmax.xlane.f32.xlu0 %v1232_v51 }
 0x696   : > { %v1066_v52 = vpop.f32.mrf.mxu3 }
 0x698   : > { %v1152_v53 = vpop.f32.mrf.mxu2 }
 0x69e   : > { %v1173_v55 = vpop.f32.mrf.mxu3 }
 0x69f   : > { %v1229_v56 = vadd.f32 %v1225_v54, %v1173_v55 }
 0x6a1   : > { %v1235_v57 = vsel %vm386_vm2, %v1229_v56, -inf }
 0x6a2   : > { %1236 = vmax.xlane.f32.xlu2 %v1235_v57 }
 0x6a6   : > { %v1175_v58 = vpop.f32.mrf.mxu3 }
 0x6c5   : > { %v2359_v59 = vpop.f32.mrf.mxu0 }
 0x6cd   : > { %v1087_v60 = vpop.f32.mrf.mxu0 }
 0x6d1   : > { %v2361_v61 = vpop.f32.mrf.mxu1 }
 0x6d5   : > { %v1196_v63 = vpop.f32.mrf.mxu0 }
 0x6d6   : > { %v1230_v0 = vadd.f32 %v1226_v62, %v1196_v63 }
 0x6d8   : > { %v1238_v1 = vsel %vm386_vm2, %v1230_v0, -inf }
 0x6d9   : > { %1239 = vmax.xlane.f32.xlu1 %v1238_v1  ;;  %v1108_v2 = vpop.f32.mrf.mxu1 }
 0x6dd   : > { %v1198_v3 = vpop.f32.mrf.mxu0 }
 0x6e1   : > { %v1219_v5 = vpop.f32.mrf.mxu1 }
 0x6e2   : > { %v1231_v6 = vadd.f32 %v1227_v4, %v1219_v5 }
 0x6e4   : > { %v1241_v7 = vsel %vm386_vm2, %v1231_v6, -inf }
 0x6e5   : > { %1242 = vmax.xlane.f32.xlu0 %v1241_v7  ;;  %v1633_v7 = vld [vmem:[#allocation9] sm:$0xff] }
 0x6e9   : > { %v1221_v8 = vpop.f32.mrf.mxu1 }
 0x6f9   : > { %1280 = vrot.lane.b32.xlu0 %v2189_v13, %s2011_s15 }
 0x701   : > { %1322 = vrot.lane.b32.xlu0 %v2198_v23, %s2011_s15 }
 0x707   : > { %v1234_v9 = vpop.xlane.xlu0 %1233 }
 0x708   : > { %v1244_v10 = vsub.f32 %v1228_v50, %v1234_v9 }
 0x709   : > { %860 = vrot.lane.b32.xlu0 %v2310_v16, %s2012_s27 }
 0x70a   : > { %v1248_v11 = vmul.f32 1.442695, %v1244_v10 }
 0x70c   : > { %1782 = vpow2.f32 %v1248_v11 }
 0x711   : > { %1114 = vrot.lane.b32.xlu0 %v1043_v45, %s2013_s8 }
 0x712   : > { %v1783_v12 = vpop.eup %1782 }
 0x713   : > { %v1256_v14 = vsel %vm386_vm2, %v1783_v12, 0.0 }
 0x714   : > { %1257 = vadd.xlane.f32.xlu2 %v1256_v14 }
 0x715   : > { %v1237_v21 = vpop.xlane.xlu2 %1236 }
 0x716   : > { %v1245_v24 = vsub.f32 %v1229_v56, %v1237_v21 }
 0x72c   : > { %1301 = vrot.lane.b32.xlu2 %v2193_v18, %s2011_s15  ;;  %v1250_v18 = vmul.f32 1.442695, %v1245_v24 }
 0x734   : > { %862 = vrot.lane.b32.xlu2 %v2312_v19, %s2012_s27 }
 0x73c   : > { %1116 = vrot.lane.b32.xlu2 %v1064_v47, %s2013_s8 }
 0x74c   : > { %v1240_v13 = vpop.xlane.xlu1 %1239 }
 0x74d   : > { %v1246_v15 = vsub.f32 %v1230_v0, %v1240_v13 }
 0x74f   : > { %v1252_v20 = vmul.f32 1.442695, %v1246_v15  ;;  %v1733_v15 = vld [vmem:[%s2461_s5] ss:$0 sm:$0xff] }
 0x758   : > { %v1243_v23 = vpop.xlane.xlu0 %1242 }
 0x759   : > { %v1247_v16 = vsub.f32 %v1231_v6, %v1243_v23 }
 0x75b   : > { %v1254_v17 = vmul.f32 1.442695, %v1247_v16 }
 0x75d   : > { %1784 = vpow2.f32 %v1254_v17 }
 0x75e   : > { %1786 = vpow2.f32 %v1252_v20 }
 0x75f   : > { %1788 = vpow2.f32 %v1250_v18 }
 0x763   : > { %v1785_v22 = vpop.eup %1784 }
 0x764   : > { %v1265_v25 = vsel %vm386_vm2, %v1785_v22, 0.0  ;;  %v1787_v26 = vpop.eup %1786 }
 0x765   : > { %1266 = vadd.xlane.f32.xlu1 %v1265_v25  ;;  %v1262_v29 = vsel %vm386_vm2, %v1787_v26, 0.0  ;;  %v1789_v30 = vpop.eup %1788 }
 0x766   : > { %v1259_v35 = vsel %vm386_vm2, %v1789_v30, 0.0 }
 0x76b   : > { %v1281_v19 = vpop.permute.xlu0 %1280 }
 0x76c   : > { %v1286_v27 = vsel %vm539_vm1, %v1281_v19, 0 }
 0x76d   : > { %1263 = vadd.xlane.f32.xlu1 %v1262_v29  ;;  %1295 = vmatpush.bf16.msra.mxu2 %v1286_v27 }
 0x773   : > { %v1323_v31 = vpop.permute.xlu0 %1322 }
 0x774   : > { %v1328_v32 = vsel %vm539_vm1, %v1323_v31, 0 }
 0x775   : > { %1260 = vadd.xlane.f32.xlu1 %v1259_v35  ;;  %1337 = vmatpush.bf16.msrb.mxu0 %v1328_v32 }
 0x77b   : > { %v861_v36 = vpop.permute.xlu0 %860 }
 0x77c   : > { %873 = vst.msk [vmem:[#allocation2] sm:$0xff] %vm872_vm3, %v861_v36 }
 0x783   : > { %v1115_v37 = vpop.permute.xlu0 %1114 }
 0x784   : > { %1127 = vst.msk [vmem:[#allocation2] sm:$0xff] %vm1126_vm4, %v1115_v37 }
 0x787   : > { %v1258_v38 = vpop.xlane.xlu2 %1257 }
 0x788   : > { %1790 = vrcp.f32 %v1258_v38 }
 0x78e   : > { %v1791_v39 = vpop.eup %1790  ;;  %1343 = vrot.lane.b32.xlu1 %v2202_v28, %s2011_s15  ;;  %s1932_s15 = sshra.s32 %s1456_s20, 4  ;;  %s1933_s15 = int_to_ptr.hbm [resolvable:$true] %s1932_s15 }
 0x78f   : > { %v1272_v40 = vmul.f32 %v1791_v39, %v1783_v12  ;;  %v1302_v41 = vpop.permute.xlu2 %1301  ;;  %s1934_s25 = scalar_lea.hbm %s1933_s15, 32  ;;  %p1939_p11 = scmp.lt.s32.totalorder %s1933_s15, %s2462_s6 }
 0x790   : > { %v1307_v42 = vsel %vm539_vm1, %v1302_v41, 0  ;;  %p1935_p1 = scmp.ne.s32.totalorder %s1933_s15, %s1934_s25  ;;  %p1940_p9 = scmp.lt.s32.totalorder %s1938_s9, %s1934_s25 }
 0x791   : > { %v1276_v43 = vpack.c.bf16 %v1272_v40, %v1272_v40  ;;  %1316 = vmatpush.bf16.msra.mxu3 %v1307_v42 }
 0x792   : > { %p1936_p4 = pnand %p1935_p1, %p2136_p3  ;;  %p1941_p2 = por %p1940_p9, %p1939_p11 }
 0x793   : > { %1611 = vmatmul.msk.bf16.vlgmr.msra.gmra.mxu2 %vm386_vm2, %v1276_v43 }
 0x794   : > { %p1937_p8 = pneg %p1936_p4 }
 0x796   : > { %864 = vrot.lane.b32.xlu1 %v2320_v34, %s2012_s27  ;;  %p1942_p10 = pnand %p1941_p2, %p1937_p8 }
 0x797   : > { %v863_v44 = vpop.permute.xlu2 %862 }
 0x798   : > { %874 = vst.msk [vmem:[#allocation2 + $0x8] sm:$0xff] %vm872_vm3, %v863_v44 }
 0x79e   : > { %1120 = vrot.lane.b32.xlu1 %v2361_v61, %s2013_s8 }
 0x79f   : > { %v1117_v45 = vpop.permute.xlu2 %1116 }
 0x7a0   : > { %1128 = vst.msk [vmem:[#allocation2 + $0x8] sm:$0xff] %vm1126_vm4, %v1117_v45 }
 0x7d8   : > { %v1267_v28 = vpop.xlane.xlu1 %1266 }
 0x7e0   : > { %v1264_v46 = vpop.xlane.xlu1 %1263 }
 0x7e1   : > { %1792 = vrcp.f32 %v1264_v46 }
 0x7e7   : > { %v1793_v47 = vpop.eup %1792 }
 0x7e8   : > { %v1274_v48 = vmul.f32 %v1793_v47, %v1787_v26  ;;  %v1261_v49 = vpop.xlane.xlu1 %1260 }
 0x7e9   : > { %1794 = vrcp.f32 %v1261_v49 }
 0x7ea   : > { %v1278_v50 = vpack.c.bf16 %v1274_v48, %v1274_v48  ;;  %1796 = vrcp.f32 %v1267_v28 }
 0x7ec   : > { %1613 = vmatmul.msk.bf16.vlgmr.msrb.gmra.mxu0 %vm386_vm2, %v1278_v50 }
 0x7ef   : > { %v1795_v34 = vpop.eup %1794 }
 0x7f0   : > { %v1273_v51 = vmul.f32 %v1795_v34, %v1789_v30  ;;  %v1797_v53 = vpop.eup %1796 }
 0x7f1   : > { %v1275_v54 = vmul.f32 %v1797_v53, %v1785_v22 }
 0x7f2   : > { %v1277_v52 = vpack.c.bf16 %v1273_v51, %v1273_v51 }
 0x7f3   : > { %v1279_v57 = vpack.c.bf16 %v1275_v54, %v1275_v54 }
 0x7f4   : > { %1612 = vmatmul.msk.bf16.vlgmr.msra.gmra.mxu3 %vm386_vm2, %v1277_v52 }
 0x800   : > { %v1344_v55 = vpop.permute.xlu1 %1343 }
 0x801   : > { %v1349_v56 = vsel %vm539_vm1, %v1344_v55, 0 }
 0x802   : > { %1358 = vmatpush.bf16.msra.mxu1 %v1349_v56 }
 0x805   : > { %1614 = vmatmul.msk.bf16.vlgmr.msra.gmra.mxu1 %vm386_vm2, %v1279_v57 }
 0x808   : > { %v865_v58 = vpop.permute.xlu1 %864 }
 0x809   : > { %875 = vst.msk [vmem:[#allocation2 + $0x10] sm:$0xff] %vm872_vm3, %v865_v58 }
 0x810   : > { %v1121_v6 = vpop.permute.xlu1 %1120 }
 0x816   : > { %v1297_v60 = vpop.f32.mrf.mxu2 }
 0x817   : > { %1368 = vrot.lane.b32.xlu0 %v1297_v60, %s2014_s30 }
 0x81e   : > { %v1299_v61 = vpop.f32.mrf.mxu2 }
 0x81f   : > { %866 = vrot.lane.b32.xlu0 %v2318_v33, %s2012_s27  ;;  %v1634_v33 = vld [vmem:[#allocation9 + $0x8] sm:$0xff] }
 0x820   : > { %1423 = vmatpush.bf16.msrb.mxu2 %v1634_v33 }
 0x824   : > { %1424 = vmatpush.bf16.msrb.mxu2 %v1633_v7 }
 0x869   : > { %v1339_v62 = vpop.f32.mrf.mxu0 }
 0x86a   : > { %1372 = vrot.lane.b32.xlu0 %v1339_v62, %s2014_s30 }
 0x871   : > { %v1341_v63 = vpop.f32.mrf.mxu0 }
 0x877   : > { %v1318_v0 = vpop.f32.mrf.mxu3 }
 0x878   : > { %1370 = vrot.lane.b32.xlu2 %v1318_v0, %s2014_s30 }
 0x87f   : > { %v1320_v1 = vpop.f32.mrf.mxu3 }
 0x880   : > { %1118 = vrot.lane.b32.xlu2 %v2359_v59, %s2013_s8 }
 0x882   : > { %v1360_v2 = vpop.f32.mrf.mxu1 }
 0x888   : > { %1374 = vrot.lane.b32.xlu2 %v1360_v2, %s2014_s30 }
 0x889   : > { %v1369_v3 = vpop.permute.xlu0 %1368 }
 0x88a   : > { %1381 = vst.msk [vmem:[#allocation2] sm:$0xff] %vm1380_vm5, %v1369_v3  ;;  %v1362_v4 = vpop.f32.mrf.mxu1 }
 0x891   : > { %v867_v5 = vpop.permute.xlu0 %866  ;;  %v1385_v9 = vld [vmem:[#allocation2] sm:$0xff] }
 0x892   : > { %876 = vst.msk [vmem:[#allocation2 + $0x18] sm:$0xff] %vm872_vm3, %v867_v5 }
 0x893   : > { %1130 = vst.msk [vmem:[#allocation2 + $0x18] sm:$0xff] %vm1126_vm4, %v1121_v6 }
 0x8d2   : > { %v1371_v8 = vpop.permute.xlu2 %1370 }
 0x8d3   : > { %1382 = vst.msk [vmem:[#allocation2 + $0x8] sm:$0xff] %vm1380_vm5, %v1371_v8 }
 0x8da   : > { %v1119_v59 = vpop.permute.xlu2 %1118  ;;  %v1386_v10 = vld [vmem:[#allocation2 + $0x8] sm:$0xff] }
 0x8db   : > { %1129 = vst.msk [vmem:[#allocation2 + $0x10] sm:$0xff] %vm1126_vm4, %v1119_v59  ;;  %v1389_v11 = vpack.c.bf16 %v1386_v10, %v1385_v9 }
 0x8dc   : > { %v1373_v12 = vpop.permute.xlu0 %1372 }
 0x8dd   : > { %1383 = vst.msk [vmem:[#allocation2 + $0x10] sm:$0xff] %vm1380_vm5, %v1373_v12  ;;  %1623 = vmatmul.msk.bf16.vlgmr.msrb.gmra.mxu2 %vm351_vm0, %v1389_v11 }
 0x8e2   : > { %v1375_v14 = vpop.permute.xlu2 %1374 }
 0x8e3   : > { %1384 = vst.msk [vmem:[#allocation2 + $0x18] sm:$0xff] %vm1380_vm5, %v1375_v14 }
 0x8e4   : > { %v1387_v13 = vld [vmem:[#allocation2 + $0x10] sm:$0xff] }
 0x8ea   : > { %v1388_v23 = vld [vmem:[#allocation2 + $0x18] sm:$0xff] }
 0x8eb   : > { %v1390_v16 = vpack.c.bf16 %v1388_v23, %v1387_v13 }
 0x8ed   : > { %1624 = vmatmul.msk.bf16.gmra.mxu2 %vm351_vm0, %v1390_v16 }
 0x960   : > { %v1426_v17 = vpop.f32.mrf.mxu2 }
 0x961   : > { %v1427_v20 = vadd.f32 %v1733_v15, %v1426_v17 }
 0x963   : > { %1436 = vst.msk [vmem:[%s321_s13] sm:$0xff] %vm351_vm0, %v1427_v20 }
 0x968   : > { %v1428_v21 = vpop.f32.mrf.mxu2 }
 0x969   : > { %v1429_v22 = vadd.f32 %v1733_v15, %v1428_v21 }
 0x96b   : > { %1437 = vst.msk [vmem:[%s321_s13 + $0x8] sm:$0xff] %vm351_vm0, %v1429_v22 }
 0x970   : > { %v1431_v24 = vpop.f32.mrf.mxu2 }
 0x971   : > { %v1432_v25 = vadd.f32 %v1733_v15, %v1431_v24 }
 0x973   : > { %1438 = vst.msk [vmem:[%s321_s13 + $0x10] sm:$0xff] %vm351_vm0, %v1432_v25 }
 0x978   : > { %v1433_v18 = vpop.f32.mrf.mxu2 }
 0x979   : > { %v1434_v26 = vadd.f32 %v1733_v15, %v1433_v18 }
 0x97b   : > { %1439 = vst.msk [vmem:[%s321_s13 + $0x18] sm:$0xff] %vm351_vm0, %v1434_v26 }
 0x97c   : > { %1945 = shalt.err (!%p1942_p10)
}
 0x97d   : > { %s2015_s26 = smov 128  }
 0x97e   : > { %1650 = dma.vmem_to_hbm [thread:$0]  (%p2136_p3), %s1454_s7, 512, %s1456_s20, %s1441_s19, %s2015_s26, %s2015_s26, %s2012_s27  }
 0x97f PF: > { %s1470_s13 = sand.u32 1, %s1980_s21   ;;  %p2473_p12 = scmp.ge.s32.totalorder %s1992_s24, 2 }
 0x980   : > { %s1471_s16 = scalar_lea.sflag [#allocation5], %s1470_s13 }
 0x981   : > { %p1667_p13 = pnand %p2473_p12, %p2086_p6 }
 0x983   : > { %p1668_p0 = pneg %p1667_p13 }
 0x985   : > { %1975 = dma.done.wait (%p1668_p0), %s1471_s16, 512  }
 0x986   : > { %1977 = vsyncadd (%p1668_p0), %s1471_s16, 4294966784  ;;  %p21_p5 = scmp.ge.s32.totalorder %s2123_s10, 4   ;;  %s2474_s21 = smov %s1984_s22 }
 0x987   : > { %s2475_s22 = smov %s1988_s23  ;;  %s2476_s23 = smov %s2132_s14 }
 0x988   : > { %s2477_s24 = smov %s2123_s10  ;;  %23 = sbr.rel (!%p21_p5) target bundleno = 7 (0x7), region = 104 }
 0x98d   :  { %1477 = vsyncpa [#allocation4], 1 }
 0x98e   :  { %1479 = vsyncpa [#allocation4 + $0x1], 1 }
 0x98f   :  { %1480 = vsyncpa [#allocation7], 1 }
 0x990   :  { %1481 = vsyncpa [#allocation10], 1 }
 0x991   :  { %1482 = vsyncpa [#allocation5], 1 }
 0x992   :  { %1484 = vsyncpa [#allocation5 + $0x1], 1 }

// kernel: tpu_custom_call.1
= control target key start
LH: loop header
LB: loop body
LE: loop exit
PB: predicated region body
PF: predicated region fallthrough
CT: control target
= control target key end

     0   :  { %11 = vsyncpa [#allocation4], 0  ;;  %s2456_s0 = inlined_call_operand.hbm [shape: f32[8,8,32], index: 0, kind: input, shape index: {}]   ;;  %s2457_s1 = inlined_call_operand.hbm [shape: bf16[32,96], index: 1, kind: input, shape index: {}]   ;;  %s2458_s2 = inlined_call_operand.vmem [shape: f32[1,96], index: 2, kind: input, shape index: {}]   ;;  %s2459_s3 = inlined_call_operand.hbm [shape: f32[4,4,8,8], index: 3, kind: input, shape index: {}]   ;;  %s2460_s4 = inlined_call_operand.hbm [shape: bf16[32,32], index: 4, kind: input, shape index: {}]   ;;  %s2461_s5 = inlined_call_operand.vmem [shape: f32[1,32], index: 5, kind: input, shape index: {}]   ;;  %s2462_s6 = inlined_call_operand.hbm [shape: f32[8,8,32], index: 6, kind: output, shape index: {}]  }
   0x1   :  { %13 = vsyncpa [#allocation4 + $0x1], 0 }
   0x2   :  { %14 = vsyncpa [#allocation7], 0 }
   0x3   :  { %15 = vsyncpa [#allocation10], 0 }
   0x4   :  { %16 = vsyncpa [#allocation5], 0 }
   0x5   :  { %18 = vsyncpa [#allocation5 + $0x1], 0  ;;  %s2051_s21 = smov 0   ;;  %s2053_s22 = smov 0  }
   0x6   :  { %s2055_s23 = smov 0   ;;  %s2057_s24 = smov 0  }
   0x7 LB: > { %s2072_s25 = sadd.s32 4294967295, %s1992_s24   ;;  %s1558_s26 = sadd.s32 4294967294, %s1992_s24   ;;  %s1992_s24 = sphi %s2057_s24, %s2477_s24   ;;  %s1988_s23 = sphi %s2055_s23, %s2476_s23   ;;  %s1984_s22 = sphi %s2053_s22, %s2475_s22   ;;  %s1980_s21 = sphi %s2051_s21, %s2474_s21  }
   0x8   : > { %p44_p0 = scmp.ne.s32.totalorder %s1984_s22, %s1980_s21  ;;  %p45_p1 = scmp.eq.s32.totalorder %s2072_s25, 0 }
   0x9   : > { %p173_p2 = scmp.eq.s32.totalorder %s2072_s25, 1  ;;  %p179_p3 = scmp.eq.s32.totalorder %s1558_s26, 1 }
   0xa   : > { %p2081_p4 = por %p45_p1, %p44_p0  ;;  %p1559_p5 = scmp.ge.s32.totalorder %s1992_s24, 1 }
   0xb   : > { %p2086_p6 = por %p179_p3, %p44_p0  ;;  %p186_p7 = scmp.lt.s32.totalorder %s1992_s24, 3 }
   0xc   : > { %s197_s7 = sshll.u32 %s2457_s1, 4  ;;  %s1994_s9 = smov [#allocation6]   ;;  %s198_s7 = int_to_ptr.hbm [resolvable:$true] %s197_s7 }
   0xd   : > { %p2094_p8 = pnand %p1559_p5, %p186_p7  ;;  %s199_s10 = sshll.u32 %s1994_s9, 4  ;;  %s200_s10 = int_to_ptr.vmem [resolvable:$true] %s199_s10 }
   0xe   : > { %s214_s14 = sshll.u32 %s2459_s3, 4  ;;  %s1995_s15 = smov 64   ;;  %s215_s14 = int_to_ptr.hbm [resolvable:$true] %s214_s14 }
   0xf   : > { %p1652_p9 = pneg %p2094_p8  ;;  %s1996_s16 = smov 4  }
  0x10   : > { %s1997_s17 = smov [#allocation8]   ;;  %s2463_s19 = smov 128  }
  0x11   : > { %p2102_p10 = pnand %p1652_p9, %p45_p1  ;;  %s216_s18 = sshll.u32 %s1997_s17, 4  ;;  %s217_s18 = int_to_ptr.vmem [resolvable:$true] %s216_s18 }
  0x12   : > { %s2464_s20 = smov 8   ;;  %s228_s30 = sshll.u32 %s2460_s4, 4  ;;  %s229_s30 = int_to_ptr.hbm [resolvable:$true] %s228_s30 }
  0x13   : > { %1655 = dma.hbm_to_vmem [thread:$0]  (!%p2102_p10), %s198_s7, 256, %s200_s10, [#allocation7], %s1995_s15, %s1995_s15, %s1996_s16  }
  0x14   : > { %1658 = dma.hbm_to_vmem [thread:$0]  (!%p2102_p10), %s215_s14, 2048, %s217_s18, [#allocation7], %s2463_s19, %s2463_s19, %s2464_s20  }
  0x15   : > { %s2000_s7 = smov [#allocation9]   ;;  %s2123_s10 = sadd.s32 1, %s1992_s24  }
  0x16   : > { %s230_s9 = sshll.u32 %s2000_s7, 4  ;;  %s28_s12 = ssub.s32 %s1992_s24, %s2123_s10  ;;  %s231_s9 = int_to_ptr.vmem [resolvable:$true] %s230_s9 }
  0x17   : > { %1661 = dma.hbm_to_vmem [thread:$0]  (!%p2102_p10), %s229_s30, 256, %s231_s9, [#allocation10], %s1995_s15, %s1995_s15, %s1996_s16  }
  0x18   : > { %s31_s13 = sadd.s32 1, %s1988_s23  ;;  %p29_p12 = scmp.eq.s32.totalorder %s28_s12, 0 }
  0x19   : > { %p38_p13 = scmp.ne.s32.totalorder %s1988_s23, %s1984_s22  ;;  %p39_p0 = scmp.eq.s32.totalorder %s1992_s24, 0 }
  0x1a   : > { %s2132_s14 = scalar_select %p29_p12, %s1988_s23, %s31_s13  }
  0x1b   : > { %p2136_p3 = por %p173_p2, %p38_p13  ;;  %p1673_p5 = scmp.lt.s32.totalorder %s1992_s24, 2 }
  0x1c   : > { %s247_s18 = sand.u32 1, %s1988_s23   ;;  %s1630_s26 = sshll.u32 %s1992_s24, 5 }
  0x1d   : > { %p40_p7 = por %p39_p0, %p38_p13  ;;  %s1564_s11 = sshll.u32 %s247_s18, 5 }
  0x1e   : > { %s256_s29 = scalar_lea.hbm %s2456_s0, %s1630_s26  ;;  %s251_s7 = scalar_lea.vmem [#allocation3], %s1564_s11 }
  0x1f   : > { %s257_s30 = sshll.u32 %s256_s29, 4  ;;  %s259_s9 = sshll.u32 %s251_s7, 4  ;;  %s258_s30 = int_to_ptr.hbm [resolvable:$true] %s257_s30  ;;  %s260_s9 = int_to_ptr.vmem [resolvable:$true] %s259_s9 }
  0x20   : > { %p2146_p9 = pnand %p1673_p5, %p40_p7  ;;  %s248_s13 = scalar_lea.sflag [#allocation4], %s247_s18 }
  0x21   : > { %s1888_s19 = sshra.s32 %s258_s30, 4  ;;  %s1895_s11 = scalar_lea.hbm %s2456_s0, 64  ;;  %s1889_s19 = int_to_ptr.hbm [resolvable:$true] %s1888_s19 }
  0x22   : > { %s1890_s20 = scalar_lea.hbm %s1889_s19, 32  ;;  %p1892_p10 = pneg %p2146_p9 }
  0x23   : > { %p1891_p2 = scmp.ne.s32.totalorder %s1889_s19, %s1890_s20  ;;  %p1896_p0 = scmp.lt.s32.totalorder %s1889_s19, %s2456_s0 }
  0x24   : > { %p1897_p5 = scmp.lt.s32.totalorder %s1895_s11, %s1890_s20 }
  0x25   : > { %p1893_p12 = pnand %p1892_p10, %p1891_p2 }
  0x26   : > { %p1898_p7 = por %p1897_p5, %p1896_p0 }
  0x27   : > { %p1894_p13 = pneg %p1893_p12 }
  0x29   : > { %p1899_p11 = pnand %p1898_p7, %p1894_p13 }
  0x2b   : > { %1902 = shalt.err (!%p1899_p11)
}
  0x2c   : > { %s2471_s18 = smov 8   ;;  %s2472_s7 = smov 128  }
  0x2d   : > { %1665 = dma.hbm_to_vmem [thread:$0]  (!%p2146_p9), %s258_s30, 512, %s260_s9, %s248_s13, %s2472_s7, %s2472_s7, %s2471_s18  }
  0x2e   : > { %271 = sbr.rel (%p2094_p8) target bundleno = 2431 (0x97f), region = 44  ;;  %s2166_s26 = sand.u32 (!%p2094_p8), 1, %s1984_s22  }
  0x2f   : > { %s1568_s19 = sshll.u32 (!%p2094_p8), %s2166_s26, 5  ;;  %s274_s20 = scalar_lea.sflag (!%p2094_p8), [#allocation4], %s2166_s26 }
  0x30   : > { %s277_s15 = scalar_lea.vmem (!%p2094_p8), [#allocation3], %s1568_s19 }
  0x33   : > { %1963 = dma.done.wait (%p2081_p4), %s274_s20, 512  }
  0x34   : > { %1965 = vsyncadd (%p2081_p4), %s274_s20, 4294966784 }
  0x35   : > { %1967 = dma.done.wait (%p45_p1), [#allocation7], 2304  }
  0x36   : > { %1969 = vsyncadd (%p45_p1), [#allocation7], 4294964992 }
  0x37   : > { %1971 = dma.done.wait (%p45_p1), [#allocation10], 256  }
  0x38   : > { %1973 = vsyncadd (%p45_p1), [#allocation10], 4294967040  ;;  %v1632_v0 = vld [vmem:[#allocation6 + $0x8] sm:$0xff]  ;;  %v1631_v1 = vld [vmem:[#allocation6] sm:$0xff]  ;;  %vm351_vm0 = vcmask 261120   ;;  %s2001_s30 = smov 64  }
  0x39   : > { %v325_v2 = vld [vmem:[%s277_s15] sm:$0xff]  ;;  %364 = vmatpush.bf16.msra.mxu0 %v1632_v0  ;;  %v326_v3 = vld [vmem:[%s277_s15 + $0x8] sm:$0xff]  ;;  %v327_v5 = vld [vmem:[%s277_s15 + $0x10] sm:$0xff]  ;;  %s2002_s9 = smov 96   ;;  %vm539_vm1 = vcmask 1043456   ;;  %vm386_vm2 = vcmask 64512  }
  0x3a   : > { %v329_v4 = vpack.c.bf16 %v326_v3, %v325_v2  ;;  %v328_v6 = vld [vmem:[%s277_s15 + $0x18] sm:$0xff]  ;;  %v1732_v8 = vld [vmem:[%s2458_s2] ss:$0 sm:$0xff]  ;;  %v478_v42 = vld [vmem:[#allocation8] sm:$0xff]  ;;  %s2003_s12 = smov 120   ;;  %s2004_s13 = smov 88  }
  0x3b   : > { %v330_v7 = vpack.c.bf16 %v328_v6, %v327_v5  ;;  %v479_v46 = vld [vmem:[#allocation8 + $0x20] sm:$0xff]  ;;  %s2005_s11 = smov 80   ;;  %s2006_s16 = smov 56   ;;  %vm872_vm3 = vcmask 130112   ;;  %vm1126_vm4 = vcmask 195712   ;;  %vm1380_vm5 = vcmask 261312  }
  0x3c   : > { %v480_v51 = vld [vmem:[#allocation8 + $0x40] sm:$0xff]  ;;  %s2007_s29 = smov 112   ;;  %s2008_s18 = smov 48  }
  0x3d   : > { %365 = vmatpush.bf16.msra.mxu0 %v1631_v1  ;;  %v481_v53 = vld [vmem:[#allocation8 + $0x60] sm:$0xff]  ;;  %s2009_s7 = smov 72   ;;  %s2010_s20 = smov 104  }
  0x3e   : > { %s2011_s15 = smov 40   ;;  %s2012_s27 = smov 8  }
  0x3f   : > { %s2013_s8 = smov 16  }
  0x40   : > { %1581 = vmatmul.msk.bf16.vlgmr.msra.gmra.mxu0 %vm351_vm0, %v329_v4 }
  0x50   : > { %1582 = vmatmul.msk.bf16.gmra.mxu0 %vm351_vm0, %v330_v7 }
  0xbd   : > { %v367_v9 = vpop.f32.mrf.mxu0 }
  0xbe   : > { %v368_v10 = vadd.f32 %v1732_v8, %v367_v9 }
  0xc0   : > { %v377_v11 = vpack.c.bf16 %v368_v10, %v368_v10 }
  0xc2   : > { %v382_v12 = vunpack.c.l.b16 %v377_v11 }
  0xc4   : > { %v2189_v13 = vpack.c.b16 %v382_v12, %v382_v12 }
  0xc5   : > { %v369_v14 = vpop.f32.mrf.mxu0 }
  0xc6   : > { %v370_v15 = vadd.f32 %v1732_v8, %v369_v14  ;;  %534 = vrot.lane.b32.xlu2 %v2189_v13, %s2001_s30 }
  0xc8   : > { %v378_v16 = vpack.c.bf16 %v370_v15, %v370_v15 }
  0xca   : > { %v407_v17 = vunpack.c.l.b16 %v378_v16 }
  0xcc   : > { %v2193_v18 = vpack.c.b16 %v407_v17, %v407_v17 }
  0xcd   : > { %v372_v19 = vpop.f32.mrf.mxu0 }
  0xce   : > { %v373_v20 = vadd.f32 %v1732_v8, %v372_v19  ;;  %409 = vrot.lane.b32.xlu0 %v2193_v18, %s2002_s9  ;;  %556 = vrot.lane.b32.xlu2 %v2193_v18, %s2001_s30 }
  0xd0   : > { %v379_v21 = vpack.c.bf16 %v373_v20, %v373_v20 }
  0xd2   : > { %v431_v22 = vunpack.c.l.b16 %v379_v21 }
  0xd4   : > { %v2198_v23 = vpack.c.b16 %v431_v22, %v431_v22 }
  0xd5   : > { %v374_v24 = vpop.f32.mrf.mxu0 }
  0xd6   : > { %433 = vrot.lane.b32.xlu1 %v2198_v23, %s2002_s9  ;;  %384 = vrot.lane.b32.xlu0 %v2189_v13, %s2002_s9  ;;  %v375_v25 = vadd.f32 %v1732_v8, %v374_v24 }
  0xd8   : > { %v380_v26 = vpack.c.bf16 %v375_v25, %v375_v25 }
  0xda   : > { %v455_v27 = vunpack.c.l.b16 %v380_v26 }
  0xdc   : > { %v2202_v28 = vpack.c.b16 %v455_v27, %v455_v27 }
  0xde   : > { %457 = vrot.lane.b32.xlu1 %v2202_v28, %s2002_s9  ;;  %s1938_s9 = scalar_lea.hbm %s2462_s6, 64 }
 0x120   : > { %v535_v29 = vpop.permute.xlu2 %534 }
 0x121   : > { %v541_v30 = vsel %vm539_vm1, %v535_v29, 0 }
 0x122   : > { %550 = vmatpush.bf16.msra.mxu2 %v541_v30 }
 0x128   : > { %v557_v33 = vpop.permute.xlu2 %556 }
 0x129   : > { %v562_v38 = vsel %vm539_vm1, %v557_v33, 0 }
 0x140   : > { %v410_v31 = vpop.permute.xlu0 %409 }
 0x141   : > { %v415_v32 = vsel %vm386_vm2, %v410_v31, 0 }
 0x142   : > { %424 = vmatpush.bf16.xpose.msra.mxu3 %v415_v32 }
 0x148   : > { %v434_v34 = vpop.permute.xlu1 %433  ;;  %v385_v35 = vpop.permute.xlu0 %384 }
 0x149   : > { %1584 = vmatmul.msk.bf16.vlgmr.msra.gmra.mxu3 %vm386_vm2, %v378_v16  ;;  %v391_v36 = vsel %vm386_vm2, %v385_v35, 0  ;;  %v439_v37 = vsel %vm386_vm2, %v434_v34, 0 }
 0x14a   : > { %400 = vmatpush.bf16.xpose.msra.mxu1 %v391_v36  ;;  %448 = vmatpush.bf16.xpose.msrb.mxu3 %v439_v37 }
 0x150   : > { %v458_v39 = vpop.permute.xlu1 %457 }
 0x151   : > { %1583 = vmatmul.msk.bf16.vlgmr.msra.gmra.mxu1 %vm386_vm2, %v377_v11  ;;  %v463_v40 = vsel %vm386_vm2, %v458_v39, 0 }
 0x152   : > { %571 = vmatpush.bf16.msra.mxu3 %v562_v38  ;;  %472 = vmatpush.bf16.xpose.msrb.mxu1 %v463_v40 }
 0x159   : > { %1585 = vmatmul.msk.bf16.vlgmr.msrb.gmra.mxu3 %vm386_vm2, %v379_v21 }
 0x161   : > { %1586 = vmatmul.msk.bf16.vlgmr.msrb.gmra.mxu1 %vm386_vm2, %v380_v26 }
 0x1cc   : > { %v426_v41 = vpop.f32.mrf.mxu3 }
 0x1cd   : > { %v483_v48 = vadd.f32 %v479_v46, %v426_v41 }
 0x1ce   : > { %v402_v43 = vpop.f32.mrf.mxu1 }
 0x1cf   : > { %v482_v44 = vadd.f32 %v478_v42, %v402_v43  ;;  %v489_v50 = vsel %vm386_vm2, %v483_v48, -inf }
 0x1d1   : > { %v486_v45 = vsel %vm386_vm2, %v482_v44, -inf }
 0x1d2   : > { %487 = vmax.xlane.f32.xlu2 %v486_v45 }
 0x1d4   : > { %v428_v47 = vpop.f32.mrf.mxu3 }
 0x1d6   : > { %v404_v49 = vpop.f32.mrf.mxu1 }
 0x1da   : > { %490 = vmax.xlane.f32.xlu2 %v489_v50 }
 0x1dc   : > { %v450_v52 = vpop.f32.mrf.mxu3 }
 0x1dd   : > { %v484_v54 = vadd.f32 %v480_v51, %v450_v52 }
 0x1de   : > { %v474_v55 = vpop.f32.mrf.mxu1 }
 0x1df   : > { %v485_v56 = vadd.f32 %v481_v53, %v474_v55  ;;  %v492_v57 = vsel %vm386_vm2, %v484_v54, -inf }
 0x1e0   : > { %493 = vmax.xlane.f32.xlu0 %v492_v57  ;;  %v716_v57 = vld [vmem:[#allocation8 + $0x8] sm:$0xff] }
 0x1e1   : > { %v495_v58 = vsel %vm386_vm2, %v485_v56, -inf }
 0x1e2   : > { %496 = vmax.xlane.f32.xlu1 %v495_v58 }
 0x1e4   : > { %v452_v59 = vpop.f32.mrf.mxu3 }
 0x1e6   : > { %v476_v60 = vpop.f32.mrf.mxu1 }
 0x1f2   : > { %623 = vrot.lane.b32.xlu2 %v2189_v13, %s2003_s12 }
 0x1f4   : > { %625 = vrot.lane.b32.xlu0 %v2189_v13, %s2004_s13 }
 0x1fb   : > { %648 = vrot.lane.b32.xlu1 %v2193_v18, %s2004_s13 }
 0x203   : > { %577 = vrot.lane.b32.xlu1 %v2198_v23, %s2001_s30 }
 0x20b   : > { %598 = vrot.lane.b32.xlu1 %v2202_v28, %s2001_s30  ;;  %s2014_s30 = smov 24  }
 0x213   : > { %671 = vrot.lane.b32.xlu1 %v2198_v23, %s2004_s13 }
 0x21b   : > { %694 = vrot.lane.b32.xlu1 %v2202_v28, %s2004_s13  ;;  %s321_s13 = scalar_lea.vmem [#allocation11], %s1568_s19  ;;  %s1441_s19 = scalar_lea.sflag [#allocation5], %s2166_s26 }
 0x223   : > { %669 = vrot.lane.b32.xlu1 %v2198_v23, %s2003_s12 }
 0x245   : > { %v488_v61 = vpop.xlane.xlu2 %487 }
 0x246   : > { %v498_v62 = vsub.f32 %v482_v44, %v488_v61 }
 0x248   : > { %v502_v63 = vmul.f32 1.442695, %v498_v62 }
 0x24a   : > { %1734 = vpow2.f32 %v502_v63  ;;  %v717_v63 = vld [vmem:[#allocation8 + $0x28] sm:$0xff] }
 0x24d   : > { %v491_v0 = vpop.xlane.xlu2 %490 }
 0x24e   : > { %v499_v1 = vsub.f32 %v483_v48, %v491_v0 }
 0x250   : > { %v1735_v2 = vpop.eup %1734  ;;  %v504_v3 = vmul.f32 1.442695, %v499_v1 }
 0x251   : > { %v510_v4 = vsel %vm386_vm2, %v1735_v2, 0.0 }
 0x252   : > { %1736 = vpow2.f32 %v504_v3  ;;  %511 = vadd.xlane.f32.xlu2 %v510_v4 }
 0x253   : > { %v494_v5 = vpop.xlane.xlu0 %493 }
 0x254   : > { %v500_v6 = vsub.f32 %v484_v54, %v494_v5 }
 0x255   : > { %v497_v12 = vpop.xlane.xlu1 %496  ;;  %v624_v33 = vpop.permute.xlu2 %623 }
 0x256   : > { %v506_v7 = vmul.f32 1.442695, %v500_v6  ;;  %v501_v26 = vsub.f32 %v485_v56, %v497_v12 }
 0x258   : > { %v1737_v8 = vpop.eup %1736  ;;  %1738 = vpow2.f32 %v506_v7  ;;  %v508_v27 = vmul.f32 1.442695, %v501_v26 }
 0x259   : > { %v513_v9 = vsel %vm386_vm2, %v1737_v8, 0.0 }
 0x25a   : > { %514 = vadd.xlane.f32.xlu2 %v513_v9  ;;  %1740 = vpow2.f32 %v508_v27 }
 0x25e   : > { %v1739_v10 = vpop.eup %1738 }
 0x25f   : > { %v516_v11 = vsel %vm386_vm2, %v1739_v10, 0.0 }
 0x260   : > { %517 = vadd.xlane.f32.xlu0 %v516_v11  ;;  %v1741_v31 = vpop.eup %1740 }
 0x261   : > { %v519_v32 = vsel %vm386_vm2, %v1741_v31, 0.0 }
 0x266   : > { %v626_v14 = vpop.permute.xlu0 %625 }
 0x267   : > { %v631_v15 = vsel %vm386_vm2, %v626_v14, 0 }
 0x268   : > { %640 = vmatpush.bf16.xpose.msrb.mxu2 %v631_v15  ;;  %v718_v15 = vld [vmem:[#allocation8 + $0x48] sm:$0xff] }
 0x26d   : > { %v649_v16 = vpop.permute.xlu1 %648 }
 0x26e   : > { %v654_v17 = vsel %vm386_vm2, %v649_v16, 0 }
 0x26f   : > { %663 = vmatpush.bf16.xpose.msrb.mxu3 %v654_v17 }
 0x272   : > { %646 = vrot.lane.b32.xlu2 %v2193_v18, %s2003_s12 }
 0x274   : > { %692 = vrot.lane.b32.xlu0 %v2202_v28, %s2003_s12 }
 0x275   : > { %v578_v19 = vpop.permute.xlu1 %577 }
 0x276   : > { %v583_v20 = vsel %vm539_vm1, %v578_v19, 0 }
 0x277   : > { %592 = vmatpush.bf16.msrb.mxu0 %v583_v20 }
 0x27c   : > { %902 = vrot.lane.b32.xlu0 %v2193_v18, %s2005_s11 }
 0x27d   : > { %v599_v21 = vpop.permute.xlu1 %598 }
 0x27e   : > { %v604_v22 = vsel %vm539_vm1, %v599_v21, 0 }
 0x27f   : > { %613 = vmatpush.bf16.msra.mxu1 %v604_v22 }
 0x285   : > { %v672_v24 = vpop.permute.xlu1 %671 }
 0x286   : > { %v677_v25 = vsel %vm386_vm2, %v672_v24, 0 }
 0x287   : > { %686 = vmatpush.bf16.xpose.msra.mxu0 %v677_v25 }
 0x28d   : > { %v695_v29 = vpop.permute.xlu1 %694 }
 0x28e   : > { %v700_v30 = vsel %vm386_vm2, %v695_v29, 0 }
 0x28f   : > { %709 = vmatpush.bf16.xpose.msrb.mxu1 %v700_v30 }
 0x295   : > { %v670_v47 = vpop.permute.xlu1 %669 }
 0x29b   : > { %520 = vadd.xlane.f32.xlu2 %v519_v32 }
 0x2c5   : > { %v512_v34 = vpop.xlane.xlu2 %511 }
 0x2c6   : > { %1742 = vrcp.f32 %v512_v34 }
 0x2cc   : > { %v1743_v35 = vpop.eup %1742 }
 0x2cd   : > { %v515_v36 = vpop.xlane.xlu2 %514  ;;  %v526_v37 = vmul.f32 %v1743_v35, %v1735_v2 }
 0x2ce   : > { %1744 = vrcp.f32 %v515_v36 }
 0x2cf   : > { %v530_v38 = vpack.c.bf16 %v526_v37, %v526_v37 }
 0x2d1   : > { %1587 = vmatmul.msk.bf16.vlgmr.msra.gmra.mxu2 %vm386_vm2, %v530_v38 }
 0x2d3   : > { %v518_v39 = vpop.xlane.xlu0 %517 }
 0x2d4   : > { %v1745_v40 = vpop.eup %1744  ;;  %1746 = vrcp.f32 %v518_v39 }
 0x2d5   : > { %v527_v41 = vmul.f32 %v1745_v40, %v1737_v8  ;;  %v647_v46 = vpop.permute.xlu2 %646 }
 0x2d7   : > { %v531_v42 = vpack.c.bf16 %v527_v41, %v527_v41 }
 0x2d9   : > { %1588 = vmatmul.msk.bf16.vlgmr.msra.gmra.mxu3 %vm386_vm2, %v531_v42 }
 0x2da   : > { %v1747_v43 = vpop.eup %1746 }
 0x2db   : > { %v528_v44 = vmul.f32 %v1747_v43, %v1739_v10  ;;  %v719_v10 = vld [vmem:[#allocation8 + $0x68] sm:$0xff] }
 0x2dd   : > { %v532_v45 = vpack.c.bf16 %v528_v44, %v528_v44 }
 0x2df   : > { %1589 = vmatmul.msk.bf16.vlgmr.msrb.gmra.mxu0 %vm386_vm2, %v532_v45 }
 0x2e1   : > { %1591 = vmatmul.msk.bf16.vlgmr.msrb.gmra.mxu2 %vm386_vm2, %v624_v33 }
 0x2e6   : > { %v693_v52 = vpop.permute.xlu0 %692 }
 0x2e9   : > { %1592 = vmatmul.msk.bf16.vlgmr.msrb.gmra.mxu3 %vm386_vm2, %v647_v46 }
 0x2ee   : > { %v903_v35 = vpop.permute.xlu0 %902 }
 0x2ef   : > { %1593 = vmatmul.msk.bf16.vlgmr.msra.gmra.mxu0 %vm386_vm2, %v670_v47  ;;  %v908_v38 = vsel %vm386_vm2, %v903_v35, 0 }
 0x30e   : > { %v521_v48 = vpop.xlane.xlu2 %520 }
 0x30f   : > { %1748 = vrcp.f32 %v521_v48 }
 0x315   : > { %v1749_v49 = vpop.eup %1748 }
 0x316   : > { %v529_v50 = vmul.f32 %v1749_v49, %v1741_v31 }
 0x318   : > { %v533_v51 = vpack.c.bf16 %v529_v50, %v529_v50 }
 0x31a   : > { %1590 = vmatmul.msk.bf16.vlgmr.msra.gmra.mxu1 %vm386_vm2, %v533_v51 }
 0x32a   : > { %1594 = vmatmul.msk.bf16.vlgmr.msrb.gmra.mxu1 %vm386_vm2, %v693_v52 }
 0x354   : > { %v552_v53 = vpop.f32.mrf.mxu2 }
 0x355   : > { %619 = vst.msk [vmem:[#allocation2] sm:$0xff] %vm386_vm2, %v552_v53 }
 0x35c   : > { %v554_v54 = vpop.f32.mrf.mxu2  ;;  %v573_v55 = vpop.f32.mrf.mxu3 }
 0x35d   : > { %620 = vst.msk [vmem:[#allocation2 + $0x8] sm:$0xff] %vm386_vm2, %v573_v55  ;;  %v594_v56 = vpop.f32.mrf.mxu0 }
 0x35e   : > { %621 = vst.msk [vmem:[#allocation2 + $0x10] sm:$0xff] %vm386_vm2, %v594_v56 }
 0x364   : > { %v575_v58 = vpop.f32.mrf.mxu3  ;;  %v642_v59 = vpop.f32.mrf.mxu2 }
 0x365   : > { %v596_v60 = vpop.f32.mrf.mxu0  ;;  %v720_v61 = vadd.f32 %v716_v57, %v642_v59 }
 0x367   : > { %v724_v62 = vsel %vm386_vm2, %v720_v61, -inf }
 0x368   : > { %725 = vmax.xlane.f32.xlu2 %v724_v62 }
 0x36c   : > { %v644_v0 = vpop.f32.mrf.mxu2  ;;  %v665_v1 = vpop.f32.mrf.mxu3 }
 0x36d   : > { %v721_v2 = vadd.f32 %v717_v63, %v665_v1  ;;  %v688_v3 = vpop.f32.mrf.mxu0 }
 0x36e   : > { %v722_v16 = vadd.f32 %v718_v15, %v688_v3 }
 0x36f   : > { %v727_v4 = vsel %vm386_vm2, %v721_v2, -inf }
 0x370   : > { %728 = vmax.xlane.f32.xlu1 %v727_v4  ;;  %v730_v17 = vsel %vm386_vm2, %v722_v16, -inf }
 0x374   : > { %v667_v5 = vpop.f32.mrf.mxu3 }
 0x375   : > { %v690_v6 = vpop.f32.mrf.mxu0 }
 0x380   : > { %772 = vrot.lane.b32.xlu2 %v2189_v13, %s2006_s16 }
 0x388   : > { %879 = vrot.lane.b32.xlu2 %v2189_v13, %s2005_s11 }
 0x389   : > { %793 = vrot.lane.b32.xlu1 %v2193_v18, %s2006_s16 }
 0x391   : > { %900 = vrot.lane.b32.xlu1 %v2193_v18, %s2007_s29 }
 0x397   : > { %v615_v7 = vpop.f32.mrf.mxu1 }
 0x398   : > { %622 = vst.msk [vmem:[#allocation2 + $0x18] sm:$0xff] %vm386_vm2, %v615_v7 }
 0x39f   : > { %v617_v8 = vpop.f32.mrf.mxu1 }
 0x3a7   : > { %v711_v9 = vpop.f32.mrf.mxu1 }
 0x3a8   : > { %v723_v11 = vadd.f32 %v719_v10, %v711_v9 }
 0x3aa   : > { %v733_v14 = vsel %vm386_vm2, %v723_v11, -inf }
 0x3af   : > { %v713_v12 = vpop.f32.mrf.mxu1 }
 0x3b1   : > { %734 = vmax.xlane.f32.xlu2 %v733_v14 }
 0x3b9   : > { %731 = vmax.xlane.f32.xlu2 %v730_v17 }
 0x3db   : > { %v726_v19 = vpop.xlane.xlu2 %725 }
 0x3dc   : > { %v736_v20 = vsub.f32 %v720_v61, %v726_v19 }
 0x3de   : > { %v740_v21 = vmul.f32 1.442695, %v736_v20  ;;  %v970_v20 = vld [vmem:[#allocation8 + $0x10] sm:$0xff] }
 0x3e0   : > { %1750 = vpow2.f32 %v740_v21 }
 0x3e3   : > { %v729_v22 = vpop.xlane.xlu1 %728  ;;  %v773_v24 = vpop.permute.xlu2 %772 }
 0x3e4   : > { %v737_v25 = vsub.f32 %v721_v2, %v729_v22  ;;  %v778_v26 = vsel %vm539_vm1, %v773_v24, 0 }
 0x3e5   : > { %787 = vmatpush.bf16.msra.mxu2 %v778_v26  ;;  %v971_v26 = vld [vmem:[#allocation8 + $0x30] sm:$0xff] }
 0x3e6   : > { %v1751_v27 = vpop.eup %1750  ;;  %v742_v29 = vmul.f32 1.442695, %v737_v25 }
 0x3e7   : > { %v748_v30 = vsel %vm386_vm2, %v1751_v27, 0.0 }
 0x3e8   : > { %1752 = vpow2.f32 %v742_v29  ;;  %749 = vadd.xlane.f32.xlu0 %v748_v30 }
 0x3eb   : > { %v880_v31 = vpop.permute.xlu2 %879 }
 0x3ec   : > { %v885_v32 = vsel %vm386_vm2, %v880_v31, 0 }
 0x3ed   : > { %894 = vmatpush.bf16.xpose.msrb.mxu2 %v885_v32 }
 0x3ee   : > { %v1753_v33 = vpop.eup %1752 }
 0x3ef   : > { %v751_v34 = vsel %vm386_vm2, %v1753_v33, 0.0 }
 0x3f0   : > { %752 = vadd.xlane.f32.xlu2 %v751_v34 }
 0x3fb   : > { %v794_v36 = vpop.permute.xlu1 %793 }
 0x3fc   : > { %v799_v37 = vsel %vm539_vm1, %v794_v36, 0  ;;  %814 = vrot.lane.b32.xlu0 %v2198_v23, %s2006_s16  ;;  %v973_v36 = vld [vmem:[#allocation8 + $0x70] sm:$0xff] }
 0x3fd   : > { %808 = vmatpush.bf16.msra.mxu3 %v799_v37 }
 0x401   : > { %917 = vmatpush.bf16.xpose.msrb.mxu3 %v908_v38 }
 0x403   : > { %v901_v62 = vpop.permute.xlu1 %900 }
 0x404   : > { %835 = vrot.lane.b32.xlu0 %v2202_v28, %s2006_s16 }
 0x408   : > { %877 = vrot.lane.b32.xlu2 %v2189_v13, %s2007_s29 }
 0x40c   : > { %925 = vrot.lane.b32.xlu0 %v2198_v23, %s2005_s11 }
 0x414   : > { %948 = vrot.lane.b32.xlu0 %v2202_v28, %s2005_s11  ;;  %s1635_s11 = sshll.u32 %s2072_s25, 5 }
 0x41c   : > { %923 = vrot.lane.b32.xlu0 %v2198_v23, %s2007_s29 }
 0x424   : > { %v735_v39 = vpop.xlane.xlu2 %734 }
 0x425   : > { %v739_v40 = vsub.f32 %v723_v11, %v735_v39 }
 0x427   : > { %v746_v41 = vmul.f32 1.442695, %v739_v40 }
 0x429   : > { %1754 = vpow2.f32 %v746_v41  ;;  %v972_v41 = vld [vmem:[#allocation8 + $0x50] sm:$0xff] }
 0x42c   : > { %v732_v42 = vpop.xlane.xlu2 %731 }
 0x42d   : > { %v738_v43 = vsub.f32 %v722_v16, %v732_v42 }
 0x42f   : > { %v1755_v44 = vpop.eup %1754  ;;  %v744_v45 = vmul.f32 1.442695, %v738_v43 }
 0x430   : > { %v757_v46 = vsel %vm386_vm2, %v1755_v44, 0.0 }
 0x431   : > { %1756 = vpow2.f32 %v744_v45  ;;  %758 = vadd.xlane.f32.xlu1 %v757_v46 }
 0x437   : > { %v1757_v47 = vpop.eup %1756 }
 0x438   : > { %v754_v48 = vsel %vm386_vm2, %v1757_v47, 0.0 }
 0x439   : > { %755 = vadd.xlane.f32.xlu2 %v754_v48 }
 0x44a   : > { %1026 = vrot.lane.b32.xlu1 %v2189_v13, %s2008_s18 }
 0x451   : > { %946 = vrot.lane.b32.xlu2 %v2202_v28, %s2007_s29 }
 0x459   : > { %1156 = vrot.lane.b32.xlu2 %v2193_v18, %s2009_s7 }
 0x45b   : > { %v750_v49 = vpop.xlane.xlu0 %749 }
 0x45c   : > { %1758 = vrcp.f32 %v750_v49 }
 0x462   : > { %v1759_v50 = vpop.eup %1758 }
 0x463   : > { %v764_v51 = vmul.f32 %v1759_v50, %v1751_v27  ;;  %v753_v52 = vpop.xlane.xlu2 %752 }
 0x464   : > { %1760 = vrcp.f32 %v753_v52 }
 0x465   : > { %v768_v53 = vpack.c.bf16 %v764_v51, %v764_v51 }
 0x467   : > { %1595 = vmatmul.msk.bf16.vlgmr.msra.gmra.mxu2 %vm386_vm2, %v768_v53 }
 0x46a   : > { %v1761_v54 = vpop.eup %1760 }
 0x46b   : > { %v765_v55 = vmul.f32 %v1761_v54, %v1753_v33  ;;  %v878_v59 = vpop.permute.xlu2 %877 }
 0x46d   : > { %v769_v56 = vpack.c.bf16 %v765_v55, %v765_v55 }
 0x46e   : > { %v815_v57 = vpop.permute.xlu0 %814 }
 0x46f   : > { %v820_v58 = vsel %vm539_vm1, %v815_v57, 0  ;;  %1596 = vmatmul.msk.bf16.vlgmr.msra.gmra.mxu3 %vm386_vm2, %v769_v56 }
 0x470   : > { %829 = vmatpush.bf16.msrb.mxu0 %v820_v58 }
 0x476   : > { %v836_v60 = vpop.permute.xlu0 %835 }
 0x477   : > { %v841_v61 = vsel %vm539_vm1, %v836_v60, 0  ;;  %1599 = vmatmul.msk.bf16.vlgmr.msrb.gmra.mxu2 %vm386_vm2, %v878_v59 }
 0x478   : > { %850 = vmatpush.bf16.msra.mxu1 %v841_v61 }
 0x47e   : > { %v926_v63 = vpop.permute.xlu0 %925 }
 0x47f   : > { %v931_v0 = vsel %vm386_vm2, %v926_v63, 0  ;;  %1600 = vmatmul.msk.bf16.vlgmr.msrb.gmra.mxu3 %vm386_vm2, %v901_v62 }
 0x480   : > { %940 = vmatpush.bf16.xpose.msra.mxu0 %v931_v0 }
 0x486   : > { %v949_v1 = vpop.permute.xlu0 %948 }
 0x487   : > { %v954_v2 = vsel %vm386_vm2, %v949_v1, 0 }
 0x488   : > { %963 = vmatpush.bf16.xpose.msrb.mxu1 %v954_v2 }
 0x48e   : > { %v924_v15 = vpop.permute.xlu0 %923 }
 0x4a4   : > { %v759_v3 = vpop.xlane.xlu1 %758 }
 0x4a5   : > { %1762 = vrcp.f32 %v759_v3 }
 0x4ab   : > { %v1763_v4 = vpop.eup %1762 }
 0x4ac   : > { %v767_v5 = vmul.f32 %v1763_v4, %v1755_v44  ;;  %v756_v6 = vpop.xlane.xlu2 %755 }
 0x4ad   : > { %1764 = vrcp.f32 %v756_v6 }
 0x4ae   : > { %v771_v7 = vpack.c.bf16 %v767_v5, %v767_v5 }
 0x4b0   : > { %1598 = vmatmul.msk.bf16.vlgmr.msra.gmra.mxu1 %vm386_vm2, %v771_v7 }
 0x4b3   : > { %v1765_v8 = vpop.eup %1764 }
 0x4b4   : > { %v766_v9 = vmul.f32 %v1765_v8, %v1757_v47  ;;  %v947_v14 = vpop.permute.xlu2 %946 }
 0x4b6   : > { %v770_v10 = vpack.c.bf16 %v766_v9, %v766_v9 }
 0x4b8   : > { %1597 = vmatmul.msk.bf16.vlgmr.msrb.gmra.mxu0 %vm386_vm2, %v770_v10 }
 0x4bc   : > { %v1027_v11 = vpop.permute.xlu1 %1026  ;;  %v1157_v56 = vpop.permute.xlu2 %1156 }
 0x4bd   : > { %v1032_v12 = vsel %vm539_vm1, %v1027_v11, 0  ;;  %v1162_v60 = vsel %vm386_vm2, %v1157_v56, 0 }
 0x4be   : > { %1041 = vmatpush.bf16.msra.mxu2 %v1032_v12 }
 0x4c0   : > { %1602 = vmatmul.msk.bf16.vlgmr.msrb.gmra.mxu1 %vm386_vm2, %v947_v14 }
 0x4c8   : > { %1601 = vmatmul.msk.bf16.vlgmr.msra.gmra.mxu0 %vm386_vm2, %v924_v15 }
 0x4ea   : > { %v2310_v16 = vpop.f32.mrf.mxu2 }
 0x4f2   : > { %v791_v17 = vpop.f32.mrf.mxu2  ;;  %v2312_v19 = vpop.f32.mrf.mxu3 }
 0x4fa   : > { %v812_v21 = vpop.f32.mrf.mxu3  ;;  %v896_v22 = vpop.f32.mrf.mxu2 }
 0x4fb   : > { %v974_v24 = vadd.f32 %v970_v20, %v896_v22 }
 0x4fd   : > { %v978_v25 = vsel %vm386_vm2, %v974_v24, -inf }
 0x4fe   : > { %979 = vmax.xlane.f32.xlu1 %v978_v25 }
 0x502   : > { %v898_v27 = vpop.f32.mrf.mxu2  ;;  %v919_v29 = vpop.f32.mrf.mxu3 }
 0x503   : > { %v975_v30 = vadd.f32 %v971_v26, %v919_v29 }
 0x505   : > { %v981_v31 = vsel %vm386_vm2, %v975_v30, -inf }
 0x506   : > { %982 = vmax.xlane.f32.xlu0 %v981_v31 }
 0x50a   : > { %v921_v32 = vpop.f32.mrf.mxu3 }
 0x51a   : > { %1047 = vrot.lane.b32.xlu0 %v2193_v18, %s2008_s18 }
 0x52d   : > { %v2318_v33 = vpop.f32.mrf.mxu1 }
 0x535   : > { %v2320_v34 = vpop.f32.mrf.mxu0  ;;  %v854_v35 = vpop.f32.mrf.mxu1 }
 0x53d   : > { %v833_v37 = vpop.f32.mrf.mxu0  ;;  %v965_v38 = vpop.f32.mrf.mxu1 }
 0x53e   : > { %v977_v39 = vadd.f32 %v973_v36, %v965_v38 }
 0x540   : > { %v987_v40 = vsel %vm386_vm2, %v977_v39, -inf }
 0x541   : > { %988 = vmax.xlane.f32.xlu1 %v987_v40 }
 0x545   : > { %v942_v42 = vpop.f32.mrf.mxu0  ;;  %v967_v43 = vpop.f32.mrf.mxu1 }
 0x546   : > { %v976_v44 = vadd.f32 %v972_v41, %v942_v42 }
 0x548   : > { %v984_v45 = vsel %vm386_vm2, %v976_v44, -inf }
 0x549   : > { %985 = vmax.xlane.f32.xlu1 %v984_v45 }
 0x54d   : > { %v944_v46 = vpop.f32.mrf.mxu0 }
 0x562   : > { %1133 = vrot.lane.b32.xlu1 %v2189_v13, %s2009_s7 }
 0x571   : > { %v980_v47 = vpop.xlane.xlu1 %979 }
 0x572   : > { %v990_v48 = vsub.f32 %v974_v24, %v980_v47 }
 0x574   : > { %v994_v49 = vmul.f32 1.442695, %v990_v48  ;;  %v1224_v48 = vld [vmem:[#allocation8 + $0x18] sm:$0xff] }
 0x576   : > { %1766 = vpow2.f32 %v994_v49 }
 0x579   : > { %v983_v50 = vpop.xlane.xlu0 %982 }
 0x57a   : > { %v991_v51 = vsub.f32 %v975_v30, %v983_v50 }
 0x57c   : > { %v1767_v52 = vpop.eup %1766  ;;  %v996_v54 = vmul.f32 1.442695, %v991_v51 }
 0x57d   : > { %v1002_v53 = vsel %vm386_vm2, %v1767_v52, 0.0 }
 0x57e   : > { %1003 = vadd.xlane.f32.xlu2 %v1002_v53  ;;  %1768 = vpow2.f32 %v996_v54  ;;  %v1225_v54 = vld [vmem:[#allocation8 + $0x38] sm:$0xff] }
 0x584   : > { %v1769_v55 = vpop.eup %1768 }
 0x585   : > { %v1005_v57 = vsel %vm386_vm2, %v1769_v55, 0.0 }
 0x58c   : > { %1006 = vadd.xlane.f32.xlu1 %v1005_v57  ;;  %v1048_v58 = vpop.permute.xlu0 %1047 }
 0x58d   : > { %v1053_v59 = vsel %vm539_vm1, %v1048_v58, 0 }
 0x58e   : > { %1062 = vmatpush.bf16.msra.mxu3 %v1053_v59 }
 0x592   : > { %1171 = vmatpush.bf16.xpose.msrb.mxu3 %v1162_v60 }
 0x596   : > { %1131 = vrot.lane.b32.xlu2 %v2189_v13, %s2010_s20 }
 0x59e   : > { %1154 = vrot.lane.b32.xlu2 %v2193_v18, %s2010_s20 }
 0x5a6   : > { %1068 = vrot.lane.b32.xlu2 %v2198_v23, %s2008_s18 }
 0x5ae   : > { %1202 = vrot.lane.b32.xlu2 %v2202_v28, %s2009_s7 }
 0x5b4   : > { %v989_v61 = vpop.xlane.xlu1 %988 }
 0x5b5   : > { %v993_v62 = vsub.f32 %v977_v39, %v989_v61 }
 0x5b6   : > { %1177 = vrot.lane.b32.xlu2 %v2198_v23, %s2010_s20 }
 0x5b7   : > { %v1000_v63 = vmul.f32 1.442695, %v993_v62  ;;  %v1226_v62 = vld [vmem:[#allocation8 + $0x58] sm:$0xff] }
 0x5b9   : > { %1770 = vpow2.f32 %v1000_v63 }
 0x5bc   : > { %v986_v0 = vpop.xlane.xlu1 %985 }
 0x5bd   : > { %v992_v1 = vsub.f32 %v976_v44, %v986_v0 }
 0x5be   : > { %1200 = vrot.lane.b32.xlu2 %v2202_v28, %s2010_s20 }
 0x5bf   : > { %v1771_v2 = vpop.eup %1770  ;;  %v998_v3 = vmul.f32 1.442695, %v992_v1 }
 0x5c0   : > { %v1011_v4 = vsel %vm386_vm2, %v1771_v2, 0.0 }
 0x5c1   : > { %1772 = vpow2.f32 %v998_v3  ;;  %1012 = vadd.xlane.f32.xlu1 %v1011_v4  ;;  %v1227_v4 = vld [vmem:[#allocation8 + $0x78] sm:$0xff] }
 0x5c7   : > { %v1773_v5 = vpop.eup %1772 }
 0x5c8   : > { %v1008_v6 = vsel %vm386_vm2, %v1773_v5, 0.0 }
 0x5c9   : > { %1009 = vadd.xlane.f32.xlu0 %v1008_v6 }
 0x5d4   : > { %v1134_v7 = vpop.permute.xlu1 %1133 }
 0x5d5   : > { %v1139_v8 = vsel %vm386_vm2, %v1134_v7, 0 }
 0x5d6   : > { %1148 = vmatpush.bf16.xpose.msrb.mxu2 %v1139_v8 }
 0x5da   : > { %1179 = vrot.lane.b32.xlu1 %v2198_v23, %s2009_s7  ;;  %s1453_s7 = sshll.u32 %s321_s13, 4  ;;  %s1454_s7 = int_to_ptr.vmem [resolvable:$true] %s1453_s7 }
 0x5dd   : > { %1089 = vrot.lane.b32.xlu0 %v2202_v28, %s2008_s18  ;;  %s1452_s18 = scalar_lea.hbm %s2462_s6, %s1635_s11 }
 0x5de   : > { %s1455_s20 = sshll.u32 %s1452_s18, 4  ;;  %s1456_s20 = int_to_ptr.hbm [resolvable:$true] %s1455_s20 }
 0x5f1   : > { %v1004_v9 = vpop.xlane.xlu2 %1003 }
 0x5f2   : > { %1774 = vrcp.f32 %v1004_v9 }
 0x5f8   : > { %v1775_v10 = vpop.eup %1774 }
 0x5f9   : > { %v1018_v11 = vmul.f32 %v1775_v10, %v1767_v52  ;;  %v1132_v12 = vpop.permute.xlu2 %1131 }
 0x5fb   : > { %v1022_v14 = vpack.c.bf16 %v1018_v11, %v1018_v11 }
 0x5fd   : > { %1603 = vmatmul.msk.bf16.vlgmr.msra.gmra.mxu2 %vm386_vm2, %v1022_v14 }
 0x5ff   : > { %v1007_v15 = vpop.xlane.xlu1 %1006 }
 0x600   : > { %1776 = vrcp.f32 %v1007_v15 }
 0x601   : > { %v1155_v17 = vpop.permute.xlu2 %1154 }
 0x606   : > { %v1777_v20 = vpop.eup %1776 }
 0x607   : > { %v1019_v21 = vmul.f32 %v1777_v20, %v1769_v55 }
 0x609   : > { %v1023_v22 = vpack.c.bf16 %v1019_v21, %v1019_v21  ;;  %v1069_v24 = vpop.permute.xlu2 %1068 }
 0x60a   : > { %v1074_v25 = vsel %vm539_vm1, %v1069_v24, 0 }
 0x60b   : > { %1604 = vmatmul.msk.bf16.vlgmr.msra.gmra.mxu3 %vm386_vm2, %v1023_v22  ;;  %1083 = vmatpush.bf16.msrb.mxu0 %v1074_v25 }
 0x60d   : > { %1607 = vmatmul.msk.bf16.vlgmr.msrb.gmra.mxu2 %vm386_vm2, %v1132_v12 }
 0x611   : > { %v1203_v36 = vpop.permute.xlu2 %1202 }
 0x612   : > { %v1208_v41 = vsel %vm386_vm2, %v1203_v36, 0 }
 0x619   : > { %v1178_v43 = vpop.permute.xlu2 %1177 }
 0x61b   : > { %1608 = vmatmul.msk.bf16.vlgmr.msrb.gmra.mxu3 %vm386_vm2, %v1155_v17 }
 0x621   : > { %v1201_v44 = vpop.permute.xlu2 %1200 }
 0x634   : > { %v1013_v27 = vpop.xlane.xlu1 %1012 }
 0x63c   : > { %v1010_v26 = vpop.xlane.xlu0 %1009 }
 0x63d   : > { %1778 = vrcp.f32 %v1010_v26 }
 0x63e   : > { %1780 = vrcp.f32 %v1013_v27 }
 0x643   : > { %v1779_v29 = vpop.eup %1778 }
 0x644   : > { %v1020_v30 = vmul.f32 %v1779_v29, %v1773_v5  ;;  %v1781_v32 = vpop.eup %1780 }
 0x645   : > { %v1021_v38 = vmul.f32 %v1781_v32, %v1771_v2 }
 0x646   : > { %v1024_v31 = vpack.c.bf16 %v1020_v30, %v1020_v30 }
 0x647   : > { %v1025_v42 = vpack.c.bf16 %v1021_v38, %v1021_v38 }
 0x648   : > { %1605 = vmatmul.msk.bf16.vlgmr.msrb.gmra.mxu0 %vm386_vm2, %v1024_v31 }
 0x64c   : > { %v1180_v35 = vpop.permute.xlu1 %1179 }
 0x64d   : > { %v1185_v37 = vsel %vm386_vm2, %v1180_v35, 0 }
 0x64e   : > { %1194 = vmatpush.bf16.xpose.msra.mxu0 %v1185_v37 }
 0x64f   : > { %v1090_v39 = vpop.permute.xlu0 %1089 }
 0x650   : > { %v1095_v40 = vsel %vm539_vm1, %v1090_v39, 0 }
 0x651   : > { %1104 = vmatpush.bf16.msra.mxu1 %v1095_v40 }
 0x654   : > { %1606 = vmatmul.msk.bf16.vlgmr.msra.gmra.mxu1 %vm386_vm2, %v1025_v42 }
 0x655   : > { %1217 = vmatpush.bf16.xpose.msrb.mxu1 %v1208_v41 }
 0x658   : > { %1609 = vmatmul.msk.bf16.vlgmr.msra.gmra.mxu0 %vm386_vm2, %v1178_v43 }
 0x664   : > { %1610 = vmatmul.msk.bf16.vlgmr.msrb.gmra.mxu1 %vm386_vm2, %v1201_v44 }
 0x680   : > { %v1043_v45 = vpop.f32.mrf.mxu2 }
 0x688   : > { %v1045_v46 = vpop.f32.mrf.mxu2 }
 0x68e   : > { %v1064_v47 = vpop.f32.mrf.mxu3 }
 0x690   : > { %v1150_v49 = vpop.f32.mrf.mxu2 }
 0x691   : > { %v1228_v50 = vadd.f32 %v1224_v48, %v1150_v49 }
 0x693   : > { %v1232_v51 = vsel %vm386_vm2, %v1228_v50, -inf }
 0x694   : > { %1233 = vmax.xlane.f32.xlu0 %v1232_v51 }
 0x696   : > { %v1066_v52 = vpop.f32.mrf.mxu3 }
 0x698   : > { %v1152_v53 = vpop.f32.mrf.mxu2 }
 0x69e   : > { %v1173_v55 = vpop.f32.mrf.mxu3 }
 0x69f   : > { %v1229_v56 = vadd.f32 %v1225_v54, %v1173_v55 }
 0x6a1   : > { %v1235_v57 = vsel %vm386_vm2, %v1229_v56, -inf }
 0x6a2   : > { %1236 = vmax.xlane.f32.xlu2 %v1235_v57 }
 0x6a6   : > { %v1175_v58 = vpop.f32.mrf.mxu3 }
 0x6c5   : > { %v2359_v59 = vpop.f32.mrf.mxu0 }
 0x6cd   : > { %v1087_v60 = vpop.f32.mrf.mxu0 }
 0x6d1   : > { %v2361_v61 = vpop.f32.mrf.mxu1 }
 0x6d5   : > { %v1196_v63 = vpop.f32.mrf.mxu0 }
 0x6d6   : > { %v1230_v0 = vadd.f32 %v1226_v62, %v1196_v63 }
 0x6d8   : > { %v1238_v1 = vsel %vm386_vm2, %v1230_v0, -inf }
 0x6d9   : > { %1239 = vmax.xlane.f32.xlu1 %v1238_v1  ;;  %v1108_v2 = vpop.f32.mrf.mxu1 }
 0x6dd   : > { %v1198_v3 = vpop.f32.mrf.mxu0 }
 0x6e1   : > { %v1219_v5 = vpop.f32.mrf.mxu1 }
 0x6e2   : > { %v1231_v6 = vadd.f32 %v1227_v4, %v1219_v5 }
 0x6e4   : > { %v1241_v7 = vsel %vm386_vm2, %v1231_v6, -inf }
 0x6e5   : > { %1242 = vmax.xlane.f32.xlu0 %v1241_v7  ;;  %v1633_v7 = vld [vmem:[#allocation9] sm:$0xff] }
 0x6e9   : > { %v1221_v8 = vpop.f32.mrf.mxu1 }
 0x6f9   : > { %1280 = vrot.lane.b32.xlu0 %v2189_v13, %s2011_s15 }
 0x701   : > { %1322 = vrot.lane.b32.xlu0 %v2198_v23, %s2011_s15 }
 0x707   : > { %v1234_v9 = vpop.xlane.xlu0 %1233 }
 0x708   : > { %v1244_v10 = vsub.f32 %v1228_v50, %v1234_v9 }
 0x709   : > { %860 = vrot.lane.b32.xlu0 %v2310_v16, %s2012_s27 }
 0x70a   : > { %v1248_v11 = vmul.f32 1.442695, %v1244_v10 }
 0x70c   : > { %1782 = vpow2.f32 %v1248_v11 }
 0x711   : > { %1114 = vrot.lane.b32.xlu0 %v1043_v45, %s2013_s8 }
 0x712   : > { %v1783_v12 = vpop.eup %1782 }
 0x713   : > { %v1256_v14 = vsel %vm386_vm2, %v1783_v12, 0.0 }
 0x714   : > { %1257 = vadd.xlane.f32.xlu2 %v1256_v14 }
 0x715   : > { %v1237_v21 = vpop.xlane.xlu2 %1236 }
 0x716   : > { %v1245_v24 = vsub.f32 %v1229_v56, %v1237_v21 }
 0x72c   : > { %1301 = vrot.lane.b32.xlu2 %v2193_v18, %s2011_s15  ;;  %v1250_v18 = vmul.f32 1.442695, %v1245_v24 }
 0x734   : > { %862 = vrot.lane.b32.xlu2 %v2312_v19, %s2012_s27 }
 0x73c   : > { %1116 = vrot.lane.b32.xlu2 %v1064_v47, %s2013_s8 }
 0x74c   : > { %v1240_v13 = vpop.xlane.xlu1 %1239 }
 0x74d   : > { %v1246_v15 = vsub.f32 %v1230_v0, %v1240_v13 }
 0x74f   : > { %v1252_v20 = vmul.f32 1.442695, %v1246_v15  ;;  %v1733_v15 = vld [vmem:[%s2461_s5] ss:$0 sm:$0xff] }
 0x758   : > { %v1243_v23 = vpop.xlane.xlu0 %1242 }
 0x759   : > { %v1247_v16 = vsub.f32 %v1231_v6, %v1243_v23 }
 0x75b   : > { %v1254_v17 = vmul.f32 1.442695, %v1247_v16 }
 0x75d   : > { %1784 = vpow2.f32 %v1254_v17 }
 0x75e   : > { %1786 = vpow2.f32 %v1252_v20 }
 0x75f   : > { %1788 = vpow2.f32 %v1250_v18 }
 0x763   : > { %v1785_v22 = vpop.eup %1784 }
 0x764   : > { %v1265_v25 = vsel %vm386_vm2, %v1785_v22, 0.0  ;;  %v1787_v26 = vpop.eup %1786 }
 0x765   : > { %1266 = vadd.xlane.f32.xlu1 %v1265_v25  ;;  %v1262_v29 = vsel %vm386_vm2, %v1787_v26, 0.0  ;;  %v1789_v30 = vpop.eup %1788 }
 0x766   : > { %v1259_v35 = vsel %vm386_vm2, %v1789_v30, 0.0 }
 0x76b   : > { %v1281_v19 = vpop.permute.xlu0 %1280 }
 0x76c   : > { %v1286_v27 = vsel %vm539_vm1, %v1281_v19, 0 }
 0x76d   : > { %1263 = vadd.xlane.f32.xlu1 %v1262_v29  ;;  %1295 = vmatpush.bf16.msra.mxu2 %v1286_v27 }
 0x773   : > { %v1323_v31 = vpop.permute.xlu0 %1322 }
 0x774   : > { %v1328_v32 = vsel %vm539_vm1, %v1323_v31, 0 }
 0x775   : > { %1260 = vadd.xlane.f32.xlu1 %v1259_v35  ;;  %1337 = vmatpush.bf16.msrb.mxu0 %v1328_v32 }
 0x77b   : > { %v861_v36 = vpop.permute.xlu0 %860 }
 0x77c   : > { %873 = vst.msk [vmem:[#allocation2] sm:$0xff] %vm872_vm3, %v861_v36 }
 0x783   : > { %v1115_v37 = vpop.permute.xlu0 %1114 }
 0x784   : > { %1127 = vst.msk [vmem:[#allocation2] sm:$0xff] %vm1126_vm4, %v1115_v37 }
 0x787   : > { %v1258_v38 = vpop.xlane.xlu2 %1257 }
 0x788   : > { %1790 = vrcp.f32 %v1258_v38 }
 0x78e   : > { %v1791_v39 = vpop.eup %1790  ;;  %1343 = vrot.lane.b32.xlu1 %v2202_v28, %s2011_s15  ;;  %s1932_s15 = sshra.s32 %s1456_s20, 4  ;;  %s1933_s15 = int_to_ptr.hbm [resolvable:$true] %s1932_s15 }
 0x78f   : > { %v1272_v40 = vmul.f32 %v1791_v39, %v1783_v12  ;;  %v1302_v41 = vpop.permute.xlu2 %1301  ;;  %s1934_s25 = scalar_lea.hbm %s1933_s15, 32  ;;  %p1939_p11 = scmp.lt.s32.totalorder %s1933_s15, %s2462_s6 }
 0x790   : > { %v1307_v42 = vsel %vm539_vm1, %v1302_v41, 0  ;;  %p1935_p1 = scmp.ne.s32.totalorder %s1933_s15, %s1934_s25  ;;  %p1940_p9 = scmp.lt.s32.totalorder %s1938_s9, %s1934_s25 }
 0x791   : > { %v1276_v43 = vpack.c.bf16 %v1272_v40, %v1272_v40  ;;  %1316 = vmatpush.bf16.msra.mxu3 %v1307_v42 }
 0x792   : > { %p1936_p4 = pnand %p1935_p1, %p2136_p3  ;;  %p1941_p2 = por %p1940_p9, %p1939_p11 }
 0x793   : > { %1611 = vmatmul.msk.bf16.vlgmr.msra.gmra.mxu2 %vm386_vm2, %v1276_v43 }
 0x794   : > { %p1937_p8 = pneg %p1936_p4 }
 0x796   : > { %864 = vrot.lane.b32.xlu1 %v2320_v34, %s2012_s27  ;;  %p1942_p10 = pnand %p1941_p2, %p1937_p8 }
 0x797   : > { %v863_v44 = vpop.permute.xlu2 %862 }
 0x798   : > { %874 = vst.msk [vmem:[#allocation2 + $0x8] sm:$0xff] %vm872_vm3, %v863_v44 }
 0x79e   : > { %1120 = vrot.lane.b32.xlu1 %v2361_v61, %s2013_s8 }
 0x79f   : > { %v1117_v45 = vpop.permute.xlu2 %1116 }
 0x7a0   : > { %1128 = vst.msk [vmem:[#allocation2 + $0x8] sm:$0xff] %vm1126_vm4, %v1117_v45 }
 0x7d8   : > { %v1267_v28 = vpop.xlane.xlu1 %1266 }
 0x7e0   : > { %v1264_v46 = vpop.xlane.xlu1 %1263 }
 0x7e1   : > { %1792 = vrcp.f32 %v1264_v46 }
 0x7e7   : > { %v1793_v47 = vpop.eup %1792 }
 0x7e8   : > { %v1274_v48 = vmul.f32 %v1793_v47, %v1787_v26  ;;  %v1261_v49 = vpop.xlane.xlu1 %1260 }
 0x7e9   : > { %1794 = vrcp.f32 %v1261_v49 }
 0x7ea   : > { %v1278_v50 = vpack.c.bf16 %v1274_v48, %v1274_v48  ;;  %1796 = vrcp.f32 %v1267_v28 }
 0x7ec   : > { %1613 = vmatmul.msk.bf16.vlgmr.msrb.gmra.mxu0 %vm386_vm2, %v1278_v50 }
 0x7ef   : > { %v1795_v34 = vpop.eup %1794 }
 0x7f0   : > { %v1273_v51 = vmul.f32 %v1795_v34, %v1789_v30  ;;  %v1797_v53 = vpop.eup %1796 }
 0x7f1   : > { %v1275_v54 = vmul.f32 %v1797_v53, %v1785_v22 }
 0x7f2   : > { %v1277_v52 = vpack.c.bf16 %v1273_v51, %v1273_v51 }
 0x7f3   : > { %v1279_v57 = vpack.c.bf16 %v1275_v54, %v1275_v54 }
 0x7f4   : > { %1612 = vmatmul.msk.bf16.vlgmr.msra.gmra.mxu3 %vm386_vm2, %v1277_v52 }
 0x800   : > { %v1344_v55 = vpop.permute.xlu1 %1343 }
 0x801   : > { %v1349_v56 = vsel %vm539_vm1, %v1344_v55, 0 }
 0x802   : > { %1358 = vmatpush.bf16.msra.mxu1 %v1349_v56 }
 0x805   : > { %1614 = vmatmul.msk.bf16.vlgmr.msra.gmra.mxu1 %vm386_vm2, %v1279_v57 }
 0x808   : > { %v865_v58 = vpop.permute.xlu1 %864 }
 0x809   : > { %875 = vst.msk [vmem:[#allocation2 + $0x10] sm:$0xff] %vm872_vm3, %v865_v58 }
 0x810   : > { %v1121_v6 = vpop.permute.xlu1 %1120 }
 0x816   : > { %v1297_v60 = vpop.f32.mrf.mxu2 }
 0x817   : > { %1368 = vrot.lane.b32.xlu0 %v1297_v60, %s2014_s30 }
 0x81e   : > { %v1299_v61 = vpop.f32.mrf.mxu2 }
 0x81f   : > { %866 = vrot.lane.b32.xlu0 %v2318_v33, %s2012_s27  ;;  %v1634_v33 = vld [vmem:[#allocation9 + $0x8] sm:$0xff] }
 0x820   : > { %1423 = vmatpush.bf16.msrb.mxu2 %v1634_v33 }
 0x824   : > { %1424 = vmatpush.bf16.msrb.mxu2 %v1633_v7 }
 0x869   : > { %v1339_v62 = vpop.f32.mrf.mxu0 }
 0x86a   : > { %1372 = vrot.lane.b32.xlu0 %v1339_v62, %s2014_s30 }
 0x871   : > { %v1341_v63 = vpop.f32.mrf.mxu0 }
 0x877   : > { %v1318_v0 = vpop.f32.mrf.mxu3 }
 0x878   : > { %1370 = vrot.lane.b32.xlu2 %v1318_v0, %s2014_s30 }
 0x87f   : > { %v1320_v1 = vpop.f32.mrf.mxu3 }
 0x880   : > { %1118 = vrot.lane.b32.xlu2 %v2359_v59, %s2013_s8 }
 0x882   : > { %v1360_v2 = vpop.f32.mrf.mxu1 }
 0x888   : > { %1374 = vrot.lane.b32.xlu2 %v1360_v2, %s2014_s30 }
 0x889   : > { %v1369_v3 = vpop.permute.xlu0 %1368 }
 0x88a   : > { %1381 = vst.msk [vmem:[#allocation2] sm:$0xff] %vm1380_vm5, %v1369_v3  ;;  %v1362_v4 = vpop.f32.mrf.mxu1 }
 0x891   : > { %v867_v5 = vpop.permute.xlu0 %866  ;;  %v1385_v9 = vld [vmem:[#allocation2] sm:$0xff] }
 0x892   : > { %876 = vst.msk [vmem:[#allocation2 + $0x18] sm:$0xff] %vm872_vm3, %v867_v5 }
 0x893   : > { %1130 = vst.msk [vmem:[#allocation2 + $0x18] sm:$0xff] %vm1126_vm4, %v1121_v6 }
 0x8d2   : > { %v1371_v8 = vpop.permute.xlu2 %1370 }
 0x8d3   : > { %1382 = vst.msk [vmem:[#allocation2 + $0x8] sm:$0xff] %vm1380_vm5, %v1371_v8 }
 0x8da   : > { %v1119_v59 = vpop.permute.xlu2 %1118  ;;  %v1386_v10 = vld [vmem:[#allocation2 + $0x8] sm:$0xff] }
 0x8db   : > { %1129 = vst.msk [vmem:[#allocation2 + $0x10] sm:$0xff] %vm1126_vm4, %v1119_v59  ;;  %v1389_v11 = vpack.c.bf16 %v1386_v10, %v1385_v9 }
 0x8dc   : > { %v1373_v12 = vpop.permute.xlu0 %1372 }
 0x8dd   : > { %1383 = vst.msk [vmem:[#allocation2 + $0x10] sm:$0xff] %vm1380_vm5, %v1373_v12  ;;  %1623 = vmatmul.msk.bf16.vlgmr.msrb.gmra.mxu2 %vm351_vm0, %v1389_v11 }
 0x8e2   : > { %v1375_v14 = vpop.permute.xlu2 %1374 }
 0x8e3   : > { %1384 = vst.msk [vmem:[#allocation2 + $0x18] sm:$0xff] %vm1380_vm5, %v1375_v14 }
 0x8e4   : > { %v1387_v13 = vld [vmem:[#allocation2 + $0x10] sm:$0xff] }
 0x8ea   : > { %v1388_v23 = vld [vmem:[#allocation2 + $0x18] sm:$0xff] }
 0x8eb   : > { %v1390_v16 = vpack.c.bf16 %v1388_v23, %v1387_v13 }
 0x8ed   : > { %1624 = vmatmul.msk.bf16.gmra.mxu2 %vm351_vm0, %v1390_v16 }
 0x960   : > { %v1426_v17 = vpop.f32.mrf.mxu2 }
 0x961   : > { %v1427_v20 = vadd.f32 %v1733_v15, %v1426_v17 }
 0x963   : > { %1436 = vst.msk [vmem:[%s321_s13] sm:$0xff] %vm351_vm0, %v1427_v20 }
 0x968   : > { %v1428_v21 = vpop.f32.mrf.mxu2 }
 0x969   : > { %v1429_v22 = vadd.f32 %v1733_v15, %v1428_v21 }
 0x96b   : > { %1437 = vst.msk [vmem:[%s321_s13 + $0x8] sm:$0xff] %vm351_vm0, %v1429_v22 }
 0x970   : > { %v1431_v24 = vpop.f32.mrf.mxu2 }
 0x971   : > { %v1432_v25 = vadd.f32 %v1733_v15, %v1431_v24 }
 0x973   : > { %1438 = vst.msk [vmem:[%s321_s13 + $0x10] sm:$0xff] %vm351_vm0, %v1432_v25 }
 0x978   : > { %v1433_v18 = vpop.f32.mrf.mxu2 }
 0x979   : > { %v1434_v26 = vadd.f32 %v1733_v15, %v1433_v18 }
 0x97b   : > { %1439 = vst.msk [vmem:[%s321_s13 + $0x18] sm:$0xff] %vm351_vm0, %v1434_v26 }
 0x97c   : > { %1945 = shalt.err (!%p1942_p10)
}
 0x97d   : > { %s2015_s26 = smov 128  }
 0x97e   : > { %1650 = dma.vmem_to_hbm [thread:$0]  (%p2136_p3), %s1454_s7, 512, %s1456_s20, %s1441_s19, %s2015_s26, %s2015_s26, %s2012_s27  }
 0x97f PF: > { %s1470_s13 = sand.u32 1, %s1980_s21   ;;  %p2473_p12 = scmp.ge.s32.totalorder %s1992_s24, 2 }
 0x980   : > { %s1471_s16 = scalar_lea.sflag [#allocation5], %s1470_s13 }
 0x981   : > { %p1667_p13 = pnand %p2473_p12, %p2086_p6 }
 0x983   : > { %p1668_p0 = pneg %p1667_p13 }
 0x985   : > { %1975 = dma.done.wait (%p1668_p0), %s1471_s16, 512  }
 0x986   : > { %1977 = vsyncadd (%p1668_p0), %s1471_s16, 4294966784  ;;  %p21_p5 = scmp.ge.s32.totalorder %s2123_s10, 4   ;;  %s2474_s21 = smov %s1984_s22 }
 0x987   : > { %s2475_s22 = smov %s1988_s23  ;;  %s2476_s23 = smov %s2132_s14 }
 0x988   : > { %s2477_s24 = smov %s2123_s10  ;;  %23 = sbr.rel (!%p21_p5) target bundleno = 7 (0x7), region = 104 }
 0x98d   :  { %1477 = vsyncpa [#allocation4], 1 }
 0x98e   :  { %1479 = vsyncpa [#allocation4 + $0x1], 1 }
 0x98f   :  { %1480 = vsyncpa [#allocation7], 1 }
 0x990   :  { %1481 = vsyncpa [#allocation10], 1 }
 0x991   :  { %1482 = vsyncpa [#allocation5], 1 }
 0x992   :  { %1484 = vsyncpa [#allocation5 + $0x1], 1 }

</bundles_post_ra>
